<compile_context>
chip_gen: v7x
topology: tpu7x:2x2x1
jax: 0.10.0
libtpu: 0.0.40
codegen_flags: <defaults>
</compile_context>

<pallas_src>
import functools

import jax
import jax.numpy as jnp
from jax import lax
from jax.experimental import pallas as pl
from jax.experimental.pallas import tpu as pltpu


# ----------------------------------------------------------------------------
# Fused kernel: deconv(k3,s2,p1) + 3x (conv3x3 'same' + ReLU), one image/step
# ----------------------------------------------------------------------------
def _decoding_block_kernel(x_ref, e_ref, m_ref, w_ref, b_ref, o_ref,
                           xplane, plane_a, plane_b, *, Wp, G, Cout):
    f32 = jnp.float32
    P = e_ref.shape[1]

    # Guard columns (and phantom channel rows) must read as zero; a full clear
    # of a (Cs, R) channel-major plane is only ~11 vreg stores.
    xplane[...] = jnp.zeros_like(xplane)
    plane_a[...] = jnp.zeros_like(plane_a)
    plane_b[...] = jnp.zeros_like(plane_b)

    # Stage 0: stride-2 zero-dilation of the whole image with ONE matmul
    # against the precomputed 0/1 expansion matrix, then one bulk store.
    xdil = jnp.dot(x_ref[0].astype(f32), e_ref[...],
                   preferred_element_type=f32)             # (Cs, P)
    xplane[:, G:G + P] = xdil

    mask = m_ref[...]                                       # (1, P)
    offs = [G + (kh - 1) * Wp + (kw - 1) for kh in range(3) for kw in range(3)]

    def conv3x3(src, layer, relu):
        # im2col: stack the 9 lane-shifted taps on the contraction axis and do
        # a single (Cout, 9*Cs) @ (9*Cs, P) matmul; bias broadcasts over lanes.
        stacked = jnp.concatenate([src[:, o:o + P] for o in offs], axis=0)
        acc = jnp.dot(w_ref[layer], stacked,
                      preferred_element_type=f32) + b_ref[layer]
        if relu:
            acc = jnp.maximum(acc, 0.0)
        return acc                                          # (Cout, P)

    # layer 0: ConvTranspose2d(k3,s2,p1) == 3x3 conv over the dilated plane
    a = conv3x3(xplane, 0, relu=False)
    plane_a[:Cout, G:G + P] = a * mask
    # layers 1..3: Conv2d(k3,s1,'same') + ReLU, ping-pong between VMEM planes
    a = conv3x3(plane_a, 1, relu=True)
    plane_b[:Cout, G:G + P] = a * mask
    a = conv3x3(plane_b, 2, relu=True)
    plane_a[:Cout, G:G + P] = a * mask
    a = conv3x3(plane_a, 3, relu=True)

    # Lane-dense channel-first bulk store of the whole padded plane.
    o_ref[0] = a.astype(o_ref.dtype)


# ----------------------------------------------------------------------------
# DecodingBlock forward (NCHW in / NCHW out, like the PyTorch module)
# ----------------------------------------------------------------------------
def decoding_block_pallas(x_nchw, params):
    N, Cin, H, W = x_nchw.shape
    Cout = params["bt"].shape[0]
    Ho, Wo = 2 * H - 1, 2 * W - 1          # deconv output spatial size
    Hp, Wp = Ho + 2, Wo + 2                # +1 halo ring on each side
    P = Hp * Wp
    G = -(-(Wp + 1) // 128) * 128          # lane-aligned guard width (>= Wp+1)
    R = 2 * G + P
    Cs = -(-max(Cin, Cout) // 8) * 8       # plane channel rows (sublane-padded)

    f32 = jnp.float32

    # ---- tiny host-side prep (constants + weight packing, all well under 2 MB)
    x_flat = x_nchw.reshape(N, Cin, H * W).astype(f32)
    if Cs > Cin:
        x_flat = jnp.concatenate(
            [x_flat, jnp.zeros((N, Cs - Cin, H * W), f32)], axis=1)

    # 0/1 expansion: x[c, iy*W+ix] -> padded-plane pixel (2*iy+1, 2*ix+1).
    rows = jnp.arange(H * W, dtype=jnp.int32)
    cols = (2 * (rows // W) + 1) * Wp + (2 * (rows % W) + 1)
    expand = jnp.zeros((H * W, P), f32).at[rows, cols].set(1.0)

    # Interior mask of the padded plane (zeroes the halo ring between layers).
    pidx = jnp.arange(P, dtype=jnp.int32)
    pr, pc = pidx // Wp, pidx % Wp
    mask = (((pr >= 1) & (pr <= Hp - 2) & (pc >= 1) & (pc <= Wp - 2))
            .astype(f32).reshape(1, P))

    def pack_weight(w_hwio, cin):
        # (3,3,cin,Cout) -> (Cout, 9*Cs); K index = (kh*3+kw)*Cs + cin_idx,
        # matching the in-kernel concat order (kh outer, kw inner, channel last).
        wp = jnp.zeros((3, 3, Cs, Cout), f32)
        wp = wp.at[:, :, :cin, :].set(w_hwio.astype(f32))
        return wp.reshape(9 * Cs, Cout).T

    # ConvTranspose2d weight -> equivalent dense-conv weight (flip + reorder).
    w0_hwio = jnp.transpose(params["wt"][:, :, ::-1, ::-1], (2, 3, 0, 1))
    w_all = jnp.stack([pack_weight(w0_hwio, Cin),
                       pack_weight(params["w1"], Cout),
                       pack_weight(params["w2"], Cout),
                       pack_weight(params["w3"], Cout)])        # (4, Cout, 9*Cs)
    b_all = jnp.stack([params["bt"], params["b1"],
                       params["b2"], params["b3"]]).astype(f32).reshape(4, Cout, 1)

    kernel = functools.partial(_decoding_block_kernel, Wp=Wp, G=G, Cout=Cout)

    def cspec(shape):      # grid-invariant input (DMA'd once, stays in VMEM)
        return pl.BlockSpec(shape, lambda n, _r=len(shape): (0,) * _r)

    out_flat = pl.pallas_call(
        kernel,
        out_shape=jax.ShapeDtypeStruct((N, Cout, P), x_nchw.dtype),
        grid_spec=pltpu.PrefetchScalarGridSpec(
            num_scalar_prefetch=0,
            grid=(N,),
            in_specs=[
                pl.BlockSpec((1, Cs, H * W), lambda n: (n, 0, 0)),
                cspec((H * W, P)),          # expansion matrix
                cspec((1, P)),              # interior mask
                cspec((4, Cout, 9 * Cs)),   # packed weights (all 4 layers)
                cspec((4, Cout, 1)),        # packed biases
            ],
            out_specs=pl.BlockSpec((1, Cout, P), lambda n: (n, 0, 0)),
            scratch_shapes=[
                pltpu.VMEM((Cs, R), jnp.float32),   # dilated-input plane
                pltpu.VMEM((Cs, R), jnp.float32),   # activation ping
                pltpu.VMEM((Cs, R), jnp.float32),   # activation pong
            ],
        ),
        compiler_params=pltpu.CompilerParams(
            dimension_semantics=("parallel",),      # v7x: batch over 2 TCs
        ),
    )(x_flat, expand, mask, w_all, b_all)

    # Strip the halo ring; output is already channel-first (NCHW).
    return out_flat.reshape(N, Cout, Hp, Wp)[:, :, 1:-1, 1:-1]


# ----------------------------------------------------------------------------
# Pure-JAX reference (lax.conv_general_dilated) for verification
# ----------------------------------------------------------------------------
def decoding_block_ref(x_nchw, params):
    dn = ("NHWC", "HWIO", "NHWC")
    x = jnp.transpose(x_nchw, (0, 2, 3, 1))
    w_conv = jnp.transpose(params["wt"][:, :, ::-1, ::-1], (2, 3, 0, 1))
    y = lax.conv_general_dilated(
        x, w_conv, window_strides=(1, 1), padding=((1, 1), (1, 1)),
        lhs_dilation=(2, 2), dimension_numbers=dn,
    ) + params["bt"]
    for wk, bk in (("w1", "b1"), ("w2", "b2"), ("w3", "b3")):
        y = lax.conv_general_dilated(
            y, params[wk], window_strides=(1, 1), padding=((1, 1), (1, 1)),
            dimension_numbers=dn,
        ) + params[bk]
        y = jnp.maximum(y, 0.0)
    return jnp.transpose(y, (0, 3, 1, 2))


if __name__ == "__main__":
    key = jax.random.PRNGKey(0)
    N, Cin, Cout, H, W = 2, 4, 8, 16, 16
    ks = jax.random.split(key, 9)

    x_nchw = jax.random.normal(ks[0], (N, Cin, H, W), dtype=jnp.float32)

    def hwio(w_pt):  # PyTorch Conv2d weight (Cout, Cin, kh, kw) -> HWIO
        return jnp.transpose(w_pt, (2, 3, 1, 0))

    params = {
        # ConvTranspose2d weight keeps its native (Cin, Cout, kh, kw) layout.
        "wt": 0.1 * jax.random.normal(ks[1], (Cin, Cout, 3, 3), jnp.float32),
        "bt": 0.1 * jax.random.normal(ks[2], (Cout,), jnp.float32),
        "w1": hwio(0.1 * jax.random.normal(ks[3], (Cout, Cout, 3, 3), jnp.float32)),
        "b1": 0.1 * jax.random.normal(ks[4], (Cout,), jnp.float32),
        "w2": hwio(0.1 * jax.random.normal(ks[5], (Cout, Cout, 3, 3), jnp.float32)),
        "b2": 0.1 * jax.random.normal(ks[6], (Cout,), jnp.float32),
        "w3": hwio(0.1 * jax.random.normal(ks[7], (Cout, Cout, 3, 3), jnp.float32)),
        "b3": 0.1 * jax.random.normal(ks[8], (Cout,), jnp.float32),
    }

    out = decoding_block_pallas(x_nchw, params)
    out = jax.block_until_ready(out)
    assert out.shape == (N, Cout, 2 * H - 1, 2 * W - 1), out.shape

    ref = jax.block_until_ready(decoding_block_ref(x_nchw, params))
    assert jnp.allclose(out, ref, rtol=1e-4, atol=1e-4), float(
        jnp.max(jnp.abs(out - ref))
    )

    print("KERNEL_OK")
</pallas_src>

<mosaic_0001>
module attributes {stable_mosaic.version = 11 : i64} {
  func.func @_decoding_block_kernel(%arg0: i32, %arg1: memref<1x8x256xf32, #tpu.memory_space<vmem>>, %arg2: memref<256x1089xf32, #tpu.memory_space<vmem>>, %arg3: memref<1x1089xf32, #tpu.memory_space<vmem>>, %arg4: memref<4x8x72xf32, #tpu.memory_space<vmem>>, %arg5: memref<4x8x1xf32, #tpu.memory_space<vmem>>, %arg6: memref<1x8x1089xf32, #tpu.memory_space<vmem>>, %arg7: memref<8x1345xf32, #tpu.memory_space<vmem>>, %arg8: memref<8x1345xf32, #tpu.memory_space<vmem>>, %arg9: memref<8x1345xf32, #tpu.memory_space<vmem>>) attributes {dimension_semantics = [#tpu.dimension_semantics<parallel>], iteration_bounds = array<i64: 2>, scalar_prefetch = 0 : i64, scratch_operands = 3 : i64, tpu.core_type = #tpu.core_type<tc>, window_params = [{transform_indices = @transform_0, window_bounds = array<i64: 1, 8, 256>}, {pipeline_mode = #tpu.pipeline_mode<synchronous>, transform_indices = @transform_1, window_bounds = array<i64: 256, 1089>}, {pipeline_mode = #tpu.pipeline_mode<synchronous>, transform_indices = @transform_2, window_bounds = array<i64: 1, 1089>}, {pipeline_mode = #tpu.pipeline_mode<synchronous>, transform_indices = @transform_3, window_bounds = array<i64: 4, 8, 72>}, {pipeline_mode = #tpu.pipeline_mode<synchronous>, transform_indices = @transform_4, window_bounds = array<i64: 4, 8, 1>}, {transform_indices = @transform_5, window_bounds = array<i64: 1, 8, 1089>}]} {
    %cst = arith.constant 0.000000e+00 : f32
    %0 = vector.broadcast %cst : f32 to vector<8x1345xf32>
    %c0 = arith.constant 0 : index
    %c0_0 = arith.constant 0 : index
    %1 = vector.load %arg7[%c0, %c0_0] : memref<8x1345xf32, #tpu.memory_space<vmem>>, vector<8x1345xf32>
    tpu.vector_store %arg7[%c0, %c0_0], %0 {strides = array<i32>} : memref<8x1345xf32, #tpu.memory_space<vmem>>, vector<8x1345xf32>,
    %cst_1 = arith.constant 0.000000e+00 : f32
    %2 = vector.broadcast %cst_1 : f32 to vector<8x1345xf32>
    %c0_2 = arith.constant 0 : index
    %c0_3 = arith.constant 0 : index
    %3 = vector.load %arg8[%c0_2, %c0_3] : memref<8x1345xf32, #tpu.memory_space<vmem>>, vector<8x1345xf32>
    tpu.vector_store %arg8[%c0_2, %c0_3], %2 {strides = array<i32>} : memref<8x1345xf32, #tpu.memory_space<vmem>>, vector<8x1345xf32>,
    %cst_4 = arith.constant 0.000000e+00 : f32
    %4 = vector.broadcast %cst_4 : f32 to vector<8x1345xf32>
    %c0_5 = arith.constant 0 : index
    %c0_6 = arith.constant 0 : index
    %5 = vector.load %arg9[%c0_5, %c0_6] : memref<8x1345xf32, #tpu.memory_space<vmem>>, vector<8x1345xf32>
    tpu.vector_store %arg9[%c0_5, %c0_6], %4 {strides = array<i32>} : memref<8x1345xf32, #tpu.memory_space<vmem>>, vector<8x1345xf32>,
    %c0_7 = arith.constant 0 : index
    %c0_8 = arith.constant 0 : index
    %c0_9 = arith.constant 0 : index
    %6 = vector.load %arg1[%c0_7, %c0_8, %c0_9] : memref<1x8x256xf32, #tpu.memory_space<vmem>>, vector<1x8x256xf32>
    %7 = vector.shape_cast %6 : vector<1x8x256xf32> to vector<8x256xf32>
    %c0_10 = arith.constant 0 : index
    %c0_11 = arith.constant 0 : index
    %8 = vector.load %arg2[%c0_10, %c0_11] : memref<256x1089xf32, #tpu.memory_space<vmem>>, vector<256x1089xf32>
    %cst_12 = arith.constant dense<0.000000e+00> : vector<8x1089xf32>
    %9 = tpu.matmul %7, %8, %cst_12 {dimension_numbers = #tpu.dot_dimension_numbers<[1], [0], [0], [1], [0, 0, 1, 1], [], []>} : vector<8x256xf32>, vector<256x1089xf32>, vector<8x1089xf32> -> vector<8x1089xf32>
    %c0_13 = arith.constant 0 : index
    %c128 = arith.constant 128 : index
    %10 = vector.load %arg7[%c0_13, %c128] : memref<8x1345xf32, #tpu.memory_space<vmem>>, vector<8x1089xf32>
    tpu.vector_store %arg7[%c0_13, %c128], %9 {strides = array<i32>} : memref<8x1345xf32, #tpu.memory_space<vmem>>, vector<8x1089xf32>,
    %c0_14 = arith.constant 0 : index
    %c0_15 = arith.constant 0 : index
    %11 = vector.load %arg3[%c0_14, %c0_15] : memref<1x1089xf32, #tpu.memory_space<vmem>>, vector<1x1089xf32>
    %c0_16 = arith.constant 0 : index
    %c94 = arith.constant 94 : index
    %12 = vector.load %arg7[%c0_16, %c94] : memref<8x1345xf32, #tpu.memory_space<vmem>>, vector<8x1089xf32>
    %c0_17 = arith.constant 0 : index
    %c95 = arith.constant 95 : index
    %13 = vector.load %arg7[%c0_17, %c95] : memref<8x1345xf32, #tpu.memory_space<vmem>>, vector<8x1089xf32>
    %c0_18 = arith.constant 0 : index
    %c96 = arith.constant 96 : index
    %14 = vector.load %arg7[%c0_18, %c96] : memref<8x1345xf32, #tpu.memory_space<vmem>>, vector<8x1089xf32>
    %c0_19 = arith.constant 0 : index
    %c127 = arith.constant 127 : index
    %15 = vector.load %arg7[%c0_19, %c127] : memref<8x1345xf32, #tpu.memory_space<vmem>>, vector<8x1089xf32>
    %c0_20 = arith.constant 0 : index
    %c128_21 = arith.constant 128 : index
    %16 = vector.load %arg7[%c0_20, %c128_21] : memref<8x1345xf32, #tpu.memory_space<vmem>>, vector<8x1089xf32>
    %c0_22 = arith.constant 0 : index
    %c129 = arith.constant 129 : index
    %17 = vector.load %arg7[%c0_22, %c129] : memref<8x1345xf32, #tpu.memory_space<vmem>>, vector<8x1089xf32>
    %c0_23 = arith.constant 0 : index
    %c160 = arith.constant 160 : index
    %18 = vector.load %arg7[%c0_23, %c160] : memref<8x1345xf32, #tpu.memory_space<vmem>>, vector<8x1089xf32>
    %c0_24 = arith.constant 0 : index
    %c161 = arith.constant 161 : index
    %19 = vector.load %arg7[%c0_24, %c161] : memref<8x1345xf32, #tpu.memory_space<vmem>>, vector<8x1089xf32>
    %c0_25 = arith.constant 0 : index
    %c162 = arith.constant 162 : index
    %20 = vector.load %arg7[%c0_25, %c162] : memref<8x1345xf32, #tpu.memory_space<vmem>>, vector<8x1089xf32>
    %21 = tpu.concatenate %12, %13, %14, %15, %16, %17, %18, %19, %20 in 0 : vector<8x1089xf32>, vector<8x1089xf32>, vector<8x1089xf32>, vector<8x1089xf32>, vector<8x1089xf32>, vector<8x1089xf32>, vector<8x1089xf32>, vector<8x1089xf32>, vector<8x1089xf32> -> vector<72x1089xf32>
    %c0_26 = arith.constant 0 : index
    %c0_27 = arith.constant 0 : index
    %c0_28 = arith.constant 0 : index
    %22 = vector.load %arg4[%c0_26, %c0_27, %c0_28] : memref<4x8x72xf32, #tpu.memory_space<vmem>>, vector<1x8x72xf32>
    %23 = vector.shape_cast %22 : vector<1x8x72xf32> to vector<8x72xf32>
    %cst_29 = arith.constant dense<0.000000e+00> : vector<8x1089xf32>
    %24 = tpu.matmul %23, %21, %cst_29 {dimension_numbers = #tpu.dot_dimension_numbers<[1], [0], [0], [1], [0, 0, 1, 1], [], []>} : vector<8x72xf32>, vector<72x1089xf32>, vector<8x1089xf32> -> vector<8x1089xf32>
    %c0_30 = arith.constant 0 : index
    %c0_31 = arith.constant 0 : index
    %c0_32 = arith.constant 0 : index
    %25 = vector.load %arg5[%c0_30, %c0_31, %c0_32] : memref<4x8x1xf32, #tpu.memory_space<vmem>>, vector<1x8x1xf32>
    %26 = vector.shape_cast %25 : vector<1x8x1xf32> to vector<8x1xf32>
    %27 = vector.broadcast %26 : vector<8x1xf32> to vector<8x1089xf32>
    %28 = arith.addf %24, %27 : vector<8x1089xf32>
    %29 = vector.broadcast %11 : vector<1x1089xf32> to vector<8x1089xf32>
    %30 = arith.mulf %28, %29 : vector<8x1089xf32>
    %c0_33 = arith.constant 0 : index
    %c128_34 = arith.constant 128 : index
    %31 = vector.load %arg8[%c0_33, %c128_34] : memref<8x1345xf32, #tpu.memory_space<vmem>>, vector<8x1089xf32>
    tpu.vector_store %arg8[%c0_33, %c128_34], %30 {strides = array<i32>} : memref<8x1345xf32, #tpu.memory_space<vmem>>, vector<8x1089xf32>,
    %c0_35 = arith.constant 0 : index
    %c94_36 = arith.constant 94 : index
    %32 = vector.load %arg8[%c0_35, %c94_36] : memref<8x1345xf32, #tpu.memory_space<vmem>>, vector<8x1089xf32>
    %c0_37 = arith.constant 0 : index
    %c95_38 = arith.constant 95 : index
    %33 = vector.load %arg8[%c0_37, %c95_38] : memref<8x1345xf32, #tpu.memory_space<vmem>>, vector<8x1089xf32>
    %c0_39 = arith.constant 0 : index
    %c96_40 = arith.constant 96 : index
    %34 = vector.load %arg8[%c0_39, %c96_40] : memref<8x1345xf32, #tpu.memory_space<vmem>>, vector<8x1089xf32>
    %c0_41 = arith.constant 0 : index
    %c127_42 = arith.constant 127 : index
    %35 = vector.load %arg8[%c0_41, %c127_42] : memref<8x1345xf32, #tpu.memory_space<vmem>>, vector<8x1089xf32>
    %c0_43 = arith.constant 0 : index
    %c128_44 = arith.constant 128 : index
    %36 = vector.load %arg8[%c0_43, %c128_44] : memref<8x1345xf32, #tpu.memory_space<vmem>>, vector<8x1089xf32>
    %c0_45 = arith.constant 0 : index
    %c129_46 = arith.constant 129 : index
    %37 = vector.load %arg8[%c0_45, %c129_46] : memref<8x1345xf32, #tpu.memory_space<vmem>>, vector<8x1089xf32>
    %c0_47 = arith.constant 0 : index
    %c160_48 = arith.constant 160 : index
    %38 = vector.load %arg8[%c0_47, %c160_48] : memref<8x1345xf32, #tpu.memory_space<vmem>>, vector<8x1089xf32>
    %c0_49 = arith.constant 0 : index
    %c161_50 = arith.constant 161 : index
    %39 = vector.load %arg8[%c0_49, %c161_50] : memref<8x1345xf32, #tpu.memory_space<vmem>>, vector<8x1089xf32>
    %c0_51 = arith.constant 0 : index
    %c162_52 = arith.constant 162 : index
    %40 = vector.load %arg8[%c0_51, %c162_52] : memref<8x1345xf32, #tpu.memory_space<vmem>>, vector<8x1089xf32>
    %41 = tpu.concatenate %32, %33, %34, %35, %36, %37, %38, %39, %40 in 0 : vector<8x1089xf32>, vector<8x1089xf32>, vector<8x1089xf32>, vector<8x1089xf32>, vector<8x1089xf32>, vector<8x1089xf32>, vector<8x1089xf32>, vector<8x1089xf32>, vector<8x1089xf32> -> vector<72x1089xf32>
    %c1 = arith.constant 1 : index
    %c0_53 = arith.constant 0 : index
    %c0_54 = arith.constant 0 : index
    %42 = vector.load %arg4[%c1, %c0_53, %c0_54] : memref<4x8x72xf32, #tpu.memory_space<vmem>>, vector<1x8x72xf32>
    %43 = vector.shape_cast %42 : vector<1x8x72xf32> to vector<8x72xf32>
    %cst_55 = arith.constant dense<0.000000e+00> : vector<8x1089xf32>
    %44 = tpu.matmul %43, %41, %cst_55 {dimension_numbers = #tpu.dot_dimension_numbers<[1], [0], [0], [1], [0, 0, 1, 1], [], []>} : vector<8x72xf32>, vector<72x1089xf32>, vector<8x1089xf32> -> vector<8x1089xf32>
    %c1_56 = arith.constant 1 : index
    %c0_57 = arith.constant 0 : index
    %c0_58 = arith.constant 0 : index
    %45 = vector.load %arg5[%c1_56, %c0_57, %c0_58] : memref<4x8x1xf32, #tpu.memory_space<vmem>>, vector<1x8x1xf32>
    %46 = vector.shape_cast %45 : vector<1x8x1xf32> to vector<8x1xf32>
    %47 = vector.broadcast %46 : vector<8x1xf32> to vector<8x1089xf32>
    %48 = arith.addf %44, %47 : vector<8x1089xf32>
    %cst_59 = arith.constant 0.000000e+00 : f32
    %49 = vector.broadcast %cst_59 : f32 to vector<8x1089xf32>
    %50 = arith.maximumf %48, %49 : vector<8x1089xf32>
    %51 = vector.broadcast %11 : vector<1x1089xf32> to vector<8x1089xf32>
    %52 = arith.mulf %50, %51 : vector<8x1089xf32>
    %c0_60 = arith.constant 0 : index
    %c128_61 = arith.constant 128 : index
    %53 = vector.load %arg9[%c0_60, %c128_61] : memref<8x1345xf32, #tpu.memory_space<vmem>>, vector<8x1089xf32>
    tpu.vector_store %arg9[%c0_60, %c128_61], %52 {strides = array<i32>} : memref<8x1345xf32, #tpu.memory_space<vmem>>, vector<8x1089xf32>,
    %c0_62 = arith.constant 0 : index
    %c94_63 = arith.constant 94 : index
    %54 = vector.load %arg9[%c0_62, %c94_63] : memref<8x1345xf32, #tpu.memory_space<vmem>>, vector<8x1089xf32>
    %c0_64 = arith.constant 0 : index
    %c95_65 = arith.constant 95 : index
    %55 = vector.load %arg9[%c0_64, %c95_65] : memref<8x1345xf32, #tpu.memory_space<vmem>>, vector<8x1089xf32>
    %c0_66 = arith.constant 0 : index
    %c96_67 = arith.constant 96 : index
    %56 = vector.load %arg9[%c0_66, %c96_67] : memref<8x1345xf32, #tpu.memory_space<vmem>>, vector<8x1089xf32>
    %c0_68 = arith.constant 0 : index
    %c127_69 = arith.constant 127 : index
    %57 = vector.load %arg9[%c0_68, %c127_69] : memref<8x1345xf32, #tpu.memory_space<vmem>>, vector<8x1089xf32>
    %c0_70 = arith.constant 0 : index
    %c128_71 = arith.constant 128 : index
    %58 = vector.load %arg9[%c0_70, %c128_71] : memref<8x1345xf32, #tpu.memory_space<vmem>>, vector<8x1089xf32>
    %c0_72 = arith.constant 0 : index
    %c129_73 = arith.constant 129 : index
    %59 = vector.load %arg9[%c0_72, %c129_73] : memref<8x1345xf32, #tpu.memory_space<vmem>>, vector<8x1089xf32>
    %c0_74 = arith.constant 0 : index
    %c160_75 = arith.constant 160 : index
    %60 = vector.load %arg9[%c0_74, %c160_75] : memref<8x1345xf32, #tpu.memory_space<vmem>>, vector<8x1089xf32>
    %c0_76 = arith.constant 0 : index
    %c161_77 = arith.constant 161 : index
    %61 = vector.load %arg9[%c0_76, %c161_77] : memref<8x1345xf32, #tpu.memory_space<vmem>>, vector<8x1089xf32>
    %c0_78 = arith.constant 0 : index
    %c162_79 = arith.constant 162 : index
    %62 = vector.load %arg9[%c0_78, %c162_79] : memref<8x1345xf32, #tpu.memory_space<vmem>>, vector<8x1089xf32>
    %63 = tpu.concatenate %54, %55, %56, %57, %58, %59, %60, %61, %62 in 0 : vector<8x1089xf32>, vector<8x1089xf32>, vector<8x1089xf32>, vector<8x1089xf32>, vector<8x1089xf32>, vector<8x1089xf32>, vector<8x1089xf32>, vector<8x1089xf32>, vector<8x1089xf32> -> vector<72x1089xf32>
    %c2 = arith.constant 2 : index
    %c0_80 = arith.constant 0 : index
    %c0_81 = arith.constant 0 : index
    %64 = vector.load %arg4[%c2, %c0_80, %c0_81] : memref<4x8x72xf32, #tpu.memory_space<vmem>>, vector<1x8x72xf32>
    %65 = vector.shape_cast %64 : vector<1x8x72xf32> to vector<8x72xf32>
    %cst_82 = arith.constant dense<0.000000e+00> : vector<8x1089xf32>
    %66 = tpu.matmul %65, %63, %cst_82 {dimension_numbers = #tpu.dot_dimension_numbers<[1], [0], [0], [1], [0, 0, 1, 1], [], []>} : vector<8x72xf32>, vector<72x1089xf32>, vector<8x1089xf32> -> vector<8x1089xf32>
    %c2_83 = arith.constant 2 : index
    %c0_84 = arith.constant 0 : index
    %c0_85 = arith.constant 0 : index
    %67 = vector.load %arg5[%c2_83, %c0_84, %c0_85] : memref<4x8x1xf32, #tpu.memory_space<vmem>>, vector<1x8x1xf32>
    %68 = vector.shape_cast %67 : vector<1x8x1xf32> to vector<8x1xf32>
    %69 = vector.broadcast %68 : vector<8x1xf32> to vector<8x1089xf32>
    %70 = arith.addf %66, %69 : vector<8x1089xf32>
    %cst_86 = arith.constant 0.000000e+00 : f32
    %71 = vector.broadcast %cst_86 : f32 to vector<8x1089xf32>
    %72 = arith.maximumf %70, %71 : vector<8x1089xf32>
    %73 = vector.broadcast %11 : vector<1x1089xf32> to vector<8x1089xf32>
    %74 = arith.mulf %72, %73 : vector<8x1089xf32>
    %c0_87 = arith.constant 0 : index
    %c128_88 = arith.constant 128 : index
    %75 = vector.load %arg8[%c0_87, %c128_88] : memref<8x1345xf32, #tpu.memory_space<vmem>>, vector<8x1089xf32>
    tpu.vector_store %arg8[%c0_87, %c128_88], %74 {strides = array<i32>} : memref<8x1345xf32, #tpu.memory_space<vmem>>, vector<8x1089xf32>,
    %c0_89 = arith.constant 0 : index
    %c94_90 = arith.constant 94 : index
    %76 = vector.load %arg8[%c0_89, %c94_90] : memref<8x1345xf32, #tpu.memory_space<vmem>>, vector<8x1089xf32>
    %c0_91 = arith.constant 0 : index
    %c95_92 = arith.constant 95 : index
    %77 = vector.load %arg8[%c0_91, %c95_92] : memref<8x1345xf32, #tpu.memory_space<vmem>>, vector<8x1089xf32>
    %c0_93 = arith.constant 0 : index
    %c96_94 = arith.constant 96 : index
    %78 = vector.load %arg8[%c0_93, %c96_94] : memref<8x1345xf32, #tpu.memory_space<vmem>>, vector<8x1089xf32>
    %c0_95 = arith.constant 0 : index
    %c127_96 = arith.constant 127 : index
    %79 = vector.load %arg8[%c0_95, %c127_96] : memref<8x1345xf32, #tpu.memory_space<vmem>>, vector<8x1089xf32>
    %c0_97 = arith.constant 0 : index
    %c128_98 = arith.constant 128 : index
    %80 = vector.load %arg8[%c0_97, %c128_98] : memref<8x1345xf32, #tpu.memory_space<vmem>>, vector<8x1089xf32>
    %c0_99 = arith.constant 0 : index
    %c129_100 = arith.constant 129 : index
    %81 = vector.load %arg8[%c0_99, %c129_100] : memref<8x1345xf32, #tpu.memory_space<vmem>>, vector<8x1089xf32>
    %c0_101 = arith.constant 0 : index
    %c160_102 = arith.constant 160 : index
    %82 = vector.load %arg8[%c0_101, %c160_102] : memref<8x1345xf32, #tpu.memory_space<vmem>>, vector<8x1089xf32>
    %c0_103 = arith.constant 0 : index
    %c161_104 = arith.constant 161 : index
    %83 = vector.load %arg8[%c0_103, %c161_104] : memref<8x1345xf32, #tpu.memory_space<vmem>>, vector<8x1089xf32>
    %c0_105 = arith.constant 0 : index
    %c162_106 = arith.constant 162 : index
    %84 = vector.load %arg8[%c0_105, %c162_106] : memref<8x1345xf32, #tpu.memory_space<vmem>>, vector<8x1089xf32>
    %85 = tpu.concatenate %76, %77, %78, %79, %80, %81, %82, %83, %84 in 0 : vector<8x1089xf32>, vector<8x1089xf32>, vector<8x1089xf32>, vector<8x1089xf32>, vector<8x1089xf32>, vector<8x1089xf32>, vector<8x1089xf32>, vector<8x1089xf32>, vector<8x1089xf32> -> vector<72x1089xf32>
    %c3 = arith.constant 3 : index
    %c0_107 = arith.constant 0 : index
    %c0_108 = arith.constant 0 : index
    %86 = vector.load %arg4[%c3, %c0_107, %c0_108] : memref<4x8x72xf32, #tpu.memory_space<vmem>>, vector<1x8x72xf32>
    %87 = vector.shape_cast %86 : vector<1x8x72xf32> to vector<8x72xf32>
    %cst_109 = arith.constant dense<0.000000e+00> : vector<8x1089xf32>
    %88 = tpu.matmul %87, %85, %cst_109 {dimension_numbers = #tpu.dot_dimension_numbers<[1], [0], [0], [1], [0, 0, 1, 1], [], []>} : vector<8x72xf32>, vector<72x1089xf32>, vector<8x1089xf32> -> vector<8x1089xf32>
    %c3_110 = arith.constant 3 : index
    %c0_111 = arith.constant 0 : index
    %c0_112 = arith.constant 0 : index
    %89 = vector.load %arg5[%c3_110, %c0_111, %c0_112] : memref<4x8x1xf32, #tpu.memory_space<vmem>>, vector<1x8x1xf32>
    %90 = vector.shape_cast %89 : vector<1x8x1xf32> to vector<8x1xf32>
    %91 = vector.broadcast %90 : vector<8x1xf32> to vector<8x1089xf32>
    %92 = arith.addf %88, %91 : vector<8x1089xf32>
    %cst_113 = arith.constant 0.000000e+00 : f32
    %93 = vector.broadcast %cst_113 : f32 to vector<8x1089xf32>
    %94 = arith.maximumf %92, %93 : vector<8x1089xf32>
    %c0_114 = arith.constant 0 : index
    %c0_115 = arith.constant 0 : index
    %c0_116 = arith.constant 0 : index
    %95 = vector.load %arg6[%c0_114, %c0_115, %c0_116] : memref<1x8x1089xf32, #tpu.memory_space<vmem>>, vector<1x8x1089xf32>
    %96 = vector.shape_cast %95 : vector<1x8x1089xf32> to vector<8x1089xf32>
    %97 = vector.shape_cast %94 : vector<8x1089xf32> to vector<1x8x1089xf32>
    tpu.vector_store %arg6[%c0_114, %c0_115, %c0_116], %97 {strides = array<i32>} : memref<1x8x1089xf32, #tpu.memory_space<vmem>>, vector<1x8x1089xf32>,
    return
  }
  func.func @transform_0(%arg0: i32) -> (i32, i32, i32) {
    %c0_i32 = arith.constant 0 : i32
    %c0_i32_0 = arith.constant 0 : i32
    %c0_i32_1 = arith.constant 0 : i32
    return %arg0, %c0_i32, %c0_i32_0 : i32, i32, i32
  }
  func.func @transform_1(%arg0: i32) -> (i32, i32) {
    %c0_i32 = arith.constant 0 : i32
    %c0_i32_0 = arith.constant 0 : i32
    %c0_i32_1 = arith.constant 0 : i32
    return %c0_i32, %c0_i32_0 : i32, i32
  }
  func.func @transform_2(%arg0: i32) -> (i32, i32) {
    %c0_i32 = arith.constant 0 : i32
    %c0_i32_0 = arith.constant 0 : i32
    %c0_i32_1 = arith.constant 0 : i32
    return %c0_i32, %c0_i32_0 : i32, i32
  }
  func.func @transform_3(%arg0: i32) -> (i32, i32, i32) {
    %c0_i32 = arith.constant 0 : i32
    %c0_i32_0 = arith.constant 0 : i32
    %c0_i32_1 = arith.constant 0 : i32
    %c0_i32_2 = arith.constant 0 : i32
    return %c0_i32, %c0_i32_0, %c0_i32_1 : i32, i32, i32
  }
  func.func @transform_4(%arg0: i32) -> (i32, i32, i32) {
    %c0_i32 = arith.constant 0 : i32
    %c0_i32_0 = arith.constant 0 : i32
    %c0_i32_1 = arith.constant 0 : i32
    %c0_i32_2 = arith.constant 0 : i32
    return %c0_i32, %c0_i32_0, %c0_i32_1 : i32, i32, i32
  }
  func.func @transform_5(%arg0: i32) -> (i32, i32, i32) {
    %c0_i32 = arith.constant 0 : i32
    %c0_i32_0 = arith.constant 0 : i32
    %c0_i32_1 = arith.constant 0 : i32
    return %arg0, %c0_i32, %c0_i32_0 : i32, i32, i32
  }
}

</mosaic_0001>

<bundles_post_ra>
// kernel: tpu_custom_call.1
= control target key start
LH: loop header
LB: loop body
LE: loop exit
PB: predicated region body
PF: predicated region fallthrough
CT: control target
= control target key end

     0   :  { %10 = vsyncpa [#allocation6], 0  ;;  %s11200_s0 = inlined_call_operand.vmem [shape: f32[2,8,256], index: 0, kind: input, shape index: {}]   ;;  %s11201_s1 = inlined_call_operand.vmem [shape: f32[256,1089], index: 1, kind: input, shape index: {}]   ;;  %s11202_s2 = inlined_call_operand.vmem [shape: f32[1,1089], index: 2, kind: input, shape index: {}]   ;;  %s11203_s3 = inlined_call_operand.vmem [shape: f32[4,8,72], index: 3, kind: input, shape index: {}]   ;;  %s11204_s4 = inlined_call_operand.vmem [shape: f32[4,8,1], index: 4, kind: input, shape index: {}]   ;;  %s11205_s5 = inlined_call_operand.hbm [shape: f32[2,8,1089], index: 5, kind: output, shape index: {}]  }
   0x1   :  { %12 = vsyncpa [#allocation6 + $0x1], 0  ;;  %s7290_s18 = smov 0   ;;  %s7292_s19 = smov 0  }
   0x2   :  { %s7294_s20 = smov 0   ;;  %s7296_s21 = smov 0  }
   0x3 LB: > { %s7311_s22 = sadd.s32 4294967295, %s7244_s21   ;;  %s4911_s23 = sadd.s32 4294967294, %s7244_s21   ;;  %s7244_s21 = sphi %s7296_s21, %s11211_s21   ;;  %s7240_s20 = sphi %s7294_s20, %s11210_s20   ;;  %s7236_s19 = sphi %s7292_s19, %s11209_s19   ;;  %s7232_s18 = sphi %s7290_s18, %s11208_s18  }
   0x4   : > { %s7315_s24 = sadd.s32 1, %s7244_s21   ;;  %s135_s25 = sadd.s32 1, %s7240_s20 }
   0x5   : > { %s132_s26 = ssub.s32 %s7244_s21, %s7315_s24  ;;  %p145_p0 = scmp.ne.s32.totalorder %s7240_s20, %s7236_s19 }
   0x6   : > { %p133_p1 = scmp.eq.s32.totalorder %s132_s26, 0  ;;  %p146_p2 = scmp.eq.s32.totalorder %s7311_s22, 1 }
   0x7   : > { %p151_p3 = scmp.ne.s32.totalorder %s7236_s19, %s7232_s18  ;;  %p152_p4 = scmp.eq.s32.totalorder %s4911_s23, 1 }
   0x8   : > { %s7326_s27 = scalar_select %p133_p1, %s7240_s20, %s135_s25  }
   0x9   : > { %p7328_p5 = por %p146_p2, %p145_p0  ;;  %p7332_p6 = por %p152_p4, %p151_p3 }
   0xa   : > { %p4914_p7 = scmp.ge.s32.totalorder %s7244_s21, 1  ;;  %p190_p8 = scmp.lt.s32.totalorder %s7244_s21, 3 }
   0xc   : > { %p191_p9 = pnand %p4914_p7, %p190_p8 }
   0xd   : > { %v260_v0 = vld [vmem:[%s11201_s1 + $0x8] sm:$0xff] (!%p191_p9)  ;;  %v269_v1 = vld [vmem:[%s11201_s1 + $0x50] sm:$0xff] (!%p191_p9)  ;;  %v262_v2 = vld [vmem:[%s11201_s1 + $0x18] sm:$0xff] (!%p191_p9)  ;;  %p218_p10 = scmp.lt.s32.totalorder (!%p191_p9), %s7311_s22, 1  ;;  %vm233_vm0 = vcmask (!%p191_p9), 531456   ;;  %s7247_s17 = smov (!%p191_p9), 126  }
   0xe   : > { %194 = sbr.rel (%p191_p9) target bundleno = 2479 (0x9af), region = 40  ;;  %v5107_v3 = vpack.c.bf16 (!%p191_p9), %v269_v1, %v260_v0  ;;  %v271_v4 = vld [vmem:[%s11201_s1 + $0x60] sm:$0xff] (!%p191_p9)  ;;  %v268_v6 = vld [vmem:[%s11201_s1 + $0x48] sm:$0xff] (!%p191_p9)  ;;  %v261_v9 = vld [vmem:[%s11201_s1 + $0x10] sm:$0xff] (!%p191_p9)  ;;  %s7248_s23 = smov (!%p191_p9), 127   ;;  %vm952_vm1 = vcmask (!%p191_p9), 1039360  }
   0xf   : > { %v259_v5 = vld [vmem:[%s11201_s1] sm:$0xff] (!%p191_p9)  ;;  %v5171_v7 = vpack.c.bf16 (!%p191_p9), %v271_v4, %v262_v2  ;;  %v270_v10 = vld [vmem:[%s11201_s1 + $0x58] sm:$0xff] (!%p191_p9)  ;;  %v280_v14 = vld [vmem:[%s11201_s1 + $0xa8] sm:$0xff] (!%p191_p9)  ;;  %s7250_s26 = smov (!%p191_p9), 60   ;;  %s7251_s30 = smov (!%p191_p9), 94   ;;  %vm1012_vm2 = vcmask (!%p191_p9), 777216  }
  0x10   : > { %v5109_v8 = vpack.c.bf16 (!%p191_p9), %v268_v6, %v259_v5  ;;  %v278_v11 = vld [vmem:[%s11201_s1 + $0x98] sm:$0xff] (!%p191_p9)  ;;  %5108 = vmatprep.subr.bf16.mxu0 (!%p191_p9), %v5107_v3  ;;  %v5173_v12 = vpack.c.bf16 (!%p191_p9), %v270_v10, %v261_v9  ;;  %v287_v13 = vld [vmem:[%s11201_s1 + $0xe0] sm:$0xff] (!%p191_p9)  ;;  %v289_v15 = vld [vmem:[%s11201_s1 + $0xf0] sm:$0xff] (!%p191_p9)  ;;  %s7252_s6 = smov (!%p191_p9), 93   ;;  %s7253_s7 = smov (!%p191_p9), 62   ;;  %vm982_vm3 = vcmask (!%p191_p9), 1031168  }
  0x11   : > { %5172 = vmatprep.subr.bf16.mxu1 (!%p191_p9), %v5171_v7  ;;  %v5111_v16 = vpack.c.bf16 (!%p191_p9), %v287_v13, %v278_v11  ;;  %v5175_v17 = vpack.c.bf16 (!%p191_p9), %v289_v15, %v280_v14  ;;  %v277_v18 = vld [vmem:[%s11201_s1 + $0x90] sm:$0xff] (!%p191_p9)  ;;  %v286_v19 = vld [vmem:[%s11201_s1 + $0xd8] sm:$0xff] (!%p191_p9)  ;;  %v279_v20 = vld [vmem:[%s11201_s1 + $0xa0] sm:$0xff] (!%p191_p9)  ;;  %s7254_s8 = smov (!%p191_p9), 61   ;;  %vm1040_vm4 = vcmask (!%p191_p9), 769024   ;;  %vm1121_vm5 = vcmask (!%p191_p9), 498688  }
  0x12   : > { %5110 = vmatpush1.bf16.msra.mxu0 (!%p191_p9), %v5109_v8  ;;  %5174 = vmatpush1.bf16.msra.mxu1 (!%p191_p9), %v5173_v12  ;;  %v5113_v21 = vpack.c.bf16 (!%p191_p9), %v286_v19, %v277_v18  ;;  %v288_v22 = vld [vmem:[%s11201_s1 + $0xe8] sm:$0xff] (!%p191_p9)  ;;  %v305_v24 = vld [vmem:[%s11201_s1 + $0x170] sm:$0xff] (!%p191_p9)  ;;  %v298_v27 = vld [vmem:[%s11201_s1 + $0x138] sm:$0xff] (!%p191_p9)  ;;  %vm1067_vm6 = vcmask (!%p191_p9), 760832   ;;  %vm1148_vm7 = vcmask (!%p191_p9), 490496   ;;  %vm1094_vm8 = vcmask (!%p191_p9), 506880  }
  0x13   : > { %v296_v23 = vld [vmem:[%s11201_s1 + $0x128] sm:$0xff] (!%p191_p9)  ;;  %5112 = vmatprep.subr.bf16.mxu0 (!%p191_p9), %v5111_v16  ;;  %5176 = vmatprep.subr.bf16.mxu1 (!%p191_p9), %v5175_v17  ;;  %v5177_v25 = vpack.c.bf16 (!%p191_p9), %v288_v22, %v279_v20  ;;  %v307_v28 = vld [vmem:[%s11201_s1 + $0x180] sm:$0xff] (!%p191_p9)  ;;  %v297_v32 = vld [vmem:[%s11201_s1 + $0x130] sm:$0xff] (!%p191_p9)  ;;  %vm1344_vm9 = vcmask (!%p191_p9), 277504   ;;  %vm1507_vm10 = vcmask (!%p191_p9), 588800   ;;  %vm7258_vm11 = vmmov (!%p191_p9), 0  }
  0x14   : > { %v5115_v26 = vpack.c.bf16 (!%p191_p9), %v305_v24, %v296_v23  ;;  %v295_v29 = vld [vmem:[%s11201_s1 + $0x120] sm:$0xff] (!%p191_p9)  ;;  %v5179_v30 = vpack.c.bf16 (!%p191_p9), %v307_v28, %v298_v27  ;;  %v304_v31 = vld [vmem:[%s11201_s1 + $0x168] sm:$0xff] (!%p191_p9)  ;;  %v306_v33 = vld [vmem:[%s11201_s1 + $0x178] sm:$0xff] (!%p191_p9)  ;;  %s7259_s12 = smov (!%p191_p9), [#allocation5]  }
  0x15   : > { %v5117_v34 = vpack.c.bf16 %v304_v31, %v295_v29  ;;  %v314_v35 = vld [vmem:[%s11201_s1 + $0x1b8] sm:$0xff]  ;;  %v323_v36 = vld [vmem:[%s11201_s1 + $0x200] sm:$0xff]  ;;  %v316_v37 = vld [vmem:[%s11201_s1 + $0x1c8] sm:$0xff]  ;;  %v5181_v38 = vpack.c.bf16 %v306_v33, %v297_v32  ;;  %s7570_s13 = scalar_select %p218_p10, %s7311_s22, 1 }
  0x16   : > { %5114 = vmatpush1.bf16.msra.mxu0 %v5113_v21  ;;  %5178 = vmatpush1.bf16.msra.mxu1 %v5177_v25  ;;  %v5119_v39 = vpack.c.bf16 %v323_v36, %v314_v35  ;;  %v325_v40 = vld [vmem:[%s11201_s1 + $0x210] sm:$0xff]  ;;  %v322_v42 = vld [vmem:[%s11201_s1 + $0x1f8] sm:$0xff]  ;;  %v315_v44 = vld [vmem:[%s11201_s1 + $0x1c0] sm:$0xff]  ;;  %s7186_s14 = sshll.u32 %s7259_s12, 4  ;;  %s7187_s14 = int_to_ptr.vmem [resolvable:$false] %s7186_s14 }
  0x17   : > { %5116 = vmatprep.subr.bf16.mxu0 %v5115_v26  ;;  %v313_v41 = vld [vmem:[%s11201_s1 + $0x1b0] sm:$0xff]  ;;  %5180 = vmatprep.subr.bf16.mxu1 %v5179_v30  ;;  %v5183_v43 = vpack.c.bf16 %v325_v40, %v316_v37  ;;  %v324_v45 = vld [vmem:[%s11201_s1 + $0x208] sm:$0xff]  ;;  %v334_v48 = vld [vmem:[%s11201_s1 + $0x258] sm:$0xff]  ;;  %s4947_s15 = sshll.u32 %s7570_s13, 4  ;;  %s7249_s13 = smov 95  }
  0x18   : > { %v332_v46 = vld [vmem:[%s11201_s1 + $0x248] sm:$0xff]  ;;  %v341_v47 = vld [vmem:[%s11201_s1 + $0x290] sm:$0xff]  ;;  %v343_v49 = vld [vmem:[%s11201_s1 + $0x2a0] sm:$0xff]  ;;  %v5121_v50 = vpack.c.bf16 %v322_v42, %v313_v41  ;;  %v5185_v51 = vpack.c.bf16 %v324_v45, %v315_v44  ;;  %s7628_s25 = scalar_lea.vmem %s11200_s0, %s4947_s15  ;;  %s7255_s15 = smov 34  }
  0x19   : > { %v5123_v52 = vpack.c.bf16 %v341_v47, %v332_v46  ;;  %v331_v53 = vld [vmem:[%s11201_s1 + $0x240] sm:$0xff]  ;;  %v340_v54 = vld [vmem:[%s11201_s1 + $0x288] sm:$0xff]  ;;  %v333_v55 = vld [vmem:[%s11201_s1 + $0x250] sm:$0xff]  ;;  %v5187_v56 = vpack.c.bf16 %v343_v49, %v334_v48 }
  0x1a   : > { %5118 = vmatpush1.bf16.msra.mxu0 %v5117_v34  ;;  %5182 = vmatpush1.bf16.msra.mxu1 %v5181_v38  ;;  %v342_v57 = vld [vmem:[%s11201_s1 + $0x298] sm:$0xff]  ;;  %v359_v59 = vld [vmem:[%s11201_s1 + $0x320] sm:$0xff]  ;;  %v352_v60 = vld [vmem:[%s11201_s1 + $0x2e8] sm:$0xff]  ;;  %v5125_v62 = vpack.c.bf16 %v340_v54, %v331_v53 }
  0x1b   : > { %5120 = vmatprep.subr.bf16.mxu0 %v5119_v39  ;;  %5184 = vmatprep.subr.bf16.mxu1 %v5183_v43  ;;  %v350_v58 = vld [vmem:[%s11201_s1 + $0x2d8] sm:$0xff]  ;;  %v361_v61 = vld [vmem:[%s11201_s1 + $0x330] sm:$0xff]  ;;  %v5189_v63 = vpack.c.bf16 %v342_v57, %v333_v55  ;;  %v351_v3 = vld [vmem:[%s11201_s1 + $0x2e0] sm:$0xff] }
  0x1c   : > { %v5127_v0 = vpack.c.bf16 %v359_v59, %v350_v58  ;;  %v349_v1 = vld [vmem:[%s11201_s1 + $0x2d0] sm:$0xff]  ;;  %v358_v2 = vld [vmem:[%s11201_s1 + $0x318] sm:$0xff]  ;;  %v5191_v4 = vpack.c.bf16 %v361_v61, %v352_v60  ;;  %v360_v5 = vld [vmem:[%s11201_s1 + $0x328] sm:$0xff]  ;;  %v7246_v59 = vmov 0.0  }
  0x1d   : > { %v368_v6 = vld [vmem:[%s11201_s1 + $0x368] sm:$0xff]  ;;  %v377_v7 = vld [vmem:[%s11201_s1 + $0x3b0] sm:$0xff]  ;;  %v370_v8 = vld [vmem:[%s11201_s1 + $0x378] sm:$0xff]  ;;  %v5129_v10 = vpack.c.bf16 %v358_v2, %v349_v1  ;;  %v5193_v11 = vpack.c.bf16 %v360_v5, %v351_v3  ;;  %223 = vst [vmem:[#allocation2] sm:$0xff] %v7246_v59 }
  0x1e   : > { %5122 = vmatpush1.bf16.msra.mxu0 %v5121_v50  ;;  %5186 = vmatpush1.bf16.msra.mxu1 %v5185_v51  ;;  %v379_v9 = vld [vmem:[%s11201_s1 + $0x3c0] sm:$0xff]  ;;  %v5131_v12 = vpack.c.bf16 %v377_v7, %v368_v6  ;;  %v376_v14 = vld [vmem:[%s11201_s1 + $0x3a8] sm:$0xff]  ;;  %v369_v15 = vld [vmem:[%s11201_s1 + $0x370] sm:$0xff]  ;;  %232 = vst [vmem:[#allocation2 + $0x48] sm:$0xff] %v7246_v59 }
  0x1f   : > { %5124 = vmatprep.subr.bf16.mxu0 %v5123_v52  ;;  %5188 = vmatprep.subr.bf16.mxu1 %v5187_v56  ;;  %v367_v13 = vld [vmem:[%s11201_s1 + $0x360] sm:$0xff]  ;;  %v5195_v16 = vpack.c.bf16 %v379_v9, %v370_v8  ;;  %v378_v17 = vld [vmem:[%s11201_s1 + $0x3b8] sm:$0xff]  ;;  %v388_v20 = vld [vmem:[%s11201_s1 + $0x408] sm:$0xff]  ;;  %244 = vst [vmem:[#allocation3 + $0x48] sm:$0xff] %v7246_v59 }
  0x20   : > { %v386_v18 = vld [vmem:[%s11201_s1 + $0x3f8] sm:$0xff]  ;;  %v395_v19 = vld [vmem:[%s11201_s1 + $0x440] sm:$0xff]  ;;  %v397_v21 = vld [vmem:[%s11201_s1 + $0x450] sm:$0xff]  ;;  %v5133_v22 = vpack.c.bf16 %v376_v14, %v367_v13  ;;  %v5197_v23 = vpack.c.bf16 %v378_v17, %v369_v15  ;;  %255 = vst [vmem:[#allocation4 + $0x48] sm:$0xff] %v7246_v59 }
  0x21   : > { %v5135_v24 = vpack.c.bf16 %v395_v19, %v386_v18  ;;  %v385_v25 = vld [vmem:[%s11201_s1 + $0x3f0] sm:$0xff]  ;;  %v394_v26 = vld [vmem:[%s11201_s1 + $0x438] sm:$0xff]  ;;  %v387_v27 = vld [vmem:[%s11201_s1 + $0x400] sm:$0xff]  ;;  %v5199_v28 = vpack.c.bf16 %v397_v21, %v388_v20 }
  0x22   : > { %5126 = vmatpush1.bf16.msra.mxu0 %v5125_v62  ;;  %5190 = vmatpush1.bf16.msra.mxu1 %v5189_v63  ;;  %v396_v29 = vld [vmem:[%s11201_s1 + $0x448] sm:$0xff]  ;;  %v413_v31 = vld [vmem:[%s11201_s1 + $0x4d0] sm:$0xff]  ;;  %v406_v32 = vld [vmem:[%s11201_s1 + $0x498] sm:$0xff]  ;;  %v5137_v34 = vpack.c.bf16 %v394_v26, %v385_v25 }
  0x23   : > { %5128 = vmatprep.subr.bf16.mxu0 %v5127_v0  ;;  %5192 = vmatprep.subr.bf16.mxu1 %v5191_v4  ;;  %v404_v30 = vld [vmem:[%s11201_s1 + $0x488] sm:$0xff]  ;;  %v415_v33 = vld [vmem:[%s11201_s1 + $0x4e0] sm:$0xff]  ;;  %v5201_v35 = vpack.c.bf16 %v396_v29, %v387_v27  ;;  %v405_v39 = vld [vmem:[%s11201_s1 + $0x490] sm:$0xff] }
  0x24   : > { %v5139_v36 = vpack.c.bf16 %v413_v31, %v404_v30  ;;  %v403_v37 = vld [vmem:[%s11201_s1 + $0x480] sm:$0xff]  ;;  %v412_v38 = vld [vmem:[%s11201_s1 + $0x4c8] sm:$0xff]  ;;  %v5203_v40 = vpack.c.bf16 %v415_v33, %v406_v32  ;;  %v414_v41 = vld [vmem:[%s11201_s1 + $0x4d8] sm:$0xff] }
  0x25   : > { %v422_v42 = vld [vmem:[%s11201_s1 + $0x518] sm:$0xff]  ;;  %v431_v43 = vld [vmem:[%s11201_s1 + $0x560] sm:$0xff]  ;;  %v424_v44 = vld [vmem:[%s11201_s1 + $0x528] sm:$0xff]  ;;  %v5141_v46 = vpack.c.bf16 %v412_v38, %v403_v37  ;;  %v5205_v47 = vpack.c.bf16 %v414_v41, %v405_v39 }
  0x26   : > { %5130 = vmatpush1.bf16.msra.mxu0 %v5129_v10  ;;  %5194 = vmatpush1.bf16.msra.mxu1 %v5193_v11  ;;  %v433_v45 = vld [vmem:[%s11201_s1 + $0x570] sm:$0xff]  ;;  %v5143_v48 = vpack.c.bf16 %v431_v43, %v422_v42  ;;  %v430_v50 = vld [vmem:[%s11201_s1 + $0x558] sm:$0xff]  ;;  %v423_v51 = vld [vmem:[%s11201_s1 + $0x520] sm:$0xff] }
  0x27   : > { %5132 = vmatprep.subr.bf16.mxu0 %v5131_v12  ;;  %5196 = vmatprep.subr.bf16.mxu1 %v5195_v16  ;;  %v421_v49 = vld [vmem:[%s11201_s1 + $0x510] sm:$0xff]  ;;  %v5207_v52 = vpack.c.bf16 %v433_v45, %v424_v44  ;;  %v432_v53 = vld [vmem:[%s11201_s1 + $0x568] sm:$0xff]  ;;  %v442_v56 = vld [vmem:[%s11201_s1 + $0x5b8] sm:$0xff] }
  0x28   : > { %v440_v54 = vld [vmem:[%s11201_s1 + $0x5a8] sm:$0xff]  ;;  %v449_v55 = vld [vmem:[%s11201_s1 + $0x5f0] sm:$0xff]  ;;  %v451_v57 = vld [vmem:[%s11201_s1 + $0x600] sm:$0xff]  ;;  %v5145_v58 = vpack.c.bf16 %v430_v50, %v421_v49  ;;  %v5209_v60 = vpack.c.bf16 %v432_v53, %v423_v51 }
  0x29   : > { %v5147_v61 = vpack.c.bf16 %v449_v55, %v440_v54  ;;  %v439_v62 = vld [vmem:[%s11201_s1 + $0x5a0] sm:$0xff]  ;;  %v448_v63 = vld [vmem:[%s11201_s1 + $0x5e8] sm:$0xff]  ;;  %v441_v0 = vld [vmem:[%s11201_s1 + $0x5b0] sm:$0xff]  ;;  %v5211_v1 = vpack.c.bf16 %v451_v57, %v442_v56 }
  0x2a   : > { %5134 = vmatpush1.bf16.msra.mxu0 %v5133_v22  ;;  %5198 = vmatpush1.bf16.msra.mxu1 %v5197_v23  ;;  %v450_v2 = vld [vmem:[%s11201_s1 + $0x5f8] sm:$0xff]  ;;  %v467_v4 = vld [vmem:[%s11201_s1 + $0x680] sm:$0xff]  ;;  %v460_v5 = vld [vmem:[%s11201_s1 + $0x648] sm:$0xff]  ;;  %v5149_v7 = vpack.c.bf16 %v448_v63, %v439_v62 }
  0x2b   : > { %5136 = vmatprep.subr.bf16.mxu0 %v5135_v24  ;;  %5200 = vmatprep.subr.bf16.mxu1 %v5199_v28  ;;  %v458_v3 = vld [vmem:[%s11201_s1 + $0x638] sm:$0xff]  ;;  %v469_v6 = vld [vmem:[%s11201_s1 + $0x690] sm:$0xff]  ;;  %v5213_v9 = vpack.c.bf16 %v450_v2, %v441_v0  ;;  %v459_v12 = vld [vmem:[%s11201_s1 + $0x640] sm:$0xff] }
  0x2c   : > { %v457_v8 = vld [vmem:[%s11201_s1 + $0x630] sm:$0xff]  ;;  %v5151_v10 = vpack.c.bf16 %v467_v4, %v458_v3  ;;  %v466_v11 = vld [vmem:[%s11201_s1 + $0x678] sm:$0xff]  ;;  %v468_v13 = vld [vmem:[%s11201_s1 + $0x688] sm:$0xff]  ;;  %v5215_v14 = vpack.c.bf16 %v469_v6, %v460_v5 }
  0x2d   : > { %v476_v15 = vld [vmem:[%s11201_s1 + $0x6c8] sm:$0xff]  ;;  %v485_v16 = vld [vmem:[%s11201_s1 + $0x710] sm:$0xff]  ;;  %v478_v18 = vld [vmem:[%s11201_s1 + $0x6d8] sm:$0xff]  ;;  %v5153_v20 = vpack.c.bf16 %v466_v11, %v457_v8  ;;  %v5217_v21 = vpack.c.bf16 %v468_v13, %v459_v12 }
  0x2e   : > { %5138 = vmatpush1.bf16.msra.mxu0 %v5137_v34  ;;  %5202 = vmatpush1.bf16.msra.mxu1 %v5201_v35  ;;  %v7649_v17 = vld [vmem:[%s7628_s25 + $0x8] sm:$0xff]  ;;  %v487_v19 = vld [vmem:[%s11201_s1 + $0x720] sm:$0xff]  ;;  %v5155_v22 = vpack.c.bf16 %v485_v16, %v476_v15  ;;  %v477_v25 = vld [vmem:[%s11201_s1 + $0x6d0] sm:$0xff] }
  0x2f   : > { %5140 = vmatprep.subr.bf16.mxu0 %v5139_v36  ;;  %5204 = vmatprep.subr.bf16.mxu1 %v5203_v40  ;;  %v475_v23 = vld [vmem:[%s11201_s1 + $0x6c0] sm:$0xff]  ;;  %v484_v24 = vld [vmem:[%s11201_s1 + $0x708] sm:$0xff]  ;;  %v5219_v26 = vpack.c.bf16 %v487_v19, %v478_v18  ;;  %v486_v27 = vld [vmem:[%s11201_s1 + $0x718] sm:$0xff] }
  0x30   : > { %611 = vmatprep.mubr.f32.mxu0 %v7649_v17  ;;  %682 = vmatprep.mubr.f32.mxu1 %v7649_v17  ;;  %v494_v28 = vld [vmem:[%s11201_s1 + $0x758] sm:$0xff]  ;;  %v503_v29 = vld [vmem:[%s11201_s1 + $0x7a0] sm:$0xff]  ;;  %v496_v30 = vld [vmem:[%s11201_s1 + $0x768] sm:$0xff]  ;;  %v5157_v32 = vpack.c.bf16 %v484_v24, %v475_v23  ;;  %v5221_v33 = vpack.c.bf16 %v486_v27, %v477_v25 }
  0x31   : > { %v505_v31 = vld [vmem:[%s11201_s1 + $0x7b0] sm:$0xff]  ;;  %v5159_v34 = vpack.c.bf16 %v503_v29, %v494_v28  ;;  %v502_v36 = vld [vmem:[%s11201_s1 + $0x798] sm:$0xff]  ;;  %v495_v37 = vld [vmem:[%s11201_s1 + $0x760] sm:$0xff] }
  0x32   : > { %5142 = vmatpush1.bf16.msra.mxu0 %v5141_v46  ;;  %5206 = vmatpush1.bf16.msra.mxu1 %v5205_v47  ;;  %v493_v35 = vld [vmem:[%s11201_s1 + $0x750] sm:$0xff]  ;;  %v5223_v38 = vpack.c.bf16 %v505_v31, %v496_v30  ;;  %v504_v39 = vld [vmem:[%s11201_s1 + $0x7a8] sm:$0xff]  ;;  %v514_v42 = vld [vmem:[%s11201_s1 + $0x7f8] sm:$0xff] }
  0x33   : > { %5144 = vmatprep.subr.bf16.mxu0 %v5143_v48  ;;  %5208 = vmatprep.subr.bf16.mxu1 %v5207_v52  ;;  %v512_v40 = vld [vmem:[%s11201_s1 + $0x7e8] sm:$0xff]  ;;  %v521_v41 = vld [vmem:[%s11201_s1 + $0x830] sm:$0xff]  ;;  %v523_v43 = vld [vmem:[%s11201_s1 + $0x840] sm:$0xff]  ;;  %v5161_v44 = vpack.c.bf16 %v502_v36, %v493_v35  ;;  %v5225_v45 = vpack.c.bf16 %v504_v39, %v495_v37 }
  0x34   : > { %v5163_v46 = vpack.c.bf16 %v521_v41, %v512_v40  ;;  %v511_v47 = vld [vmem:[%s11201_s1 + $0x7e0] sm:$0xff]  ;;  %v520_v48 = vld [vmem:[%s11201_s1 + $0x828] sm:$0xff]  ;;  %v513_v49 = vld [vmem:[%s11201_s1 + $0x7f0] sm:$0xff]  ;;  %v5227_v50 = vpack.c.bf16 %v523_v43, %v514_v42 }
  0x35   : > { %v522_v51 = vld [vmem:[%s11201_s1 + $0x838] sm:$0xff]  ;;  %v539_v53 = vld [vmem:[%s11201_s1 + $0x8c0] sm:$0xff]  ;;  %v532_v54 = vld [vmem:[%s11201_s1 + $0x888] sm:$0xff]  ;;  %v5165_v56 = vpack.c.bf16 %v520_v48, %v511_v47 }
  0x36   : > { %5146 = vmatpush1.bf16.msra.mxu0 %v5145_v58  ;;  %5210 = vmatpush1.bf16.msra.mxu1 %v5209_v60  ;;  %v530_v52 = vld [vmem:[%s11201_s1 + $0x878] sm:$0xff]  ;;  %v541_v55 = vld [vmem:[%s11201_s1 + $0x8d0] sm:$0xff]  ;;  %v5229_v57 = vpack.c.bf16 %v522_v51, %v513_v49  ;;  %v531_v62 = vld [vmem:[%s11201_s1 + $0x880] sm:$0xff] }
  0x37   : > { %5148 = vmatprep.subr.bf16.mxu0 %v5147_v61  ;;  %5212 = vmatprep.subr.bf16.mxu1 %v5211_v1  ;;  %v5167_v58 = vpack.c.bf16 %v539_v53, %v530_v52  ;;  %v529_v60 = vld [vmem:[%s11201_s1 + $0x870] sm:$0xff]  ;;  %v538_v61 = vld [vmem:[%s11201_s1 + $0x8b8] sm:$0xff]  ;;  %v5231_v63 = vpack.c.bf16 %v541_v55, %v532_v54  ;;  %v540_v0 = vld [vmem:[%s11201_s1 + $0x8c8] sm:$0xff] }
  0x38   : > { %v264_v1 = vld [vmem:[%s11201_s1 + $0x28] sm:$0xff]  ;;  %v273_v2 = vld [vmem:[%s11201_s1 + $0x70] sm:$0xff]  ;;  %v266_v3 = vld [vmem:[%s11201_s1 + $0x38] sm:$0xff]  ;;  %v5169_v5 = vpack.c.bf16 %v538_v61, %v529_v60  ;;  %v5233_v6 = vpack.c.bf16 %v540_v0, %v531_v62 }
  0x39   : > { %v275_v4 = vld [vmem:[%s11201_s1 + $0x80] sm:$0xff]  ;;  %v274_v12 = vld [vmem:[%s11201_s1 + $0x78] sm:$0xff]  ;;  %v284_v15 = vld [vmem:[%s11201_s1 + $0xc8] sm:$0xff] }
  0x3a   : > { %5150 = vmatpush1.bf16.msra.mxu0 %v5149_v7  ;;  %5214 = vmatpush1.bf16.msra.mxu1 %v5213_v9  ;;  %v5235_v7 = vpack.c.bf16 %v273_v2, %v264_v1  ;;  %v263_v8 = vld [vmem:[%s11201_s1 + $0x20] sm:$0xff]  ;;  %v272_v9 = vld [vmem:[%s11201_s1 + $0x68] sm:$0xff]  ;;  %v5299_v11 = vpack.c.bf16 %v275_v4, %v266_v3  ;;  %v282_v13 = vld [vmem:[%s11201_s1 + $0xb8] sm:$0xff] }
  0x3b   : > { %5152 = vmatprep.subr.bf16.mxu0 %v5151_v10  ;;  %5216 = vmatprep.subr.bf16.mxu1 %v5215_v14  ;;  %v265_v10 = vld [vmem:[%s11201_s1 + $0x30] sm:$0xff]  ;;  %v291_v14 = vld [vmem:[%s11201_s1 + $0x100] sm:$0xff]  ;;  %v5237_v19 = vpack.c.bf16 %v272_v9, %v263_v8  ;;  %v290_v23 = vld [vmem:[%s11201_s1 + $0xf8] sm:$0xff] }
  0x3c   : > { %v293_v16 = vld [vmem:[%s11201_s1 + $0x110] sm:$0xff]  ;;  %v7780_v18 = vld [vmem:[%s7628_s25] sm:$0xff]  ;;  %v300_v27 = vld [vmem:[%s11201_s1 + $0x148] sm:$0xff]  ;;  %s7188_s25 = scalar_lea.vmem %s7187_s14, 2304 }
  0x3d   : > { %v283_v24 = vld [vmem:[%s11201_s1 + $0xc0] sm:$0xff]  ;;  %v5303_v25 = vpack.c.bf16 %v293_v16, %v284_v15  ;;  %v309_v28 = vld [vmem:[%s11201_s1 + $0x190] sm:$0xff]  ;;  %v302_v29 = vld [vmem:[%s11201_s1 + $0x158] sm:$0xff] }
  0x3e   : > { %5154 = vmatpush1.bf16.msra.mxu0 %v5153_v20  ;;  %5218 = vmatpush1.bf16.msra.mxu1 %v5217_v21  ;;  %v5301_v20 = vpack.c.bf16 %v274_v12, %v265_v10  ;;  %v5239_v21 = vpack.c.bf16 %v291_v14, %v282_v13  ;;  %v311_v30 = vld [vmem:[%s11201_s1 + $0x1a0] sm:$0xff]  ;;  %v308_v35 = vld [vmem:[%s11201_s1 + $0x188] sm:$0xff]  ;;  %v301_v36 = vld [vmem:[%s11201_s1 + $0x150] sm:$0xff] }
  0x3f   : > { %5156 = vmatprep.subr.bf16.mxu0 %v5155_v22  ;;  %5220 = vmatprep.subr.bf16.mxu1 %v5219_v26  ;;  %v281_v22 = vld [vmem:[%s11201_s1 + $0xb0] sm:$0xff]  ;;  %v292_v26 = vld [vmem:[%s11201_s1 + $0x108] sm:$0xff]  ;;  %v5307_v37 = vpack.c.bf16 %v311_v30, %v302_v29  ;;  %v318_v39 = vld [vmem:[%s11201_s1 + $0x1d8] sm:$0xff] }
  0x40   : > { %v5241_v31 = vpack.c.bf16 %v290_v23, %v281_v22  ;;  %v327_v40 = vld [vmem:[%s11201_s1 + $0x220] sm:$0xff]  ;;  %v320_v41 = vld [vmem:[%s11201_s1 + $0x1e8] sm:$0xff]  ;;  %v329_v42 = vld [vmem:[%s11201_s1 + $0x230] sm:$0xff] }
  0x41   : > { %v326_v47 = vld [vmem:[%s11201_s1 + $0x218] sm:$0xff]  ;;  %v319_v48 = vld [vmem:[%s11201_s1 + $0x1e0] sm:$0xff]  ;;  %v5311_v49 = vpack.c.bf16 %v329_v42, %v320_v41  ;;  %v336_v51 = vld [vmem:[%s11201_s1 + $0x268] sm:$0xff] }
  0x42   : > { %5158 = vmatpush1.bf16.msra.mxu0 %v5157_v32  ;;  %5222 = vmatpush1.bf16.msra.mxu1 %v5221_v33  ;;  %v5305_v32 = vpack.c.bf16 %v292_v26, %v283_v24  ;;  %v5243_v33 = vpack.c.bf16 %v309_v28, %v300_v27  ;;  %v345_v52 = vld [vmem:[%s11201_s1 + $0x2b0] sm:$0xff]  ;;  %v338_v53 = vld [vmem:[%s11201_s1 + $0x278] sm:$0xff]  ;;  %v347_v54 = vld [vmem:[%s11201_s1 + $0x2c0] sm:$0xff] }
  0x43   : > { %5160 = vmatprep.subr.bf16.mxu0 %v5159_v34  ;;  %5224 = vmatprep.subr.bf16.mxu1 %v5223_v38  ;;  %v299_v34 = vld [vmem:[%s11201_s1 + $0x140] sm:$0xff]  ;;  %v310_v38 = vld [vmem:[%s11201_s1 + $0x198] sm:$0xff]  ;;  %v344_v60 = vld [vmem:[%s11201_s1 + $0x2a8] sm:$0xff]  ;;  %v5315_v62 = vpack.c.bf16 %v347_v54, %v338_v53 }
  0x44   : > { %v5245_v43 = vpack.c.bf16 %v308_v35, %v299_v34  ;;  %v337_v61 = vld [vmem:[%s11201_s1 + $0x270] sm:$0xff]  ;;  %v354_v0 = vld [vmem:[%s11201_s1 + $0x2f8] sm:$0xff]  ;;  %v363_v1 = vld [vmem:[%s11201_s1 + $0x340] sm:$0xff] }
  0x45   : > { %v356_v2 = vld [vmem:[%s11201_s1 + $0x308] sm:$0xff]  ;;  %v365_v3 = vld [vmem:[%s11201_s1 + $0x350] sm:$0xff]  ;;  %v362_v8 = vld [vmem:[%s11201_s1 + $0x338] sm:$0xff] }
  0x46   : > { %5162 = vmatpush1.bf16.msra.mxu0 %v5161_v44  ;;  %5226 = vmatpush1.bf16.msra.mxu1 %v5225_v45  ;;  %v5309_v44 = vpack.c.bf16 %v310_v38, %v301_v36  ;;  %v5247_v45 = vpack.c.bf16 %v327_v40, %v318_v39  ;;  %v355_v9 = vld [vmem:[%s11201_s1 + $0x300] sm:$0xff]  ;;  %v5319_v10 = vpack.c.bf16 %v365_v3, %v356_v2  ;;  %v372_v12 = vld [vmem:[%s11201_s1 + $0x388] sm:$0xff]  ;;  %v381_v13 = vld [vmem:[%s11201_s1 + $0x3d0] sm:$0xff] }
  0x47   : > { %5164 = vmatprep.subr.bf16.mxu0 %v5163_v46  ;;  %5228 = vmatprep.subr.bf16.mxu1 %v5227_v50  ;;  %v317_v46 = vld [vmem:[%s11201_s1 + $0x1d0] sm:$0xff]  ;;  %v328_v50 = vld [vmem:[%s11201_s1 + $0x228] sm:$0xff]  ;;  %v374_v14 = vld [vmem:[%s11201_s1 + $0x398] sm:$0xff] }
  0x48   : > { %v5249_v55 = vpack.c.bf16 %v326_v47, %v317_v46  ;;  %v383_v15 = vld [vmem:[%s11201_s1 + $0x3e0] sm:$0xff]  ;;  %v380_v22 = vld [vmem:[%s11201_s1 + $0x3c8] sm:$0xff]  ;;  %v373_v23 = vld [vmem:[%s11201_s1 + $0x390] sm:$0xff] }
  0x49   : > { %v5323_v24 = vpack.c.bf16 %v383_v15, %v374_v14  ;;  %v390_v26 = vld [vmem:[%s11201_s1 + $0x418] sm:$0xff]  ;;  %v399_v27 = vld [vmem:[%s11201_s1 + $0x460] sm:$0xff]  ;;  %v392_v28 = vld [vmem:[%s11201_s1 + $0x428] sm:$0xff] }
  0x4a   : > { %5166 = vmatpush1.bf16.msra.mxu0 %v5165_v56  ;;  %5230 = vmatpush1.bf16.msra.mxu1 %v5229_v57  ;;  %v5313_v56 = vpack.c.bf16 %v328_v50, %v319_v48  ;;  %v5251_v57 = vpack.c.bf16 %v345_v52, %v336_v51  ;;  %v401_v29 = vld [vmem:[%s11201_s1 + $0x470] sm:$0xff]  ;;  %v398_v34 = vld [vmem:[%s11201_s1 + $0x458] sm:$0xff]  ;;  %v391_v35 = vld [vmem:[%s11201_s1 + $0x420] sm:$0xff] }
  0x4b   : > { %5168 = vmatprep.subr.bf16.mxu0 %v5167_v58  ;;  %5232 = vmatprep.subr.bf16.mxu1 %v5231_v63  ;;  %v335_v58 = vld [vmem:[%s11201_s1 + $0x260] sm:$0xff]  ;;  %v346_v63 = vld [vmem:[%s11201_s1 + $0x2b8] sm:$0xff]  ;;  %v5327_v36 = vpack.c.bf16 %v401_v29, %v392_v28  ;;  %v408_v38 = vld [vmem:[%s11201_s1 + $0x4a8] sm:$0xff] }
  0x4c   : > { %v5253_v4 = vpack.c.bf16 %v344_v60, %v335_v58  ;;  %v417_v39 = vld [vmem:[%s11201_s1 + $0x4f0] sm:$0xff]  ;;  %v410_v40 = vld [vmem:[%s11201_s1 + $0x4b8] sm:$0xff]  ;;  %v419_v41 = vld [vmem:[%s11201_s1 + $0x500] sm:$0xff] }
  0x4d   : > { %v416_v46 = vld [vmem:[%s11201_s1 + $0x4e8] sm:$0xff]  ;;  %v409_v47 = vld [vmem:[%s11201_s1 + $0x4b0] sm:$0xff]  ;;  %v5331_v48 = vpack.c.bf16 %v419_v41, %v410_v40  ;;  %v426_v50 = vld [vmem:[%s11201_s1 + $0x538] sm:$0xff] }
  0x4e   : > { %5170 = vmatpush1.bf16.msra.mxu0 %v5169_v5  ;;  %5234 = vmatpush1.bf16.msra.mxu1 %v5233_v6  ;;  %v5317_v5 = vpack.c.bf16 %v346_v63, %v337_v61  ;;  %v5255_v6 = vpack.c.bf16 %v363_v1, %v354_v0  ;;  %v435_v51 = vld [vmem:[%s11201_s1 + $0x580] sm:$0xff]  ;;  %v428_v52 = vld [vmem:[%s11201_s1 + $0x548] sm:$0xff]  ;;  %v437_v53 = vld [vmem:[%s11201_s1 + $0x590] sm:$0xff] }
  0x4f   : > { %5236 = vmatprep.subr.bf16.mxu0 %v5235_v7  ;;  %5300 = vmatprep.subr.bf16.mxu1 %v5299_v11  ;;  %v353_v7 = vld [vmem:[%s11201_s1 + $0x2f0] sm:$0xff]  ;;  %v364_v11 = vld [vmem:[%s11201_s1 + $0x348] sm:$0xff]  ;;  %v434_v58 = vld [vmem:[%s11201_s1 + $0x578] sm:$0xff]  ;;  %v5335_v61 = vpack.c.bf16 %v437_v53, %v428_v52 }
  0x50   : > { %v5257_v16 = vpack.c.bf16 %v362_v8, %v353_v7  ;;  %v427_v60 = vld [vmem:[%s11201_s1 + $0x540] sm:$0xff]  ;;  %v444_v63 = vld [vmem:[%s11201_s1 + $0x5c8] sm:$0xff]  ;;  %v453_v0 = vld [vmem:[%s11201_s1 + $0x610] sm:$0xff] }
  0x51   : > { %612 = vmatmul.mubr.f32.vlgmr.msra.gmra.mrb[0].mxu0 %v7780_v18  ;;  %683 = vmatmul.mubr.f32.vlgmr.msra.gmra.mrb[0].mxu1 %v7780_v18  ;;  %v446_v1 = vld [vmem:[%s11201_s1 + $0x5d8] sm:$0xff]  ;;  %v455_v2 = vld [vmem:[%s11201_s1 + $0x620] sm:$0xff]  ;;  %v452_v7 = vld [vmem:[%s11201_s1 + $0x608] sm:$0xff] }
  0x52   : > { %5238 = vmatpush1.bf16.msra.mxu0 %v5237_v19  ;;  %5302 = vmatpush1.bf16.msra.mxu1 %v5301_v20  ;;  %v5321_v19 = vpack.c.bf16 %v364_v11, %v355_v9  ;;  %v5259_v20 = vpack.c.bf16 %v381_v13, %v372_v12  ;;  %v445_v8 = vld [vmem:[%s11201_s1 + $0x5d0] sm:$0xff]  ;;  %v5339_v9 = vpack.c.bf16 %v455_v2, %v446_v1  ;;  %v462_v11 = vld [vmem:[%s11201_s1 + $0x658] sm:$0xff]  ;;  %v471_v12 = vld [vmem:[%s11201_s1 + $0x6a0] sm:$0xff] }
  0x53   : > { %5240 = vmatprep.subr.bf16.mxu0 %v5239_v21  ;;  %5304 = vmatprep.subr.bf16.mxu1 %v5303_v25  ;;  %v371_v21 = vld [vmem:[%s11201_s1 + $0x380] sm:$0xff]  ;;  %v382_v25 = vld [vmem:[%s11201_s1 + $0x3d8] sm:$0xff]  ;;  %v464_v13 = vld [vmem:[%s11201_s1 + $0x668] sm:$0xff] }
  0x54   : > { %753 = vmatprep.mubr.f32.mxu0 %v7649_v17  ;;  %824 = vmatprep.mubr.f32.mxu1 %v7649_v17  ;;  %v5261_v30 = vpack.c.bf16 %v380_v22, %v371_v21  ;;  %v473_v14 = vld [vmem:[%s11201_s1 + $0x6b0] sm:$0xff]  ;;  %v470_v21 = vld [vmem:[%s11201_s1 + $0x698] sm:$0xff]  ;;  %v463_v22 = vld [vmem:[%s11201_s1 + $0x660] sm:$0xff] }
  0x55   : > { %v491_v28 = vld [vmem:[%s11201_s1 + $0x740] sm:$0xff]  ;;  %v509_v40 = vld [vmem:[%s11201_s1 + $0x7d0] sm:$0xff] }
  0x56   : > { %5242 = vmatpush1.bf16.msra.mxu0 %v5241_v31  ;;  %5306 = vmatpush1.bf16.msra.mxu1 %v5305_v32  ;;  %v5325_v31 = vpack.c.bf16 %v382_v25, %v373_v23  ;;  %v5263_v32 = vpack.c.bf16 %v399_v27, %v390_v26  ;;  %v5343_v23 = vpack.c.bf16 %v473_v14, %v464_v13  ;;  %v480_v25 = vld [vmem:[%s11201_s1 + $0x6e8] sm:$0xff]  ;;  %v489_v26 = vld [vmem:[%s11201_s1 + $0x730] sm:$0xff]  ;;  %v482_v27 = vld [vmem:[%s11201_s1 + $0x6f8] sm:$0xff] }
  0x57   : > { %5244 = vmatprep.subr.bf16.mxu0 %v5243_v33  ;;  %5308 = vmatprep.subr.bf16.mxu1 %v5307_v37  ;;  %v389_v33 = vld [vmem:[%s11201_s1 + $0x410] sm:$0xff]  ;;  %v400_v37 = vld [vmem:[%s11201_s1 + $0x468] sm:$0xff]  ;;  %v527_v52 = vld [vmem:[%s11201_s1 + $0x860] sm:$0xff] }
  0x58   : > { %v5265_v42 = vpack.c.bf16 %v398_v34, %v389_v33  ;;  %v488_v33 = vld [vmem:[%s11201_s1 + $0x728] sm:$0xff]  ;;  %v481_v34 = vld [vmem:[%s11201_s1 + $0x6f0] sm:$0xff] }
  0x59   : > { %v545_v1 = vld [vmem:[%s11201_s1 + $0x8f0] sm:$0xff] }
  0x5a   : > { %5246 = vmatpush1.bf16.msra.mxu0 %v5245_v43  ;;  %5310 = vmatpush1.bf16.msra.mxu1 %v5309_v44  ;;  %v5329_v43 = vpack.c.bf16 %v400_v37, %v391_v35  ;;  %v5267_v44 = vpack.c.bf16 %v417_v39, %v408_v38  ;;  %v5347_v35 = vpack.c.bf16 %v491_v28, %v482_v27  ;;  %v498_v37 = vld [vmem:[%s11201_s1 + $0x778] sm:$0xff]  ;;  %v507_v38 = vld [vmem:[%s11201_s1 + $0x7c0] sm:$0xff]  ;;  %v500_v39 = vld [vmem:[%s11201_s1 + $0x788] sm:$0xff] }
  0x5b   : > { %5248 = vmatprep.subr.bf16.mxu0 %v5247_v45  ;;  %5312 = vmatprep.subr.bf16.mxu1 %v5311_v49  ;;  %v407_v45 = vld [vmem:[%s11201_s1 + $0x4a0] sm:$0xff]  ;;  %v418_v49 = vld [vmem:[%s11201_s1 + $0x4f8] sm:$0xff] }
  0x5c   : > { %v5269_v54 = vpack.c.bf16 %v416_v46, %v407_v45  ;;  %v506_v45 = vld [vmem:[%s11201_s1 + $0x7b8] sm:$0xff]  ;;  %v499_v46 = vld [vmem:[%s11201_s1 + $0x780] sm:$0xff] }
  0x5e   : > { %5250 = vmatpush1.bf16.msra.mxu0 %v5249_v55  ;;  %5314 = vmatpush1.bf16.msra.mxu1 %v5313_v56  ;;  %v5333_v55 = vpack.c.bf16 %v418_v49, %v409_v47  ;;  %v5271_v56 = vpack.c.bf16 %v435_v51, %v426_v50  ;;  %v5351_v47 = vpack.c.bf16 %v509_v40, %v500_v39  ;;  %v516_v49 = vld [vmem:[%s11201_s1 + $0x808] sm:$0xff]  ;;  %v525_v50 = vld [vmem:[%s11201_s1 + $0x850] sm:$0xff]  ;;  %v518_v51 = vld [vmem:[%s11201_s1 + $0x818] sm:$0xff] }
  0x5f   : > { %5252 = vmatprep.subr.bf16.mxu0 %v5251_v57  ;;  %5316 = vmatprep.subr.bf16.mxu1 %v5315_v62  ;;  %v425_v57 = vld [vmem:[%s11201_s1 + $0x530] sm:$0xff]  ;;  %v436_v62 = vld [vmem:[%s11201_s1 + $0x588] sm:$0xff]  ;;  %v339_v40 = vld [vmem:[%s11201_s1 + $0x280] sm:$0xff] }
  0x60   : > { %v5273_v3 = vpack.c.bf16 %v434_v58, %v425_v57  ;;  %v524_v57 = vld [vmem:[%s11201_s1 + $0x848] sm:$0xff]  ;;  %v517_v58 = vld [vmem:[%s11201_s1 + $0x810] sm:$0xff] }
  0x62   : > { %5254 = vmatpush1.bf16.msra.mxu0 %v5253_v4  ;;  %5318 = vmatpush1.bf16.msra.mxu1 %v5317_v5  ;;  %v5337_v4 = vpack.c.bf16 %v436_v62, %v427_v60  ;;  %v5275_v5 = vpack.c.bf16 %v453_v0, %v444_v63  ;;  %v5355_v60 = vpack.c.bf16 %v527_v52, %v518_v51  ;;  %v534_v62 = vld [vmem:[%s11201_s1 + $0x898] sm:$0xff]  ;;  %v543_v63 = vld [vmem:[%s11201_s1 + $0x8e0] sm:$0xff]  ;;  %v536_v0 = vld [vmem:[%s11201_s1 + $0x8a8] sm:$0xff] }
  0x63   : > { %5256 = vmatprep.subr.bf16.mxu0 %v5255_v6  ;;  %5320 = vmatprep.subr.bf16.mxu1 %v5319_v10  ;;  %v443_v6 = vld [vmem:[%s11201_s1 + $0x5c0] sm:$0xff]  ;;  %v454_v10 = vld [vmem:[%s11201_s1 + $0x618] sm:$0xff] }
  0x64   : > { %v5277_v15 = vpack.c.bf16 %v452_v7, %v443_v6  ;;  %v542_v6 = vld [vmem:[%s11201_s1 + $0x8d8] sm:$0xff]  ;;  %v535_v7 = vld [vmem:[%s11201_s1 + $0x8a0] sm:$0xff] }
  0x65   : > { %v375_v52 = vld [vmem:[%s11201_s1 + $0x3a0] sm:$0xff] }
  0x66   : > { %5258 = vmatpush1.bf16.msra.mxu0 %v5257_v16  ;;  %5322 = vmatpush1.bf16.msra.mxu1 %v5321_v19  ;;  %v5341_v16 = vpack.c.bf16 %v454_v10, %v445_v8  ;;  %v5279_v19 = vpack.c.bf16 %v471_v12, %v462_v11  ;;  %v5359_v8 = vpack.c.bf16 %v545_v1, %v536_v0  ;;  %v411_v10 = vld [vmem:[%s11201_s1 + $0x4c0] sm:$0xff]  ;;  %v420_v11 = vld [vmem:[%s11201_s1 + $0x508] sm:$0xff] }
  0x67   : > { %5260 = vmatprep.subr.bf16.mxu0 %v5259_v20  ;;  %5324 = vmatprep.subr.bf16.mxu1 %v5323_v24  ;;  %v461_v20 = vld [vmem:[%s11201_s1 + $0x650] sm:$0xff]  ;;  %v472_v24 = vld [vmem:[%s11201_s1 + $0x6a8] sm:$0xff]  ;;  %v5363_v14 = vpack.c.bf16 %v420_v11, %v411_v10 }
  0x68   : > { %v5281_v29 = vpack.c.bf16 %v470_v21, %v461_v20  ;;  %v438_v20 = vld [vmem:[%s11201_s1 + $0x598] sm:$0xff] }
  0x6a   : > { %5262 = vmatpush1.bf16.msra.mxu0 %v5261_v30  ;;  %5326 = vmatpush1.bf16.msra.mxu1 %v5325_v31  ;;  %v5345_v30 = vpack.c.bf16 %v472_v24, %v463_v22  ;;  %v5283_v31 = vpack.c.bf16 %v489_v26, %v480_v25  ;;  %v294_v24 = vld [vmem:[%s11201_s1 + $0x118] sm:$0xff]  ;;  %v447_v25 = vld [vmem:[%s11201_s1 + $0x5e0] sm:$0xff]  ;;  %v456_v26 = vld [vmem:[%s11201_s1 + $0x628] sm:$0xff] }
  0x6b   : > { %5264 = vmatprep.subr.bf16.mxu0 %v5263_v32  ;;  %5328 = vmatprep.subr.bf16.mxu1 %v5327_v36  ;;  %v479_v32 = vld [vmem:[%s11201_s1 + $0x6e0] sm:$0xff]  ;;  %v490_v36 = vld [vmem:[%s11201_s1 + $0x738] sm:$0xff]  ;;  %v5371_v28 = vpack.c.bf16 %v456_v26, %v447_v25 }
  0x6c   : > { %v5285_v41 = vpack.c.bf16 %v488_v33, %v479_v32  ;;  %v474_v32 = vld [vmem:[%s11201_s1 + $0x6b8] sm:$0xff] }
  0x6e   : > { %5266 = vmatpush1.bf16.msra.mxu0 %v5265_v42  ;;  %5330 = vmatpush1.bf16.msra.mxu1 %v5329_v43  ;;  %v5349_v42 = vpack.c.bf16 %v490_v36, %v481_v34  ;;  %v5287_v43 = vpack.c.bf16 %v507_v38, %v498_v37  ;;  %v483_v36 = vld [vmem:[%s11201_s1 + $0x700] sm:$0xff]  ;;  %v492_v37 = vld [vmem:[%s11201_s1 + $0x748] sm:$0xff] }
  0x6f   : > { %5268 = vmatprep.subr.bf16.mxu0 %v5267_v44  ;;  %5332 = vmatprep.subr.bf16.mxu1 %v5331_v48  ;;  %v497_v44 = vld [vmem:[%s11201_s1 + $0x770] sm:$0xff]  ;;  %v508_v48 = vld [vmem:[%s11201_s1 + $0x7c8] sm:$0xff]  ;;  %v5379_v39 = vpack.c.bf16 %v492_v37, %v483_v36 }
  0x70   : > { %v5289_v53 = vpack.c.bf16 %v506_v45, %v497_v44 }
  0x72   : > { %5270 = vmatpush1.bf16.msra.mxu0 %v5269_v54  ;;  %5334 = vmatpush1.bf16.msra.mxu1 %v5333_v55  ;;  %v5353_v54 = vpack.c.bf16 %v508_v48, %v499_v46  ;;  %v5291_v55 = vpack.c.bf16 %v525_v50, %v516_v49  ;;  %v357_v46 = vld [vmem:[%s11201_s1 + $0x310] sm:$0xff]  ;;  %v519_v48 = vld [vmem:[%s11201_s1 + $0x820] sm:$0xff]  ;;  %v528_v49 = vld [vmem:[%s11201_s1 + $0x868] sm:$0xff] }
  0x73   : > { %5272 = vmatprep.subr.bf16.mxu0 %v5271_v56  ;;  %5336 = vmatprep.subr.bf16.mxu1 %v5335_v61  ;;  %v515_v56 = vld [vmem:[%s11201_s1 + $0x800] sm:$0xff]  ;;  %v526_v61 = vld [vmem:[%s11201_s1 + $0x858] sm:$0xff]  ;;  %v5387_v51 = vpack.c.bf16 %v528_v49, %v519_v48 }
  0x74   : > { %v5293_v2 = vpack.c.bf16 %v524_v57, %v515_v56 }
  0x76   : > { %5274 = vmatpush1.bf16.msra.mxu0 %v5273_v3  ;;  %5338 = vmatpush1.bf16.msra.mxu1 %v5337_v4  ;;  %v5357_v3 = vpack.c.bf16 %v526_v61, %v517_v58  ;;  %v5295_v4 = vpack.c.bf16 %v543_v63, %v534_v62  ;;  %v393_v58 = vld [vmem:[%s11201_s1 + $0x430] sm:$0xff] }
  0x77   : > { %5276 = vmatprep.subr.bf16.mxu0 %v5275_v5  ;;  %5340 = vmatprep.subr.bf16.mxu1 %v5339_v9  ;;  %v533_v5 = vld [vmem:[%s11201_s1 + $0x890] sm:$0xff]  ;;  %v544_v9 = vld [vmem:[%s11201_s1 + $0x8e8] sm:$0xff] }
  0x78   : > { %v5297_v12 = vpack.c.bf16 %v542_v6, %v533_v5  ;;  %v5361_v13 = vpack.c.bf16 %v544_v9, %v535_v7 }
  0x7a   : > { %5278 = vmatpush1.bf16.msra.mxu0 %v5277_v15  ;;  %5342 = vmatpush1.bf16.msra.mxu1 %v5341_v16  ;;  %v267_v15 = vld [vmem:[%s11201_s1 + $0x40] sm:$0xff]  ;;  %v276_v16 = vld [vmem:[%s11201_s1 + $0x88] sm:$0xff] }
  0x7b   : > { %5280 = vmatprep.subr.bf16.mxu0 %v5279_v19  ;;  %5344 = vmatprep.subr.bf16.mxu1 %v5343_v23  ;;  %v429_v19 = vld [vmem:[%s11201_s1 + $0x550] sm:$0xff]  ;;  %v5365_v21 = vpack.c.bf16 %v276_v16, %v267_v15 }
  0x7c   : > { %v5367_v22 = vpack.c.bf16 %v438_v20, %v429_v19  ;;  %v285_v23 = vld [vmem:[%s11201_s1 + $0xd0] sm:$0xff] }
  0x7d   : > { %v5369_v27 = vpack.c.bf16 %v294_v24, %v285_v23 }
  0x7e   : > { %5282 = vmatpush1.bf16.msra.mxu0 %v5281_v29  ;;  %5346 = vmatpush1.bf16.msra.mxu1 %v5345_v30  ;;  %v303_v29 = vld [vmem:[%s11201_s1 + $0x160] sm:$0xff]  ;;  %v312_v30 = vld [vmem:[%s11201_s1 + $0x1a8] sm:$0xff] }
  0x7f   : > { %5284 = vmatprep.subr.bf16.mxu0 %v5283_v31  ;;  %5348 = vmatprep.subr.bf16.mxu1 %v5347_v35  ;;  %v465_v31 = vld [vmem:[%s11201_s1 + $0x670] sm:$0xff]  ;;  %v5373_v33 = vpack.c.bf16 %v312_v30, %v303_v29 }
  0x80   : > { %v5375_v34 = vpack.c.bf16 %v474_v32, %v465_v31  ;;  %v321_v35 = vld [vmem:[%s11201_s1 + $0x1f0] sm:$0xff] }
  0x82   : > { %5286 = vmatpush1.bf16.msra.mxu0 %v5285_v41  ;;  %5350 = vmatpush1.bf16.msra.mxu1 %v5349_v42  ;;  %v348_v41 = vld [vmem:[%s11201_s1 + $0x2c8] sm:$0xff]  ;;  %v501_v42 = vld [vmem:[%s11201_s1 + $0x790] sm:$0xff] }
  0x83   : > { %5288 = vmatprep.subr.bf16.mxu0 %v5287_v43  ;;  %5352 = vmatprep.subr.bf16.mxu1 %v5351_v47  ;;  %v510_v43 = vld [vmem:[%s11201_s1 + $0x7d8] sm:$0xff]  ;;  %v5381_v44 = vpack.c.bf16 %v348_v41, %v339_v40 }
  0x84   : > { %v5383_v45 = vpack.c.bf16 %v510_v43, %v501_v42  ;;  %v366_v47 = vld [vmem:[%s11201_s1 + $0x358] sm:$0xff] }
  0x85   : > { %v5385_v50 = vpack.c.bf16 %v366_v47, %v357_v46  ;;  %v8325_v47 = vld [vmem:[#allocation2] sm:$0xff] }
  0x86   : > { %5290 = vmatpush1.bf16.msra.mxu0 %v5289_v53  ;;  %5354 = vmatpush1.bf16.msra.mxu1 %v5353_v54  ;;  %v384_v53 = vld [vmem:[%s11201_s1 + $0x3e8] sm:$0xff]  ;;  %v537_v54 = vld [vmem:[%s11201_s1 + $0x8b0] sm:$0xff] }
  0x87   : > { %5292 = vmatprep.subr.bf16.mxu0 %v5291_v55  ;;  %5356 = vmatprep.subr.bf16.mxu1 %v5355_v60  ;;  %v546_v55 = vld [vmem:[%s11201_s1 + $0x8f8] sm:$0xff]  ;;  %v5389_v56 = vpack.c.bf16 %v384_v53, %v375_v52 }
  0x88   : > { %v5391_v57 = vpack.c.bf16 %v546_v55, %v537_v54  ;;  %v402_v60 = vld [vmem:[%s11201_s1 + $0x478] sm:$0xff] }
  0x89   : > { %v5393_v61 = vpack.c.bf16 %v402_v60, %v393_v58 }
  0x8a   : > { %5294 = vmatpush1.bf16.msra.mxu0 %v5293_v2  ;;  %5358 = vmatpush1.bf16.msra.mxu1 %v5357_v3 }
  0x8b   : > { %5296 = vmatprep.subr.bf16.mxu0 %v5295_v4  ;;  %5360 = vmatprep.subr.bf16.mxu1 %v5359_v8 }
  0x8e   : > { %5298 = vmatpush1.bf16.msra.mxu0 %v5297_v12  ;;  %5362 = vmatpush1.bf16.msra.mxu1 %v5361_v13 }
  0x8f   : > { %5364 = vmatprep.subr.bf16.mxu0 %v5363_v14 }
  0x91   : > { %754 = vmatmul.mubr.f32.vlgmr.msra.gmra.mrb[2].mxu0 %v7780_v18  ;;  %825 = vmatmul.mubr.f32.vlgmr.msra.gmra.mrb[2].mxu1 %v7780_v18 }
  0x92   : > { %5366 = vmatpush3.bf16.msra.mxu0 %v5365_v21  ;;  %895 = vmatprep.mubr.f32.mxu0 %v7649_v17  ;;  %v330_v17 = vld [vmem:[%s11201_s1 + $0x238] sm:$0xff] }
  0x93   : > { %5368 = vmatprep.subr.bf16.mxu0 %v5367_v22  ;;  %1575 = vmatprep.mubr.f32.mxu1 %v7246_v59  ;;  %v5377_v38 = vpack.c.bf16 %v330_v17, %v321_v35 }
  0x96   : > { %5370 = vmatpush3.bf16.msra.mxu0 %v5369_v27 }
  0x97   : > { %5372 = vmatprep.subr.bf16.mxu0 %v5371_v28 }
  0x9a   : > { %5374 = vmatpush3.bf16.msra.mxu0 %v5373_v33 }
  0x9b   : > { %5376 = vmatprep.subr.bf16.mxu0 %v5375_v34 }
  0x9e   : > { %5378 = vmatpush3.bf16.msra.mxu0 %v5377_v38 }
  0x9f   : > { %5380 = vmatprep.subr.bf16.mxu0 %v5379_v39 }
  0xa2   : > { %5382 = vmatpush3.bf16.msra.mxu0 %v5381_v44 }
  0xa3   : > { %5384 = vmatprep.subr.bf16.mxu0 %v5383_v45 }
  0xa6   : > { %5386 = vmatpush3.bf16.msra.mxu0 %v5385_v50 }
  0xa7   : > { %5388 = vmatprep.subr.bf16.mxu0 %v5387_v51 }
  0xaa   : > { %5390 = vmatpush3.bf16.msra.mxu0 %v5389_v56 }
  0xab   : > { %5392 = vmatprep.subr.bf16.mxu0 %v5391_v57 }
  0xae   : > { %5394 = vmatpush3.bf16.msra.mxu0 %v5393_v61 }
  0xb1   : > { %896 = vmatmul.mubr.f32.vlgmr.msra.gmra.mrb[4].mxu0 %v7780_v18 }
  0xb2   : > { %1717 = vmatprep.mubr.f32.mxu0 %v7246_v59 }
 0x124   : > { %v613_v62 = vpop.f32.mrb[0].mxu0  ;;  %v684_v63 = vpop.f32.mrb[0].mxu1 }
 0x125   : > { %v615_v0 = vpop.f32.mrb[1].mxu0  ;;  %v5758_v1 = vpack.i.bf16 %v7246_v59, %v684_v63  ;;  %v686_v2 = vpop.f32.mrb[1].mxu1 }
 0x126   : > { %v5768_v3 = vpack.i.bf16 %v615_v0, %v613_v62  ;;  %v5788_v4 = vpack.i.bf16 %v686_v2, %v684_v63 }
 0x127   : > { %5759 = vrot.lane.b32.xlu1 %v5758_v1, %s7247_s17  ;;  %5754 = vrot.lane.b32.xlu0 %v5758_v1, %s7248_s23 }
 0x12b   : > { %5764 = vrot.lane.b32.xlu1 %v5758_v1, %s7249_s13  ;;  %5769 = vrot.lane.b32.xlu0 %v5768_v3, %s7248_s23 }
 0x12f   : > { %1130 = vrot.lane.b32.xlu1 %v613_v62, %s7250_s26  ;;  %5779 = vrot.lane.b32.xlu0 %v5768_v3, %s7249_s13 }
 0x133   : > { %1134 = vrot.lane.b32.xlu1 %v684_v63, %s7250_s26  ;;  %5784 = vrot.lane.b32.xlu0 %v5768_v3, %s7251_s30 }
 0x137   : > { %5774 = vrot.lane.b32.xlu1 %v5768_v3, %s7247_s17  ;;  %5794 = vrot.lane.b32.xlu0 %v5768_v3, %s7252_s6 }
 0x13b   : > { %5789 = vrot.lane.b32.xlu1 %v5788_v4, %s7251_s30  ;;  %5804 = vrot.lane.b32.xlu0 %v5768_v3, %s7253_s7 }
 0x13f   : > { %5799 = vrot.lane.b32.xlu1 %v5788_v4, %s7252_s6  ;;  %5814 = vrot.lane.b32.xlu0 %v5768_v3, %s7254_s8 }
 0x143   : > { %5809 = vrot.lane.b32.xlu1 %v5788_v4, %s7253_s7  ;;  %1132 = vrot.lane.b32.xlu0 %v615_v0, %s7250_s26 }
 0x147   : > { %5819 = vrot.lane.b32.xlu1 %v5788_v4, %s7254_s8  ;;  %1136 = vrot.lane.b32.xlu0 %v686_v2, %s7250_s26 }
 0x14b   : > { %5824 = vrot.lane.b32.xlu0 %v5768_v3, %s7255_s15 }
 0x14f   : > { %5829 = vrot.lane.b32.xlu0 %v5788_v4, %s7255_s15 }
 0x164   : > { %v755_v59 = vpop.f32.mrb[2].mxu0  ;;  %v826_v5 = vpop.f32.mrb[2].mxu1 }
 0x165   : > { %v757_v18 = vpop.f32.mrb[3].mxu0  ;;  %v5843_v6 = vpack.i.bf16 %v755_v59, %v686_v2  ;;  %v828_v7 = vpop.f32.mrb[3].mxu1 }
 0x166   : > { %v5848_v8 = vpack.i.bf16 %v757_v18, %v755_v59  ;;  %v5868_v9 = vpack.i.bf16 %v826_v5, %v757_v18  ;;  %v5888_v10 = vpack.i.bf16 %v828_v7, %v826_v5 }
 0x167   : > { %5844 = vrot.lane.b32.xlu1 %v5843_v6, %s7249_s13  ;;  %5834 = vrot.lane.b32.xlu0 %v5843_v6, %s7248_s23 }
 0x16b   : > { %1138 = vrot.lane.b32.xlu1 %v755_v59, %s7250_s26  ;;  %5839 = vrot.lane.b32.xlu0 %v5843_v6, %s7247_s17 }
 0x16f   : > { %1142 = vrot.lane.b32.xlu1 %v826_v5, %s7250_s26  ;;  %5849 = vrot.lane.b32.xlu0 %v5848_v8, %s7251_s30 }
 0x173   : > { %5854 = vrot.lane.b32.xlu1 %v5848_v8, %s7252_s6  ;;  %5859 = vrot.lane.b32.xlu0 %v5848_v8, %s7253_s7 }
 0x177   : > { %5864 = vrot.lane.b32.xlu1 %v5848_v8, %s7254_s8  ;;  %5869 = vrot.lane.b32.xlu0 %v5868_v9, %s7248_s23 }
 0x17b   : > { %5879 = vrot.lane.b32.xlu1 %v5868_v9, %s7249_s13  ;;  %5874 = vrot.lane.b32.xlu0 %v5868_v9, %s7247_s17 }
 0x17f   : > { %5889 = vrot.lane.b32.xlu1 %v5888_v10, %s7252_s6  ;;  %5884 = vrot.lane.b32.xlu0 %v5888_v10, %s7251_s30 }
 0x183   : > { %5899 = vrot.lane.b32.xlu1 %v5888_v10, %s7254_s8  ;;  %5894 = vrot.lane.b32.xlu0 %v5888_v10, %s7253_s7 }
 0x184   : > { %v4980_v11 = vpop.f32.mrb[4].mxu0 }
 0x185   : > { %v4981_v12 = vpop.f32.mrb[5].mxu0 }
 0x186   : > { %v4982_v13 = vadd.f32 %v4981_v12, %v4980_v11 }
 0x187   : > { %5904 = vrot.lane.b32.xlu1 %v5848_v8, %s7255_s15  ;;  %1140 = vrot.lane.b32.xlu0 %v757_v18, %s7250_s26 }
 0x188   : > { %909 = vst.msk [vmem:[#allocation2 + $0x48] sm:$0xff] %vm233_vm0, %v4982_v13 }
 0x18b   : > { %5909 = vrot.lane.b32.xlu1 %v5888_v10, %s7255_s15  ;;  %1144 = vrot.lane.b32.xlu0 %v828_v7, %s7250_s26 }
 0x18f   : > { %v8278_v14 = vld [vmem:[#allocation2 + $0x48] sm:$0xff] }
 0x190   : > { %v5918_v15 = vpack.i.bf16 %v8278_v14, %v828_v7 }
 0x192   : > { %5919 = vrot.lane.b32.xlu0 %v5918_v15, %s7247_s17  ;;  %5914 = vrot.lane.b32.xlu1 %v5918_v15, %s7248_s23 }
 0x196   : > { %1038 = vrot.lane.b32.xlu0 %v8278_v14, %s7251_s30  ;;  %5924 = vrot.lane.b32.xlu1 %v5918_v15, %s7249_s13 }
 0x199   : > { %v8290_v16 = vpop.permute.xlu1 %5759  ;;  %v8292_v19 = vpop.permute.xlu0 %5754 }
 0x19a   : > { %1092 = vrot.lane.b32.xlu0 %v8278_v14, %s7253_s7  ;;  %1065 = vrot.lane.b32.xlu1 %v8278_v14, %s7252_s6  ;;  %v5757_v31 = vunpack.i.h.bf16 %v8292_v19  ;;  %v5762_v43 = vunpack.i.h.bf16 %v8290_v16  ;;  %v5756_v45 = vunpack.i.l.bf16 %v8292_v19  ;;  %v5761_v2 = vunpack.i.l.bf16 %v8290_v16 }
 0x19d   : > { %v8296_v20 = vpop.permute.xlu1 %5764  ;;  %v5770_v21 = vpop.permute.xlu0 %5769 }
 0x19e   : > { %1119 = vrot.lane.b32.xlu1 %v8278_v14, %s7254_s8  ;;  %v5771_v32 = vunpack.i.l.bf16 %v5770_v21  ;;  %v5766_v35 = vunpack.i.l.bf16 %v8296_v20  ;;  %v5767_v44 = vunpack.i.h.bf16 %v8296_v20  ;;  %v5772_v46 = vunpack.i.h.bf16 %v5770_v21 }
 0x1a0   : > { %v953_v40 = vsel %vm952_vm1, %v5757_v31, %v5771_v32  ;;  %v954_v63 = vsel %vm952_vm1, %v5771_v32, %v5772_v46  ;;  %v955_v0 = vsel %vm952_vm1, %v5772_v46, %v5756_v45 }
 0x1a1   : > { %v8300_v22 = vpop.permute.xlu1 %1130  ;;  %v5780_v23 = vpop.permute.xlu0 %5779  ;;  %v5938_v48 = vpack.i.bf16 %v953_v40, %v8325_v47  ;;  %v5948_v18 = vpack.i.bf16 %v955_v0, %v954_v63 }
 0x1a2   : > { %1146 = vrot.lane.b32.xlu1 %v8278_v14, %s7250_s26  ;;  %v5782_v17 = vunpack.i.h.bf16 %v5780_v23  ;;  %v5781_v36 = vunpack.i.l.bf16 %v5780_v23 }
 0x1a4   : > { %v1014_v52 = vsel %vm1012_vm2, %v5781_v36, %v5782_v17  ;;  %v1015_v53 = vsel %vm1012_vm2, %v5782_v17, %v5766_v35  ;;  %v1013_v56 = vsel %vm1012_vm2, %v5767_v44, %v5781_v36 }
 0x1a5   : > { %v8302_v24 = vpop.permute.xlu1 %1134  ;;  %v5785_v25 = vpop.permute.xlu0 %5784  ;;  %v5958_v57 = vpack.i.bf16 %v1015_v53, %v1014_v52 }
 0x1a6   : > { %v5786_v28 = vunpack.i.l.bf16 %v5785_v25  ;;  %v5787_v55 = vunpack.i.h.bf16 %v5785_v25 }
 0x1a8   : > { %v1041_v4 = vsel %vm1040_vm4, %v5786_v28, %v5787_v55 }
 0x1a9   : > { %v5775_v26 = vpop.permute.xlu1 %5774  ;;  %v8304_v27 = vpop.permute.xlu0 %5794 }
 0x1aa   : > { %v5796_v29 = vunpack.i.l.bf16 %v8304_v27  ;;  %v5776_v37 = vunpack.i.l.bf16 %v5775_v26  ;;  %v5777_v60 = vunpack.i.h.bf16 %v5775_v26  ;;  %v5797_v9 = vunpack.i.h.bf16 %v8304_v27 }
 0x1ac   : > { %v5928_v30 = vpack.i.bf16 %v5796_v29, %v5786_v28  ;;  %v983_v54 = vsel %vm982_vm3, %v5762_v43, %v5776_v37  ;;  %v984_v7 = vsel %vm982_vm3, %v5776_v37, %v5777_v60  ;;  %v985_v8 = vsel %vm982_vm3, %v5777_v60, %v5761_v2 }
 0x1ad   : > { %v8310_v33 = vpop.permute.xlu1 %5789  ;;  %v8312_v34 = vpop.permute.xlu0 %5804  ;;  %v5943_v58 = vpack.i.bf16 %v1013_v56, %v983_v54  ;;  %v5953_v12 = vpack.i.bf16 %v985_v8, %v984_v7  ;;  %v1068_v23 = vsel %vm1067_vm6, %v5796_v29, %v5797_v9 }
 0x1ae   : > { %5929 = vrot.lane.b32.xlu0 %v5928_v30, %s7255_s15  ;;  %v5806_v41 = vunpack.i.l.bf16 %v8312_v34  ;;  %v5791_v50 = vunpack.i.l.bf16 %v8310_v33  ;;  %v5807_v21 = vunpack.i.h.bf16 %v8312_v34  ;;  %v5792_v20 = vunpack.i.h.bf16 %v8310_v33 }
 0x1b0   : > { %v1042_v62 = vsel %vm1040_vm4, %v5787_v55, %v5791_v50  ;;  %v1095_v30 = vsel %vm1094_vm8, %v5806_v41, %v5807_v21 }
 0x1b1   : > { %v8316_v38 = vpop.permute.xlu1 %5799  ;;  %v5815_v39 = vpop.permute.xlu0 %5814  ;;  %v5963_v59 = vpack.i.bf16 %v1042_v62, %v1041_v4  ;;  %v1043_v62 = vsel %vm1040_vm4, %v5791_v50, %v5792_v20 }
 0x1b2   : > { %v5816_v42 = vunpack.i.l.bf16 %v5815_v39  ;;  %1324 = vrot.lane.b32.xlu0 %v8300_v22, %s7255_s15  ;;  %v5817_v3 = vunpack.i.h.bf16 %v5815_v39  ;;  %v5801_v5 = vunpack.i.l.bf16 %v8316_v38 }
 0x1b4   : > { %v5933_v49 = vpack.i.bf16 %v5816_v42, %v5806_v41  ;;  %v1122_v10 = vsel %vm1121_vm5, %v5816_v42, %v5817_v3  ;;  %v1069_v15 = vsel %vm1067_vm6, %v5797_v9, %v5801_v5 }
 0x1b5   : > { %v8331_v51 = vpop.permute.xlu1 %5809  ;;  %v1133_v16 = vpop.permute.xlu0 %1132  ;;  %v5968_v25 = vpack.i.bf16 %v1069_v15, %v1068_v23 }
 0x1b6   : > { %5939 = vrot.lane.b32.xlu0 %v5938_v48, %s7255_s15  ;;  %5934 = vrot.lane.b32.xlu1 %v5933_v49, %s7255_s15  ;;  %v5811_v13 = vunpack.i.l.bf16 %v8331_v51  ;;  %v1149_v26 = vsel %vm1148_vm7, %v8300_v22, %v1133_v16  ;;  %v1150_v22 = vsel %vm1148_vm7, %v1133_v16, %v8302_v24  ;;  %v5812_v60 = vunpack.i.h.bf16 %v8331_v51 }
 0x1b8   : > { %v1096_v28 = vsel %vm1094_vm8, %v5807_v21, %v5811_v13  ;;  %v1097_v50 = vsel %vm1094_vm8, %v5811_v13, %v5812_v60 }
 0x1b9   : > { %v8341_v61 = vpop.permute.xlu1 %5819  ;;  %v8385_v27 = vpop.permute.xlu0 %1136  ;;  %v5973_v29 = vpack.i.bf16 %v1096_v28, %v1095_v30 }
 0x1ba   : > { %v5821_v1 = vunpack.i.l.bf16 %v8341_v61  ;;  %5959 = vrot.lane.b32.xlu0 %v5958_v57, %s7255_s15  ;;  %5944 = vrot.lane.b32.xlu1 %v5943_v58, %s7255_s15  ;;  %v1151_v32 = vsel %vm1148_vm7, %v8302_v24, %v8385_v27  ;;  %v5802_v58 = vunpack.i.h.bf16 %v8316_v38 }
 0x1bc   : > { %v1123_v6 = vsel %vm1121_vm5, %v5817_v3, %v5821_v1 }
 0x1bd   : > { %v5978_v11 = vpack.i.bf16 %v1123_v6, %v1122_v10  ;;  %v8390_v31 = vpop.permute.xlu0 %5824  ;;  %v5822_v6 = vunpack.i.h.bf16 %v8341_v61 }
 0x1be   : > { %5964 = vrot.lane.b32.xlu0 %v5963_v59, %s7255_s15  ;;  %5949 = vrot.lane.b32.xlu1 %v5948_v18, %s7255_s15  ;;  %v1070_v18 = vsel %vm1067_vm6, %v5801_v5, %v5802_v58 }
 0x1bf   : > { %v1124_v51 = vsel %vm1121_vm5, %v5821_v1, %v5822_v6 }
 0x1c1   : > { %v8397_v34 = vpop.permute.xlu0 %5829 }
 0x1c2   : > { %5979 = vrot.lane.b32.xlu0 %v5978_v11, %s7255_s15  ;;  %5954 = vrot.lane.b32.xlu1 %v5953_v12, %s7255_s15 }
 0x1c6   : > { %1326 = vrot.lane.b32.xlu0 %v1149_v26, %s7255_s15  ;;  %5969 = vrot.lane.b32.xlu1 %v5968_v25, %s7255_s15 }
 0x1ca   : > { %5974 = vrot.lane.b32.xlu1 %v5973_v29, %s7255_s15 }
 0x1ce   : > { %1328 = vrot.lane.b32.xlu1 %v1150_v22, %s7255_s15 }
 0x1d2   : > { %1330 = vrot.lane.b32.xlu1 %v1151_v32, %s7255_s15 }
 0x1d9   : > { %v8399_v17 = vpop.permute.xlu1 %5844  ;;  %v8401_v36 = vpop.permute.xlu0 %5834 }
 0x1da   : > { %v5847_v37 = vunpack.i.h.bf16 %v8399_v17  ;;  %v5846_v39 = vunpack.i.l.bf16 %v8399_v17  ;;  %v5837_v40 = vunpack.i.h.bf16 %v8401_v36  ;;  %v5836_v41 = vunpack.i.l.bf16 %v8401_v36 }
 0x1dc   : > { %v1016_v24 = vsel %vm1012_vm2, %v5766_v35, %v5846_v39  ;;  %v1017_v42 = vsel %vm1012_vm2, %v5846_v39, %v5847_v37  ;;  %v956_v43 = vsel %vm952_vm1, %v5756_v45, %v5836_v41  ;;  %v957_v44 = vsel %vm952_vm1, %v5836_v41, %v5837_v40 }
 0x1dd   : > { %v8417_v46 = vpop.permute.xlu1 %1138  ;;  %v5840_v48 = vpop.permute.xlu0 %5839  ;;  %v5993_v49 = vpack.i.bf16 %v1017_v42, %v1016_v24  ;;  %v5983_v52 = vpack.i.bf16 %v957_v44, %v956_v43 }
 0x1de   : > { %v5842_v53 = vunpack.i.h.bf16 %v5840_v48  ;;  %v5841_v54 = vunpack.i.l.bf16 %v5840_v48  ;;  %v1152_v29 = vsel %vm1148_vm7, %v8385_v27, %v8417_v46 }
 0x1df   : > { %5994 = vrot.lane.b32.xlu0 %v5993_v49, %s7255_s15  ;;  %5984 = vrot.lane.b32.xlu1 %v5983_v52, %s7255_s15 }
 0x1e0   : > { %v986_v35 = vsel %vm982_vm3, %v5761_v2, %v5841_v54  ;;  %v987_v19 = vsel %vm982_vm3, %v5841_v54, %v5842_v53 }
 0x1e1   : > { %v8424_v45 = vpop.permute.xlu1 %1142  ;;  %v5850_v55 = vpop.permute.xlu0 %5849  ;;  %v5988_v56 = vpack.i.bf16 %v987_v19, %v986_v35 }
 0x1e2   : > { %v5851_v57 = vunpack.i.l.bf16 %v5850_v55  ;;  %v5852_v61 = vunpack.i.h.bf16 %v5850_v55 }
 0x1e3   : > { %5989 = vrot.lane.b32.xlu1 %v5988_v56, %s7255_s15 }
 0x1e4   : > { %v1044_v63 = vsel %vm1040_vm4, %v5792_v20, %v5851_v57  ;;  %v1045_v27 = vsel %vm1040_vm4, %v5851_v57, %v5852_v61 }
 0x1e5   : > { %v8433_v0 = vpop.permute.xlu1 %5854  ;;  %v5860_v2 = vpop.permute.xlu0 %5859  ;;  %v5998_v3 = vpack.i.bf16 %v1044_v63, %v1043_v62 }
 0x1e6   : > { %v5856_v4 = vunpack.i.l.bf16 %v8433_v0  ;;  %v5861_v59 = vunpack.i.l.bf16 %v5860_v2  ;;  %v5862_v42 = vunpack.i.h.bf16 %v5860_v2  ;;  %v5857_v35 = vunpack.i.h.bf16 %v8433_v0 }
 0x1e7   : > { %5999 = vrot.lane.b32.xlu1 %v5998_v3, %s7255_s15 }
 0x1e8   : > { %v1071_v33 = vsel %vm1067_vm6, %v5802_v58, %v5856_v4  ;;  %v1098_v7 = vsel %vm1094_vm8, %v5812_v60, %v5861_v59  ;;  %v1099_v19 = vsel %vm1094_vm8, %v5861_v59, %v5862_v42  ;;  %v1072_v63 = vsel %vm1067_vm6, %v5856_v4, %v5857_v35 }
 0x1e9   : > { %v8448_v8 = vpop.permute.xlu1 %5864  ;;  %v8450_v9 = vpop.permute.xlu0 %5869  ;;  %v6003_v10 = vpack.i.bf16 %v1071_v33, %v1070_v18  ;;  %v6008_v38 = vpack.i.bf16 %v1098_v7, %v1097_v50 }
 0x1ea   : > { %v5866_v5 = vunpack.i.l.bf16 %v8448_v8  ;;  %v5871_v12 = vunpack.i.l.bf16 %v8450_v9  ;;  %v5872_v21 = vunpack.i.h.bf16 %v8450_v9  ;;  %v5867_v62 = vunpack.i.h.bf16 %v8448_v8 }
 0x1eb   : > { %6004 = vrot.lane.b32.xlu0 %v6003_v10, %s7255_s15  ;;  %6009 = vrot.lane.b32.xlu1 %v6008_v38, %s7255_s15 }
 0x1ec   : > { %v1125_v11 = vsel %vm1121_vm5, %v5822_v6, %v5866_v5  ;;  %v958_v32 = vsel %vm952_vm1, %v5837_v40, %v5871_v12  ;;  %v959_v24 = vsel %vm952_vm1, %v5871_v12, %v5872_v21  ;;  %v1126_v33 = vsel %vm1121_vm5, %v5866_v5, %v5867_v62 }
 0x1ed   : > { %v8460_v13 = vpop.permute.xlu1 %5879  ;;  %v8462_v15 = vpop.permute.xlu0 %5874  ;;  %v6013_v16 = vpack.i.bf16 %v1125_v11, %v1124_v51  ;;  %v6018_v48 = vpack.i.bf16 %v959_v24, %v958_v32 }
 0x1ee   : > { %v5877_v23 = vunpack.i.h.bf16 %v8462_v15  ;;  %v5876_v25 = vunpack.i.l.bf16 %v8462_v15  ;;  %v5882_v36 = vunpack.i.h.bf16 %v8460_v13  ;;  %v5881_v39 = vunpack.i.l.bf16 %v8460_v13 }
 0x1ef   : > { %6014 = vrot.lane.b32.xlu0 %v6013_v16, %s7255_s15 }
 0x1f0   : > { %v988_v1 = vsel %vm982_vm3, %v5842_v53, %v5876_v25  ;;  %v989_v26 = vsel %vm982_vm3, %v5876_v25, %v5877_v23  ;;  %v1018_v54 = vsel %vm1012_vm2, %v5847_v37, %v5881_v39  ;;  %v1019_v20 = vsel %vm1012_vm2, %v5881_v39, %v5882_v36 }
 0x1f1   : > { %v8470_v28 = vpop.permute.xlu1 %5889  ;;  %v8472_v30 = vpop.permute.xlu0 %5884  ;;  %v6023_v22 = vpack.i.bf16 %v989_v26, %v988_v1  ;;  %v6028_v56 = vpack.i.bf16 %v1019_v20, %v1018_v54 }
 0x1f2   : > { %v5886_v41 = vunpack.i.l.bf16 %v8472_v30  ;;  %v5891_v52 = vunpack.i.l.bf16 %v8470_v28  ;;  %v5887_v38 = vunpack.i.h.bf16 %v8472_v30 }
 0x1f3   : > { %1332 = vrot.lane.b32.xlu0 %v1152_v29, %s7255_s15  ;;  %6024 = vrot.lane.b32.xlu1 %v6023_v22, %s7255_s15  ;;  %v5892_v22 = vunpack.i.h.bf16 %v8470_v28 }
 0x1f4   : > { %v1046_v40 = vsel %vm1040_vm4, %v5852_v61, %v5886_v41  ;;  %v1073_v60 = vsel %vm1067_vm6, %v5857_v35, %v5891_v52 }
 0x1f5   : > { %v8490_v43 = vpop.permute.xlu1 %5899  ;;  %v8492_v44 = vpop.permute.xlu0 %5894  ;;  %v6033_v49 = vpack.i.bf16 %v1046_v40, %v1045_v27  ;;  %v6038_v2 = vpack.i.bf16 %v1073_v60, %v1072_v63 }
 0x1f6   : > { %v5896_v53 = vunpack.i.l.bf16 %v8492_v44  ;;  %v5901_v37 = vunpack.i.l.bf16 %v8490_v43  ;;  %v5897_v9 = vunpack.i.h.bf16 %v8492_v44  ;;  %v5902_v30 = vunpack.i.h.bf16 %v8490_v43 }
 0x1f7   : > { %6019 = vrot.lane.b32.xlu0 %v6018_v48, %s7255_s15  ;;  %6034 = vrot.lane.b32.xlu1 %v6033_v49, %s7255_s15 }
 0x1f8   : > { %v1100_v55 = vsel %vm1094_vm8, %v5862_v42, %v5896_v53  ;;  %v1127_v59 = vsel %vm1121_vm5, %v5867_v62, %v5901_v37  ;;  %v1101_v13 = vsel %vm1094_vm8, %v5896_v53, %v5897_v9  ;;  %v1128_v35 = vsel %vm1121_vm5, %v5901_v37, %v5902_v30 }
 0x1f9   : > { %v6043_v17 = vpack.i.bf16 %v1100_v55, %v1099_v19  ;;  %v8510_v57 = vpop.permute.xlu1 %5904  ;;  %v8512_v58 = vpop.permute.xlu0 %1140  ;;  %v6048_v50 = vpack.i.bf16 %v1127_v59, %v1126_v33  ;;  %v7256_v55 = vmov 0   ;;  %v5826_v59 = vunpack.i.l.bf16 %v8390_v31 }
 0x1fa   : > { %v1153_v3 = vsel %vm1148_vm7, %v8417_v46, %v8512_v58  ;;  %6108 = vset.pattern.permute.xlu0 %v7256_v55  ;;  %6819 = vset.pattern.permute.xlu1 %v7256_v55 }
 0x1fb   : > { %6029 = vrot.lane.b32.xlu0 %v6028_v56, %s7255_s15  ;;  %6044 = vrot.lane.b32.xlu1 %v6043_v17, %s7255_s15 }
 0x1fd   : > { %v8529_v18 = vpop.permute.xlu1 %5909  ;;  %v1145_v6 = vpop.permute.xlu0 %1144 }
 0x1ff   : > { %6039 = vrot.lane.b32.xlu0 %v6038_v2, %s7255_s15  ;;  %1334 = vrot.lane.b32.xlu1 %v1153_v3, %s7255_s15  ;;  %v5827_v3 = vunpack.i.h.bf16 %v8390_v31 }
 0x203   : > { %6049 = vrot.lane.b32.xlu0 %v6048_v50, %s7255_s15 }
 0x204   : > { %v5920_v0 = vpop.permute.xlu0 %5919  ;;  %v5915_v4 = vpop.permute.xlu1 %5914 }
 0x205   : > { %v5922_v7 = vunpack.i.h.bf16 %v5920_v0  ;;  %v5921_v8 = vunpack.i.l.bf16 %v5920_v0  ;;  %v5917_v10 = vunpack.i.h.bf16 %v5915_v4  ;;  %v5916_v46 = vunpack.i.l.bf16 %v5915_v4 }
 0x207   : > { %v990_v51 = vsel %vm982_vm3, %v5877_v23, %v5921_v8  ;;  %v991_v11 = vsel %vm982_vm3, %v5921_v8, %v5922_v7  ;;  %v960_v12 = vsel %vm952_vm1, %v5872_v21, %v5916_v46  ;;  %v961_v5 = vsel %vm952_vm1, %v5916_v46, %v5917_v10 }
 0x208   : > { %v1039_v15 = vpop.permute.xlu0 %1038  ;;  %v5925_v16 = vpop.permute.xlu1 %5924  ;;  %v6058_v25 = vpack.i.bf16 %v991_v11, %v990_v51  ;;  %v6053_v61 = vpack.i.bf16 %v961_v5, %v960_v12  ;;  %v1047_v21 = vsel %vm1040_vm4, %v5886_v41, %v5887_v38  ;;  %v6088_v43 = vpack.i.bf16 %v5917_v10, %v8278_v14 }
 0x209   : > { %v1048_v1 = vsel %vm1040_vm4, %v5887_v38, %v1039_v15  ;;  %v5927_v26 = vunpack.i.h.bf16 %v5925_v16  ;;  %v5926_v29 = vunpack.i.l.bf16 %v5925_v16  ;;  %v1155_v14 = vsel %vm1148_vm7, %v8424_v45, %v1145_v6 }
 0x20a   : > { %6059 = vrot.lane.b32.xlu1 %v6058_v25, %s7255_s15  ;;  %6054 = vrot.lane.b32.xlu0 %v6053_v61, %s7255_s15  ;;  %v6068_v42 = vpack.i.bf16 %v1048_v1, %v1047_v21  ;;  %v1346_v46 = vsel %vm1344_vm9, %v5826_v59, %v5827_v3 }
 0x20b   : > { %v1020_v23 = vsel %vm1012_vm2, %v5882_v36, %v5926_v29  ;;  %v1021_v32 = vsel %vm1012_vm2, %v5926_v29, %v5927_v26  ;;  %v1074_v36 = vsel %vm1067_vm6, %v5891_v52, %v5892_v22  ;;  %v1154_v52 = vsel %vm1148_vm7, %v8512_v58, %v8424_v45  ;;  %v1158_v45 = vld [vmem:[%s11204_s4] sm:$0xff] }
 0x20c   : > { %v1093_v39 = vpop.permute.xlu0 %1092  ;;  %v1066_v24 = vpop.permute.xlu1 %1065  ;;  %v6063_v27 = vpack.i.bf16 %v1021_v32, %v1020_v23  ;;  %v6093_v56 = vpack.i.bf16 %v5927_v26, %v5922_v7 }
 0x20d   : > { %v1102_v40 = vsel %vm1094_vm8, %v5897_v9, %v1093_v39  ;;  %v1075_v48 = vsel %vm1067_vm6, %v5892_v22, %v1066_v24  ;;  %v6098_v53 = vpack.i.bf16 %v1066_v24, %v1039_v15 }
 0x20e   : > { %6069 = vrot.lane.b32.xlu1 %v6068_v42, %s7255_s15  ;;  %6064 = vrot.lane.b32.xlu0 %v6063_v27, %s7255_s15  ;;  %v6078_v49 = vpack.i.bf16 %v1102_v40, %v1101_v13  ;;  %v6073_v54 = vpack.i.bf16 %v1075_v48, %v1074_v36 }
 0x210   : > { %v1120_v41 = vpop.permute.xlu1 %1119 }
 0x211   : > { %v1129_v20 = vsel %vm1121_vm5, %v5902_v30, %v1120_v41  ;;  %v6103_v37 = vpack.i.bf16 %v1120_v41, %v1093_v39 }
 0x212   : > { %6079 = vrot.lane.b32.xlu1 %v6078_v49, %s7255_s15  ;;  %6074 = vrot.lane.b32.xlu0 %v6073_v54, %s7255_s15  ;;  %v6083_v44 = vpack.i.bf16 %v1129_v20, %v1128_v35 }
 0x214   : > { %v1147_v19 = vpop.permute.xlu1 %1146 }
 0x215   : > { %v1156_v28 = vsel %vm1148_vm7, %v1145_v6, %v1147_v19 }
 0x216   : > { %6089 = vrot.lane.b32.xlu1 %v6088_v43, %s7255_s15  ;;  %6084 = vrot.lane.b32.xlu0 %v6083_v44, %s7255_s15 }
 0x21a   : > { %1340 = vrot.lane.b32.xlu1 %v1156_v28, %s7255_s15  ;;  %1336 = vrot.lane.b32.xlu0 %v1154_v52, %s7255_s15 }
 0x21e   : > { %6099 = vrot.lane.b32.xlu1 %v6098_v53, %s7255_s15  ;;  %1338 = vrot.lane.b32.xlu0 %v1155_v14, %s7255_s15 }
 0x220   : > { %v5930_v17 = vpop.permute.xlu0 %5929 }
 0x221   : > { %v5931_v32 = vunpack.i.l.bf16 %v5930_v17  ;;  %v5932_v40 = vunpack.i.h.bf16 %v5930_v17 }
 0x222   : > { %1342 = vrot.lane.b32.xlu1 %v1147_v19, %s7255_s15  ;;  %6094 = vrot.lane.b32.xlu0 %v6093_v56, %s7255_s15 }
 0x224   : > { %v8582_v58 = vpop.permute.xlu0 %1324 }
 0x226   : > { %6104 = vrot.lane.b32.xlu0 %v6103_v37, %s7255_s15 }
 0x228   : > { %v5940_v60 = vpop.permute.xlu0 %5939  ;;  %v5935_v62 = vpop.permute.xlu1 %5934 }
 0x229   : > { %v5941_v6 = vunpack.i.l.bf16 %v5940_v60  ;;  %v5942_v50 = vunpack.i.h.bf16 %v5940_v60  ;;  %v5937_v19 = vunpack.i.h.bf16 %v5935_v62  ;;  %v5936_v28 = vunpack.i.l.bf16 %v5935_v62 }
 0x22a   : > { %1161 = vperm.xlu0 %6108, %v1158_v45  }
 0x22b   : > { %v1345_v7 = vsel %vm1344_vm9, %v5941_v6, %v5826_v59  ;;  %v8657_v59 = vld [vmem:[%s11203_s3] sm:$0xff] }
 0x22c   : > { %v8588_v63 = vpop.permute.xlu0 %5959  ;;  %v5945_v2 = vpop.permute.xlu1 %5944 }
 0x22d   : > { %v5962_v8 = vunpack.i.h.bf16 %v8588_v63  ;;  %v5961_v38 = vunpack.i.l.bf16 %v8588_v63  ;;  %v5947_v51 = vunpack.i.h.bf16 %v5945_v2  ;;  %v5946_v25 = vunpack.i.l.bf16 %v5945_v2 }
 0x22f   : > { %v1372_v22 = vsel %vm1344_vm9, %v5947_v51, %v5961_v38  ;;  %v1373_v23 = vsel %vm1344_vm9, %v5961_v38, %v5962_v8 }
 0x230   : > { %v8592_v33 = vpop.permute.xlu1 %5949  ;;  %v8598_v10 = vpop.permute.xlu0 %5964 }
 0x231   : > { %v5952_v0 = vunpack.i.h.bf16 %v8592_v33  ;;  %v5951_v4 = vunpack.i.l.bf16 %v8592_v33  ;;  %v5967_v26 = vunpack.i.h.bf16 %v8598_v10  ;;  %v5966_v29 = vunpack.i.l.bf16 %v8598_v10 }
 0x233   : > { %v1354_v11 = vsel %vm1344_vm9, %v5942_v50, %v5951_v4  ;;  %v1355_v12 = vsel %vm1344_vm9, %v5951_v4, %v5952_v0  ;;  %v1381_v13 = vsel %vm1344_vm9, %v5931_v32, %v5966_v29  ;;  %v1382_v36 = vsel %vm1344_vm9, %v5966_v29, %v5967_v26 }
 0x234   : > { %v8608_v5 = vpop.permute.xlu1 %5954  ;;  %v5395_v15 = vpack.c.bf16 %v1355_v12, %v1346_v46  ;;  %v5397_v16 = vpack.c.bf16 %v1354_v11, %v1345_v7  ;;  %v8622_v39 = vpop.permute.xlu0 %5979  ;;  %v5832_v4 = vunpack.i.h.bf16 %v8397_v34  ;;  %v5831_v7 = vunpack.i.l.bf16 %v8397_v34 }
 0x235   : > { %v5957_v61 = vunpack.i.h.bf16 %v8608_v5  ;;  %v5956_v1 = vunpack.i.l.bf16 %v8608_v5  ;;  %v5982_v41 = vunpack.i.h.bf16 %v8622_v39  ;;  %v5981_v49 = vunpack.i.l.bf16 %v8622_v39 }
 0x236   : > { %5396 = vmatprep.subr.bf16.mxu1 %v5395_v15  ;;  %v1347_v11 = vsel %vm1344_vm9, %v5827_v3, %v5831_v7  ;;  %v1348_v12 = vsel %vm1344_vm9, %v5831_v7, %v5832_v4  ;;  %v5906_v39 = vunpack.i.l.bf16 %v8510_v57 }
 0x237   : > { %v1363_v9 = vsel %vm1344_vm9, %v5946_v25, %v5956_v1  ;;  %5398 = vmatpush1.bf16.msra.mxu1 %v5397_v16  ;;  %v1364_v21 = vsel %vm1344_vm9, %v5956_v1, %v5957_v61  ;;  %v1408_v14 = vsel %vm1344_vm9, %v5937_v19, %v5981_v49  ;;  %v1409_v17 = vsel %vm1344_vm9, %v5981_v49, %v5982_v41 }
 0x238   : > { %v8624_v24 = vpop.permute.xlu1 %5969  ;;  %v5399_v42 = vpack.c.bf16 %v1373_v23, %v1364_v21  ;;  %v5401_v27 = vpack.c.bf16 %v1372_v22, %v1363_v9  ;;  %v1327_v62 = vpop.permute.xlu0 %1326 }
 0x239   : > { %v5972_v48 = vunpack.i.h.bf16 %v8624_v24  ;;  %v5971_v30 = vunpack.i.l.bf16 %v8624_v24  ;;  %v1417_v6 = vsel %vm1344_vm9, %v8582_v58, %v1327_v62 }
 0x23a   : > { %5400 = vmatprep.subr.bf16.mxu1 %v5399_v42 }
 0x23b   : > { %v1390_v54 = vsel %vm1344_vm9, %v5932_v40, %v5971_v30  ;;  %5402 = vmatpush1.bf16.msra.mxu1 %v5401_v27  ;;  %v1391_v20 = vsel %vm1344_vm9, %v5971_v30, %v5972_v48 }
 0x23c   : > { %v8638_v35 = vpop.permute.xlu1 %5974  ;;  %v5403_v43 = vpack.c.bf16 %v1391_v20, %v1382_v36  ;;  %v5405_v44 = vpack.c.bf16 %v1390_v54, %v1381_v13 }
 0x23d   : > { %v5977_v52 = vunpack.i.h.bf16 %v8638_v35  ;;  %v5976_v53 = vunpack.i.l.bf16 %v8638_v35 }
 0x23e   : > { %5404 = vmatprep.subr.bf16.mxu1 %v5403_v43 }
 0x23f   : > { %v1399_v55 = vsel %vm1344_vm9, %v5936_v28, %v5976_v53  ;;  %5406 = vmatpush1.bf16.msra.mxu1 %v5405_v44  ;;  %v1400_v56 = vsel %vm1344_vm9, %v5976_v53, %v5977_v52 }
 0x240   : > { %v8650_v37 = vpop.permute.xlu1 %1328  ;;  %v5407_v45 = vpack.c.bf16 %v1409_v17, %v1400_v56  ;;  %v5409_v60 = vpack.c.bf16 %v1408_v14, %v1399_v55 }
 0x241   : > { %v1418_v2 = vsel %vm1344_vm9, %v1327_v62, %v8650_v37 }
 0x242   : > { %5408 = vmatprep.subr.bf16.mxu1 %v5407_v45 }
 0x243   : > { %5410 = vmatpush1.bf16.msra.mxu1 %v5409_v60 }
 0x244   : > { %1527 = vmatprep.subr.mxu1 %v1418_v2  ;;  %v8664_v50 = vpop.permute.xlu1 %1330  ;;  %v1349_v2 = vsel %vm1344_vm9, %v5832_v4, %v5906_v39 }
 0x245   : > { %v1419_v7 = vsel %vm1344_vm9, %v8650_v37, %v8664_v50 }
 0x247   : > { %1528 = vmatpush1.msra.mxu1 %v1417_v6 }
 0x248   : > { %4917 = vmatmul.mubr.msk.f32.vlgmr.msra.gmra.mrb[4].mxu1 %vm1507_vm10, %v8657_v59 }
 0x249   : > { %1646 = vmatprep.mubr.f32.mxu1 %v8325_v47 }
 0x251   : > { %v8668_v46 = vpop.permute.xlu0 %5994  ;;  %v8670_v38 = vpop.permute.xlu1 %5984 }
 0x252   : > { %v5987_v51 = vunpack.i.h.bf16 %v8670_v38  ;;  %v5986_v58 = vunpack.i.l.bf16 %v8670_v38  ;;  %v5997_v15 = vunpack.i.h.bf16 %v8668_v46  ;;  %v5996_v16 = vunpack.i.l.bf16 %v8668_v46 }
 0x254   : > { %v1356_v25 = vsel %vm1344_vm9, %v5952_v0, %v5986_v58  ;;  %v1357_v1 = vsel %vm1344_vm9, %v5986_v58, %v5987_v51  ;;  %v1374_v21 = vsel %vm1344_vm9, %v5962_v8, %v5996_v16  ;;  %v1375_v23 = vsel %vm1344_vm9, %v5996_v16, %v5997_v15 }
 0x255   : > { %v8688_v29 = vpop.permute.xlu1 %5989  ;;  %v5411_v31 = vpack.c.bf16 %v1357_v1, %v1348_v12  ;;  %v5413_v3 = vpack.c.bf16 %v1356_v25, %v1347_v11 }
 0x256   : > { %v5992_v22 = vunpack.i.h.bf16 %v8688_v29  ;;  %v5991_v9 = vunpack.i.l.bf16 %v8688_v29 }
 0x257   : > { %5412 = vmatprep.subr.bf16.mxu1 %v5411_v31 }
 0x258   : > { %v1365_v33 = vsel %vm1344_vm9, %v5957_v61, %v5991_v9  ;;  %5414 = vmatpush1.bf16.msra.mxu1 %v5413_v3  ;;  %v1366_v0 = vsel %vm1344_vm9, %v5991_v9, %v5992_v22 }
 0x259   : > { %v8704_v32 = vpop.permute.xlu1 %5999  ;;  %v5415_v42 = vpack.c.bf16 %v1375_v23, %v1366_v0  ;;  %v5417_v27 = vpack.c.bf16 %v1374_v21, %v1365_v33 }
 0x25a   : > { %v6002_v63 = vunpack.i.h.bf16 %v8704_v32  ;;  %v6001_v8 = vunpack.i.l.bf16 %v8704_v32 }
 0x25b   : > { %5416 = vmatprep.subr.bf16.mxu1 %v5415_v42 }
 0x25c   : > { %5418 = vmatpush1.bf16.msra.mxu1 %v5417_v27  ;;  %v1383_v13 = vsel %vm1344_vm9, %v5967_v26, %v6001_v8  ;;  %v1384_v36 = vsel %vm1344_vm9, %v6001_v8, %v6002_v63 }
 0x25d   : > { %v8708_v5 = vpop.permute.xlu0 %6004  ;;  %v8710_v61 = vpop.permute.xlu1 %6009 }
 0x25e   : > { %v6007_v40 = vunpack.i.h.bf16 %v8708_v5  ;;  %v6006_v30 = vunpack.i.l.bf16 %v8708_v5  ;;  %v6012_v54 = vunpack.i.h.bf16 %v8710_v61  ;;  %v6011_v20 = vunpack.i.l.bf16 %v8710_v61 }
 0x25f   : > { %v5912_v61 = vunpack.i.h.bf16 %v8529_v18 }
 0x260   : > { %v1392_v49 = vsel %vm1344_vm9, %v5972_v48, %v6006_v30  ;;  %v1393_v43 = vsel %vm1344_vm9, %v6006_v30, %v6007_v40  ;;  %v1401_v24 = vsel %vm1344_vm9, %v5977_v52, %v6011_v20  ;;  %v1402_v53 = vsel %vm1344_vm9, %v6011_v20, %v6012_v54 }
 0x261   : > { %v8728_v44 = vpop.permute.xlu0 %6014  ;;  %v5419_v10 = vpack.c.bf16 %v1393_v43, %v1384_v36  ;;  %v5421_v26 = vpack.c.bf16 %v1392_v49, %v1383_v13  ;;  %v5907_v52 = vunpack.i.h.bf16 %v8510_v57 }
 0x262   : > { %v6017_v19 = vunpack.i.h.bf16 %v8728_v44  ;;  %v6016_v28 = vunpack.i.l.bf16 %v8728_v44 }
 0x263   : > { %5420 = vmatprep.subr.bf16.mxu1 %v5419_v10  ;;  %v1350_v58 = vsel %vm1344_vm9, %v5906_v39, %v5907_v52 }
 0x264   : > { %v1410_v48 = vsel %vm1344_vm9, %v5982_v41, %v6016_v28  ;;  %5422 = vmatpush1.bf16.msra.mxu1 %v5421_v26  ;;  %v1411_v14 = vsel %vm1344_vm9, %v6016_v28, %v6017_v19 }
 0x265   : > { %v8744_v55 = vpop.permute.xlu0 %1332  ;;  %v8746_v56 = vpop.permute.xlu1 %6024  ;;  %v5423_v35 = vpack.c.bf16 %v1411_v14, %v1402_v53  ;;  %v5425_v17 = vpack.c.bf16 %v1410_v48, %v1401_v24 }
 0x266   : > { %v1420_v41 = vsel %vm1344_vm9, %v8664_v50, %v8744_v55  ;;  %v6027_v11 = vunpack.i.h.bf16 %v8746_v56  ;;  %v6026_v12 = vunpack.i.l.bf16 %v8746_v56 }
 0x267   : > { %5424 = vmatprep.subr.bf16.mxu1 %v5423_v35 }
 0x268   : > { %5426 = vmatpush1.bf16.msra.mxu1 %v5425_v17  ;;  %v1367_v31 = vsel %vm1344_vm9, %v5992_v22, %v6026_v12  ;;  %v1368_v9 = vsel %vm1344_vm9, %v6026_v12, %v6027_v11 }
 0x269   : > { %v8753_v45 = vpop.permute.xlu0 %6019  ;;  %1598 = vmatprep.subr.mxu1 %v1420_v41  ;;  %v8760_v6 = vpop.permute.xlu1 %6034 }
 0x26a   : > { %v6022_v60 = vunpack.i.h.bf16 %v8753_v45  ;;  %v6021_v62 = vunpack.i.l.bf16 %v8753_v45  ;;  %v6037_v38 = vunpack.i.h.bf16 %v8760_v6 }
 0x26c   : > { %v1358_v34 = vsel %vm1344_vm9, %v5987_v51, %v6021_v62  ;;  %1599 = vmatpush1.msra.mxu1 %v1419_v7  ;;  %v1359_v4 = vsel %vm1344_vm9, %v6021_v62, %v6022_v60  ;;  %v6036_v51 = vunpack.i.l.bf16 %v8760_v6 }
 0x26d   : > { %v8776_v16 = vpop.permute.xlu0 %6029  ;;  %4918 = vmatmul.mubr.msk.f32.vlgmr.msra.gmra.mrb[6].mxu1 %vm1507_vm10, %v8657_v59  ;;  %v5427_v37 = vpack.c.bf16 %v1359_v4, %v1350_v58  ;;  %v5429_v50 = vpack.c.bf16 %v1358_v34, %v1349_v2  ;;  %v8797_v33 = vpop.permute.xlu1 %6044 }
 0x26e   : > { %v6032_v25 = vunpack.i.h.bf16 %v8776_v16  ;;  %v6031_v1 = vunpack.i.l.bf16 %v8776_v16  ;;  %1788 = vmatprep.mubr.f32.mxu1 %v8325_v47  ;;  %v1386_v42 = vsel %vm1344_vm9, %v6036_v51, %v6037_v38  ;;  %v6047_v27 = vunpack.i.h.bf16 %v8797_v33 }
 0x26f   : > { %5428 = vmatprep.subr.bf16.mxu0 %v5427_v37  ;;  %v6046_v8 = vunpack.i.l.bf16 %v8797_v33 }
 0x270   : > { %v1376_v3 = vsel %vm1344_vm9, %v5997_v15, %v6031_v1  ;;  %5430 = vmatpush1.bf16.msra.mxu0 %v5429_v50  ;;  %v1377_v21 = vsel %vm1344_vm9, %v6031_v1, %v6032_v25  ;;  %v1385_v15 = vsel %vm1344_vm9, %v6002_v63, %v6036_v51 }
 0x271   : > { %v8799_v0 = vpop.permute.xlu0 %6039  ;;  %v5431_v29 = vpack.c.bf16 %v1377_v21, %v1368_v9  ;;  %v5433_v23 = vpack.c.bf16 %v1376_v3, %v1367_v31  ;;  %v1403_v5 = vsel %vm1344_vm9, %v6012_v54, %v6046_v8  ;;  %v8824_v43 = vpop.permute.xlu1 %1334  ;;  %v1404_v10 = vsel %vm1344_vm9, %v6046_v8, %v6047_v27 }
 0x272   : > { %v6042_v22 = vunpack.i.h.bf16 %v8799_v0  ;;  %v6041_v46 = vunpack.i.l.bf16 %v8799_v0  ;;  %v5911_v54 = vunpack.i.l.bf16 %v8529_v18 }
 0x273   : > { %5432 = vmatprep.subr.bf16.mxu0 %v5431_v29 }
 0x274   : > { %v1394_v30 = vsel %vm1344_vm9, %v6007_v40, %v6041_v46  ;;  %5434 = vmatpush1.bf16.msra.mxu0 %v5433_v23  ;;  %v1395_v32 = vsel %vm1344_vm9, %v6041_v46, %v6042_v22  ;;  %v1351_v14 = vsel %vm1344_vm9, %v5907_v52, %v5911_v54  ;;  %v1352_v35 = vsel %vm1344_vm9, %v5911_v54, %v5912_v61 }
 0x275   : > { %v8817_v13 = vpop.permute.xlu0 %6049  ;;  %v5435_v63 = vpack.c.bf16 %v1395_v32, %v1386_v42  ;;  %v5437_v36 = vpack.c.bf16 %v1394_v30, %v1385_v15 }
 0x276   : > { %v6052_v49 = vunpack.i.h.bf16 %v8817_v13  ;;  %v6051_v20 = vunpack.i.l.bf16 %v8817_v13  ;;  %v1421_v13 = vsel %vm1344_vm9, %v8744_v55, %v8824_v43 }
 0x277   : > { %5436 = vmatprep.subr.bf16.mxu0 %v5435_v63 }
 0x278   : > { %v1412_v40 = vsel %vm1344_vm9, %v6017_v19, %v6051_v20  ;;  %5438 = vmatpush1.bf16.msra.mxu0 %v5437_v36  ;;  %v1413_v26 = vsel %vm1344_vm9, %v6051_v20, %v6052_v49 }
 0x279   : > { %v5439_v28 = vpack.c.bf16 %v1413_v26, %v1404_v10  ;;  %v5441_v24 = vpack.c.bf16 %v1412_v40, %v1403_v5  ;;  %v7257_v26 = vmov 0.0|0.0  }
 0x27b   : > { %5440 = vmatprep.subr.bf16.mxu0 %v5439_v28 }
 0x27c   : > { %v8837_v48 = vpop.permute.xlu1 %6059  ;;  %v6055_v44 = vpop.permute.xlu0 %6054  ;;  %5442 = vmatpush1.bf16.msra.mxu0 %v5441_v24 }
 0x27d   : > { %v6057_v19 = vunpack.i.h.bf16 %v6055_v44  ;;  %v6056_v53 = vunpack.i.l.bf16 %v6055_v44  ;;  %v6062_v17 = vunpack.i.h.bf16 %v8837_v48  ;;  %v6061_v39 = vunpack.i.l.bf16 %v8837_v48 }
 0x27f   : > { %v1360_v18 = vsel %vm1344_vm9, %v6022_v60, %v6056_v53  ;;  %v1361_v41 = vsel %vm1344_vm9, %v6056_v53, %v6057_v19  ;;  %v1369_v45 = vsel %vm1344_vm9, %v6027_v11, %v6061_v39  ;;  %v1370_v4 = vsel %vm1344_vm9, %v6061_v39, %v6062_v17 }
 0x280   : > { %v8849_v62 = vpop.permute.xlu1 %6069  ;;  %v8851_v2 = vpop.permute.xlu0 %6064  ;;  %v5443_v7 = vpack.c.bf16 %v1361_v41, %v1352_v35  ;;  %v5445_v57 = vpack.c.bf16 %v1360_v18, %v1351_v14  ;;  %v8916_v14 = vld [vmem:[#allocation2] sm:$0xff] }
 0x281   : > { %v6067_v52 = vunpack.i.h.bf16 %v8851_v2  ;;  %v6066_v58 = vunpack.i.l.bf16 %v8851_v2  ;;  %v6072_v12 = vunpack.i.h.bf16 %v8849_v62  ;;  %v6071_v34 = vunpack.i.l.bf16 %v8849_v62 }
 0x282   : > { %5444 = vmatprep.subr.bf16.mxu1 %v5443_v7 }
 0x283   : > { %v1378_v60 = vsel %vm1344_vm9, %v6032_v25, %v6066_v58  ;;  %5446 = vmatpush1.bf16.msra.mxu1 %v5445_v57  ;;  %v1379_v37 = vsel %vm1344_vm9, %v6066_v58, %v6067_v52  ;;  %v1387_v25 = vsel %vm1344_vm9, %v6037_v38, %v6071_v34  ;;  %v1388_v31 = vsel %vm1344_vm9, %v6071_v34, %v6072_v12 }
 0x284   : > { %v8869_v50 = vpop.permute.xlu1 %6079  ;;  %v8871_v1 = vpop.permute.xlu0 %6074  ;;  %v5447_v56 = vpack.c.bf16 %v1379_v37, %v1370_v4  ;;  %v5449_v51 = vpack.c.bf16 %v1378_v60, %v1369_v45  ;;  %v1867_v34 = vlaneseq  ;;  %v910_v4 = vld [vmem:[%s11202_s2] sm:$0xff] }
 0x285   : > { %v6077_v11 = vunpack.i.h.bf16 %v8871_v1  ;;  %v6076_v16 = vunpack.i.l.bf16 %v8871_v1  ;;  %v6082_v3 = vunpack.i.h.bf16 %v8869_v50  ;;  %v6081_v9 = vunpack.i.l.bf16 %v8869_v50 }
 0x286   : > { %5448 = vmatprep.subr.bf16.mxu1 %v5447_v56  ;;  %v1868_v45 = vshrl.u32 %v1867_v34, 7 }
 0x287   : > { %v1396_v21 = vsel %vm1344_vm9, %v6042_v22, %v6076_v16  ;;  %5450 = vmatpush1.bf16.msra.mxu1 %v5449_v51  ;;  %v1397_v6 = vsel %vm1344_vm9, %v6076_v16, %v6077_v11  ;;  %v1405_v0 = vsel %vm1344_vm9, %v6047_v27, %v6081_v9  ;;  %v1406_v32 = vsel %vm1344_vm9, %v6081_v9, %v6082_v3 }
 0x288   : > { %v6090_v29 = vpop.permute.xlu1 %6089  ;;  %v6085_v38 = vpop.permute.xlu0 %6084  ;;  %v5451_v23 = vpack.c.bf16 %v1397_v6, %v1388_v31  ;;  %v5453_v46 = vpack.c.bf16 %v1396_v21, %v1387_v25  ;;  %v1869_v60 = vsub.s32 0, %v1868_v45  ;;  %v1873_v37 = vsub.s32 1, %v1868_v45 }
 0x289   : > { %v6092_v15 = vunpack.i.h.bf16 %v6090_v29  ;;  %v6091_v42 = vunpack.i.l.bf16 %v6090_v29  ;;  %v6087_v8 = vunpack.i.h.bf16 %v6085_v38  ;;  %v6086_v30 = vunpack.i.l.bf16 %v6085_v38 }
 0x28a   : > { %5452 = vmatprep.subr.bf16.mxu1 %v5451_v23  ;;  %v8947_v1 = vrot.slane %v910_v4, %v1869_v60  ;;  %v8949_v51 = vrot.slane %v910_v4, %v1873_v37  ;;  %v1877_v9 = vsub.s32 2, %v1868_v45  ;;  %v1881_v21 = vsub.s32 3, %v1868_v45 }
 0x28b   : > { %v1414_v22 = vsel %vm1344_vm9, %v6052_v49, %v6086_v30  ;;  %5454 = vmatpush1.bf16.msra.mxu1 %v5453_v46  ;;  %v1415_v63 = vsel %vm1344_vm9, %v6086_v30, %v6087_v8  ;;  %v1353_v36 = vsel %vm1344_vm9, %v5912_v61, %v6091_v42  ;;  %v1362_v20 = vsel %vm1344_vm9, %v6057_v19, %v6092_v15 }
 0x28c   : > { %v1341_v5 = vpop.permute.xlu1 %1340  ;;  %v1337_v40 = vpop.permute.xlu0 %1336  ;;  %v5455_v33 = vpack.c.bf16 %v1415_v63, %v1406_v32  ;;  %v5457_v10 = vpack.c.bf16 %v1414_v22, %v1405_v0  ;;  %v5460_v49 = vpack.c.bf16 %v1362_v20, %v1353_v36  ;;  %v8965_v6 = vrot.slane %v910_v4, %v1877_v9 }
 0x28d   : > { %v1422_v27 = vsel %vm1344_vm9, %v8824_v43, %v1337_v40  ;;  %v8967_v38 = vrot.slane %v910_v4, %v1881_v21  ;;  %v1885_v22 = vsub.s32 4, %v1868_v45  ;;  %v1889_v32 = vsub.s32 5, %v1868_v45 }
 0x28e   : > { %1669 = vmatprep.subr.mxu0 %v1422_v27  ;;  %5456 = vmatprep.subr.bf16.mxu1 %v5455_v33  ;;  %v1893_v36 = vsub.s32 6, %v1868_v45 }
 0x28f   : > { %1670 = vmatpush1.msra.mxu0 %v1421_v13  ;;  %5458 = vmatpush1.bf16.msra.mxu1 %v5457_v10  ;;  %v8982_v63 = vrot.slane %v910_v4, %v1885_v22 }
 0x290   : > { %4919 = vmatmul.mubr.msk.f32.vlgmr.msra.gmra.mrb[6].mxu0 %vm1507_vm10, %v8657_v59  ;;  %5459 = vmatprep.subr.bf16.mxu0 %v7257_v26  ;;  %v1339_v28 = vpop.permute.xlu0 %1338  ;;  %v6100_v55 = vpop.permute.xlu1 %6099 }
 0x291   : > { %5461 = vmatpush3.bf16.msra.mxu0 %v5460_v49  ;;  %v1424_v24 = vsel %vm1344_vm9, %v1339_v28, %v1341_v5  ;;  %v1423_v61 = vsel %vm1344_vm9, %v1337_v40, %v1339_v28  ;;  %5041 = vmatprep.mubr.msk.f32.mxu0 %vm7258_vm11, %v8325_v47  ;;  %v6102_v54 = vunpack.i.h.bf16 %v6100_v55  ;;  %v6101_v44 = vunpack.i.l.bf16 %v6100_v55 }
 0x292   : > { %1740 = vmatprep.subr.mxu1 %v1424_v24  ;;  %5462 = vmatprep.subr.bf16.mxu0 %v7257_v26  ;;  %v1897_v40 = vsub.s32 7, %v1868_v45  ;;  %v8989_v49 = vrot.slane %v910_v4, %v1893_v36 }
 0x293   : > { %1741 = vmatpush1.msra.mxu1 %v1423_v61  ;;  %v1389_v41 = vsel %vm1344_vm9, %v6072_v12, %v6101_v44  ;;  %v1398_v7 = vsel %vm1344_vm9, %v6077_v11, %v6102_v54 }
 0x294   : > { %v6095_v43 = vpop.permute.xlu0 %6094  ;;  %4920 = vmatmul.mubr.msk.f32.vlgmr.msra.gmra.mrb[8].mxu1 %vm1507_vm10, %v8657_v59  ;;  %v5466_v48 = vpack.c.bf16 %v1398_v7, %v1389_v41  ;;  %v8992_v61 = vrot.slane %v910_v4, %v1897_v40 }
 0x295   : > { %v6097_v19 = vunpack.i.h.bf16 %v6095_v43  ;;  %v6096_v53 = vunpack.i.l.bf16 %v6095_v43  ;;  %2585 = vmatprep.mubr.f32.mxu1 %v8916_v14 }
 0x297   : > { %v1371_v47 = vsel %vm1344_vm9, %v6062_v17, %v6096_v53  ;;  %v1380_v35 = vsel %vm1344_vm9, %v6067_v52, %v6097_v19  ;;  %v1343_v52 = vpop.permute.xlu1 %1342 }
 0x298   : > { %v6105_v39 = vpop.permute.xlu0 %6104  ;;  %v5463_v18 = vpack.c.bf16 %v1380_v35, %v1371_v47  ;;  %v1425_v12 = vsel %vm1344_vm9, %v1341_v5, %v1343_v52  ;;  %v8984_v5 = vrot.slane %v910_v4, %v1889_v32 }
 0x299   : > { %v6107_v57 = vunpack.i.h.bf16 %v6105_v39  ;;  %v6106_v58 = vunpack.i.l.bf16 %v6105_v39 }
 0x29a   : > { %5464 = vmatpush3.bf16.msra.mxu0 %v5463_v18  ;;  %v4922_v18 = vld [vmem:[%s11202_s2 + $0x8] ss:$0 sm:$0xff] }
 0x29b   : > { %5465 = vmatprep.subr.bf16.mxu0 %v7257_v26  ;;  %v1407_v17 = vsel %vm1344_vm9, %v6082_v3, %v6106_v58  ;;  %v1416_v2 = vsel %vm1344_vm9, %v6087_v8, %v6107_v57 }
 0x29c   : > { %v5469_v62 = vpack.c.bf16 %v1416_v2, %v1407_v17 }
 0x29e   : > { %5467 = vmatpush3.bf16.msra.mxu0 %v5466_v48 }
 0x29f   : > { %5468 = vmatprep.subr.bf16.mxu0 %v7257_v26 }
 0x2a2   : > { %5470 = vmatpush3.bf16.msra.mxu0 %v5469_v62 }
 0x2a3   : > { %5039 = vmatprep.subr.mxu0 %v8916_v14 }
 0x2a6   : > { %5040 = vmatpush3.msra.mxu0 %v1425_v12 }
 0x2a7   : > { %5042 = vmatmul.mubr.msk.f32.vlgmr.msra.gmra.mrb[8].mxu0 %vm1507_vm10, %v8657_v59 }
 0x2a8   : > { %2656 = vmatprep.mubr.f32.mxu0 %v8916_v14 }
 0x2a9   : > { %v8945_v50 = vpop.permute.xlu0 %1161 }
 0x31b   : > { %v1577_v56 = vpop.f32.mrb[4].mxu1 }
 0x31c   : > { %v1578_v11 = vadd.f32 %v1577_v56, %v8945_v50  ;;  %v1579_v59 = vpop.f32.mrb[5].mxu1 }
 0x31d   : > { %v1580_v16 = vadd.f32 %v1579_v59, %v8945_v50 }
 0x31e   : > { %v1912_v25 = vmul.f32 %v8947_v1, %v1578_v11 }
 0x31f   : > { %v1913_v31 = vmul.f32 %v8949_v51, %v1580_v16 }
 0x320   : > { %2141 = vrot.lane.b32.xlu0 %v1912_v25, %s7250_s26 }
 0x321   : > { %v6114_v3 = vpack.i.bf16 %v1913_v31, %v1912_v25 }
 0x323   : > { %6110 = vrot.lane.b32.xlu1 %v6114_v3, %s7248_s23 }
 0x324   : > { %6115 = vrot.lane.b32.xlu0 %v6114_v3, %s7247_s17 }
 0x327   : > { %2143 = vrot.lane.b32.xlu1 %v1913_v31, %s7250_s26 }
 0x328   : > { %6120 = vrot.lane.b32.xlu0 %v6114_v3, %s7249_s13 }
 0x32c   : > { %6125 = vrot.lane.b32.xlu0 %v6114_v3, %s7251_s30 }
 0x330   : > { %6130 = vrot.lane.b32.xlu0 %v6114_v3, %s7252_s6 }
 0x334   : > { %6135 = vrot.lane.b32.xlu0 %v6114_v3, %s7253_s7 }
 0x338   : > { %6140 = vrot.lane.b32.xlu0 %v6114_v3, %s7254_s8 }
 0x33c   : > { %6145 = vrot.lane.b32.xlu0 %v6114_v3, %s7255_s15 }
 0x340   : > { %v1648_v29 = vpop.f32.mrb[6].mxu1 }
 0x341   : > { %v1649_v23 = vadd.f32 %v1648_v29, %v8945_v50  ;;  %v1650_v46 = vpop.f32.mrb[7].mxu1 }
 0x342   : > { %v1651_v15 = vadd.f32 %v1650_v46, %v8945_v50 }
 0x343   : > { %v1914_v42 = vmul.f32 %v8965_v6, %v1649_v23 }
 0x344   : > { %v1915_v8 = vmul.f32 %v8967_v38, %v1651_v15 }
 0x345   : > { %2145 = vrot.lane.b32.xlu0 %v1914_v42, %s7250_s26  ;;  %v6149_v30 = vpack.i.bf16 %v8916_v14, %v1914_v42 }
 0x346   : > { %v6164_v0 = vpack.i.bf16 %v1915_v8, %v1914_v42 }
 0x347   : > { %6150 = vrot.lane.b32.xlu1 %v6149_v30, %s7248_s23 }
 0x34b   : > { %6155 = vrot.lane.b32.xlu1 %v6149_v30, %s7247_s17 }
 0x34f   : > { %6160 = vrot.lane.b32.xlu1 %v6149_v30, %s7249_s13 }
 0x353   : > { %6165 = vrot.lane.b32.xlu1 %v6164_v0, %s7251_s30 }
 0x357   : > { %6170 = vrot.lane.b32.xlu1 %v6164_v0, %s7252_s6 }
 0x35b   : > { %6175 = vrot.lane.b32.xlu1 %v6164_v0, %s7253_s7 }
 0x35f   : > { %6180 = vrot.lane.b32.xlu1 %v6164_v0, %s7254_s8 }
 0x363   : > { %v1719_v20 = vpop.f32.mrb[6].mxu0 }
 0x364   : > { %v1720_v33 = vadd.f32 %v1719_v20, %v8945_v50  ;;  %v1721_v10 = vpop.f32.mrb[7].mxu0 }
 0x365   : > { %v1722_v27 = vadd.f32 %v1721_v10, %v8945_v50 }
 0x366   : > { %v1916_v13 = vmul.f32 %v8982_v63, %v1720_v33 }
 0x367   : > { %v1917_v28 = vmul.f32 %v8984_v5, %v1722_v27  ;;  %v1790_v24 = vpop.f32.mrb[8].mxu1 }
 0x368   : > { %v1791_v55 = vadd.f32 %v1790_v24, %v8945_v50  ;;  %v1792_v43 = vpop.f32.mrb[9].mxu1  ;;  %v6189_v54 = vpack.i.bf16 %v1916_v13, %v1915_v8 }
 0x369   : > { %v1793_v44 = vadd.f32 %v1792_v43, %v8945_v50  ;;  %v6204_v19 = vpack.i.bf16 %v1917_v28, %v1916_v13 }
 0x36a   : > { %v1918_v53 = vmul.f32 %v8989_v49, %v1791_v55  ;;  %6190 = vrot.lane.b32.xlu1 %v6189_v54, %s7247_s17  ;;  %6185 = vrot.lane.b32.xlu0 %v6189_v54, %s7248_s23 }
 0x36b   : > { %v1919_v47 = vmul.f32 %v8992_v61, %v1793_v44 }
 0x36c   : > { %v6229_v35 = vpack.i.bf16 %v1918_v53, %v1917_v28 }
 0x36d   : > { %v6249_v39 = vpack.i.bf16 %v1919_v47, %v1918_v53 }
 0x36e   : > { %2149 = vrot.lane.b32.xlu1 %v1916_v13, %s7250_s26  ;;  %6195 = vrot.lane.b32.xlu0 %v6189_v54, %s7249_s13 }
 0x372   : > { %6205 = vrot.lane.b32.xlu1 %v6204_v19, %s7251_s30  ;;  %2147 = vrot.lane.b32.xlu0 %v1915_v8, %s7250_s26 }
 0x376   : > { %6215 = vrot.lane.b32.xlu1 %v6204_v19, %s7253_s7  ;;  %6200 = vrot.lane.b32.xlu0 %v6164_v0, %s7255_s15 }
 0x37a   : > { %v1861_v41 = vpop.f32.mrb[8].mxu0  ;;  %6210 = vrot.lane.b32.xlu0 %v6204_v19, %s7252_s6 }
 0x37b   : > { %v1862_v7 = vadd.f32 %v1861_v41, %v8945_v50  ;;  %v5043_v57 = vpop.f32.mrb[9].mxu0 }
 0x37d   : > { %v1920_v58 = vmul.f32 %v4922_v18, %v1862_v7 }
 0x37e   : > { %6220 = vrot.lane.b32.xlu0 %v6204_v19, %s7254_s8 }
 0x37f   : > { %1929 = vst.msk [vmem:[#allocation3 + $0x48] sm:$0xff] %vm233_vm0, %v1920_v58 }
 0x382   : > { %2151 = vrot.lane.b32.xlu0 %v1917_v28, %s7250_s26 }
 0x386   : > { %v9014_v48 = vld [vmem:[#allocation3 + $0x48] sm:$0xff]  ;;  %6225 = vrot.lane.b32.xlu0 %v6204_v19, %s7255_s15 }
 0x387   : > { %2079 = vrot.lane.b32.xlu1 %v9014_v48, %s7252_s6  ;;  %v6269_v52 = vpack.i.bf16 %v9014_v48, %v1919_v47 }
 0x38a   : > { %2053 = vrot.lane.b32.xlu0 %v9014_v48, %s7251_s30 }
 0x38b   : > { %2131 = vrot.lane.b32.xlu1 %v9014_v48, %s7254_s8 }
 0x38e   : > { %2105 = vrot.lane.b32.xlu0 %v9014_v48, %s7253_s7 }
 0x38f   : > { %2157 = vrot.lane.b32.xlu1 %v9014_v48, %s7250_s26 }
 0x392   : > { %6240 = vrot.lane.b32.xlu0 %v6229_v35, %s7249_s13  ;;  %v2142_v17 = vpop.permute.xlu0 %2141 }
 0x393   : > { %6230 = vrot.lane.b32.xlu1 %v6229_v35, %s7248_s23 }
 0x395   : > { %v6111_v59 = vpop.permute.xlu1 %6110 }
 0x396   : > { %6250 = vrot.lane.b32.xlu0 %v6249_v39, %s7252_s6  ;;  %v9031_v2 = vpop.permute.xlu0 %6115  ;;  %v6112_v31 = vunpack.i.l.bf16 %v6111_v59  ;;  %v6113_v30 = vunpack.i.h.bf16 %v6111_v59 }
 0x397   : > { %6235 = vrot.lane.b32.xlu1 %v6229_v35, %s7247_s17  ;;  %v6117_v42 = vunpack.i.l.bf16 %v9031_v2  ;;  %v6118_v28 = vunpack.i.h.bf16 %v9031_v2 }
 0x398   : > { %v1971_v54 = vsel %vm952_vm1, %v6112_v31, %v6113_v30 }
 0x399   : > { %v9060_v25 = vpop.permute.xlu1 %2143  ;;  %v2000_v7 = vsel %vm982_vm3, %v6117_v42, %v6118_v28 }
 0x39a   : > { %6260 = vrot.lane.b32.xlu0 %v6249_v39, %s7254_s8  ;;  %v6121_v62 = vpop.permute.xlu0 %6120  ;;  %v2159_v20 = vsel %vm1148_vm7, %v2142_v17, %v9060_v25 }
 0x39b   : > { %2153 = vrot.lane.b32.xlu1 %v1918_v53, %s7250_s26  ;;  %v6123_v46 = vunpack.i.h.bf16 %v6121_v62  ;;  %v6122_v15 = vunpack.i.l.bf16 %v6121_v62 }
 0x39d   : > { %v2029_v40 = vsel %vm1012_vm2, %v6122_v15, %v6123_v46 }
 0x39e   : > { %6270 = vrot.lane.b32.xlu0 %v6269_v52, %s7247_s17  ;;  %v6126_v12 = vpop.permute.xlu0 %6125 }
 0x39f   : > { %6245 = vrot.lane.b32.xlu1 %v6249_v39, %s7251_s30  ;;  %v6127_v34 = vunpack.i.l.bf16 %v6126_v12  ;;  %v6128_v33 = vunpack.i.h.bf16 %v6126_v12 }
 0x3a2   : > { %2155 = vrot.lane.b32.xlu0 %v1919_v47, %s7250_s26  ;;  %v9040_v45 = vpop.permute.xlu0 %6130  ;;  %v2055_v47 = vsel %vm1040_vm4, %v6127_v34, %v6128_v33 }
 0x3a3   : > { %6255 = vrot.lane.b32.xlu1 %v6249_v39, %s7253_s7  ;;  %v6132_v60 = vunpack.i.l.bf16 %v9040_v45 }
 0x3a5   : > { %v6284_v4 = vpack.i.bf16 %v6132_v60, %v6127_v34 }
 0x3a6   : > { %v9046_v37 = vpop.permute.xlu0 %6135 }
 0x3a7   : > { %6265 = vrot.lane.b32.xlu1 %v6269_v52, %s7248_s23  ;;  %6285 = vrot.lane.b32.xlu0 %v6284_v4, %s7255_s15  ;;  %v6137_v50 = vunpack.i.l.bf16 %v9046_v37  ;;  %v6138_v4 = vunpack.i.h.bf16 %v9046_v37 }
 0x3aa   : > { %v9051_v56 = vpop.permute.xlu0 %6140 }
 0x3ab   : > { %6275 = vrot.lane.b32.xlu1 %v6269_v52, %s7249_s13  ;;  %v6142_v11 = vunpack.i.l.bf16 %v9051_v56  ;;  %2336 = vrot.lane.b32.xlu0 %v2142_v17, %s7255_s15  ;;  %v6133_v17 = vunpack.i.h.bf16 %v9040_v45  ;;  %v6143_v59 = vunpack.i.h.bf16 %v9051_v56  ;;  %v2107_v45 = vsel %vm1094_vm8, %v6137_v50, %v6138_v4 }
 0x3ad   : > { %v6289_v16 = vpack.i.bf16 %v6142_v11, %v6137_v50  ;;  %v2081_v34 = vsel %vm1067_vm6, %v6132_v60, %v6133_v17  ;;  %v2133_v60 = vsel %vm1121_vm5, %v6142_v11, %v6143_v59 }
 0x3af   : > { %6280 = vrot.lane.b32.xlu1 %v6249_v39, %s7255_s15 }
 0x3b3   : > { %6290 = vrot.lane.b32.xlu1 %v6289_v16, %s7255_s15  ;;  %v9117_v16 = vpop.permute.xlu0 %6145 }
 0x3b9   : > { %v9063_v3 = vpop.permute.xlu1 %6150 }
 0x3ba   : > { %v6153_v9 = vunpack.i.h.bf16 %v9063_v3  ;;  %v6152_v22 = vunpack.i.l.bf16 %v9063_v3 }
 0x3bc   : > { %v1970_v21 = vsel %vm952_vm1, %v6153_v9, %v6112_v31  ;;  %v1972_v44 = vsel %vm952_vm1, %v6113_v30, %v6152_v22 }
 0x3bd   : > { %v9067_v29 = vpop.permute.xlu1 %6155  ;;  %v6294_v23 = vpack.i.bf16 %v1970_v21, %v8916_v14  ;;  %v6304_v41 = vpack.i.bf16 %v1972_v44, %v1971_v54 }
 0x3be   : > { %v6158_v8 = vunpack.i.h.bf16 %v9067_v29  ;;  %v6157_v19 = vunpack.i.l.bf16 %v9067_v29 }
 0x3bf   : > { %6295 = vrot.lane.b32.xlu0 %v6294_v23, %s7255_s15 }
 0x3c0   : > { %v1999_v10 = vsel %vm982_vm3, %v6158_v8, %v6117_v42  ;;  %v2001_v57 = vsel %vm982_vm3, %v6118_v28, %v6157_v19 }
 0x3c1   : > { %v9073_v0 = vpop.permute.xlu1 %6160  ;;  %v6309_v62 = vpack.i.bf16 %v2001_v57, %v2000_v7 }
 0x3c2   : > { %v6163_v32 = vunpack.i.h.bf16 %v9073_v0  ;;  %v6162_v36 = vunpack.i.l.bf16 %v9073_v0 }
 0x3c3   : > { %2338 = vrot.lane.b32.xlu0 %v2159_v20, %s7255_s15 }
 0x3c4   : > { %v2028_v27 = vsel %vm1012_vm2, %v6163_v32, %v6122_v15  ;;  %v2030_v13 = vsel %vm1012_vm2, %v6123_v46, %v6162_v36  ;;  %v2146_v15 = vpop.permute.xlu0 %2145 }
 0x3c5   : > { %v9088_v24 = vpop.permute.xlu1 %6165  ;;  %v6314_v55 = vpack.i.bf16 %v2030_v13, %v2029_v40  ;;  %v6299_v43 = vpack.i.bf16 %v2028_v27, %v1999_v10  ;;  %v2160_v37 = vsel %vm1148_vm7, %v9060_v25, %v2146_v15 }
 0x3c6   : > { %v6167_v53 = vunpack.i.l.bf16 %v9088_v24 }
 0x3c7   : > { %6315 = vrot.lane.b32.xlu0 %v6314_v55, %s7255_s15  ;;  %6300 = vrot.lane.b32.xlu1 %v6299_v43, %s7255_s15 }
 0x3c8   : > { %v2056_v35 = vsel %vm1040_vm4, %v6128_v33, %v6167_v53 }
 0x3c9   : > { %v9100_v39 = vpop.permute.xlu1 %6170  ;;  %v6319_v18 = vpack.i.bf16 %v2056_v35, %v2055_v47 }
 0x3ca   : > { %v6172_v58 = vunpack.i.l.bf16 %v9100_v39 }
 0x3cb   : > { %6320 = vrot.lane.b32.xlu0 %v6319_v18, %s7255_s15  ;;  %6305 = vrot.lane.b32.xlu1 %v6304_v41, %s7255_s15 }
 0x3cc   : > { %v2082_v52 = vsel %vm1067_vm6, %v6133_v17, %v6172_v58 }
 0x3cd   : > { %v6176_v2 = vpop.permute.xlu1 %6175  ;;  %v6324_v3 = vpack.i.bf16 %v2082_v52, %v2081_v34 }
 0x3ce   : > { %v6177_v12 = vunpack.i.l.bf16 %v6176_v2  ;;  %v6178_v0 = vunpack.i.h.bf16 %v6176_v2 }
 0x3cf   : > { %6310 = vrot.lane.b32.xlu1 %v6309_v62, %s7255_s15  ;;  %v6173_v62 = vunpack.i.h.bf16 %v9100_v39 }
 0x3d0   : > { %v2108_v9 = vsel %vm1094_vm8, %v6138_v4, %v6177_v12 }
 0x3d1   : > { %v9119_v31 = vpop.permute.xlu1 %6180  ;;  %v6329_v46 = vpack.i.bf16 %v2108_v9, %v2107_v45  ;;  %v2083_v4 = vsel %vm1067_vm6, %v6172_v58, %v6173_v62 }
 0x3d2   : > { %v6182_v21 = vunpack.i.l.bf16 %v9119_v31 }
 0x3d3   : > { %6325 = vrot.lane.b32.xlu1 %v6324_v3, %s7255_s15 }
 0x3d4   : > { %v2134_v29 = vsel %vm1121_vm5, %v6143_v59, %v6182_v21  ;;  %v6183_v59 = vunpack.i.h.bf16 %v9119_v31 }
 0x3d5   : > { %v6334_v23 = vpack.i.bf16 %v2134_v29, %v2133_v60 }
 0x3d6   : > { %v2135_v39 = vsel %vm1121_vm5, %v6182_v21, %v6183_v59 }
 0x3d7   : > { %6335 = vrot.lane.b32.xlu0 %v6334_v23, %s7255_s15  ;;  %6330 = vrot.lane.b32.xlu1 %v6329_v46, %s7255_s15 }
 0x3db   : > { %2340 = vrot.lane.b32.xlu1 %v2160_v37, %s7255_s15 }
 0x3dc   : > { %v9138_v50 = vpop.permute.xlu1 %6190  ;;  %v9140_v56 = vpop.permute.xlu0 %6185 }
 0x3dd   : > { %v6193_v11 = vunpack.i.h.bf16 %v9138_v50  ;;  %v6192_v42 = vunpack.i.l.bf16 %v9138_v50  ;;  %v6188_v8 = vunpack.i.h.bf16 %v9140_v56  ;;  %v6187_v30 = vunpack.i.l.bf16 %v9140_v56 }
 0x3df   : > { %v1973_v32 = vsel %vm952_vm1, %v6152_v22, %v6187_v30  ;;  %v1974_v25 = vsel %vm952_vm1, %v6187_v30, %v6188_v8  ;;  %v2002_v10 = vsel %vm982_vm3, %v6157_v19, %v6192_v42  ;;  %v2003_v27 = vsel %vm982_vm3, %v6192_v42, %v6193_v11 }
 0x3e0   : > { %v2150_v20 = vpop.permute.xlu1 %2149  ;;  %v9150_v40 = vpop.permute.xlu0 %6195  ;;  %v6339_v33 = vpack.i.bf16 %v1974_v25, %v1973_v32  ;;  %v6168_v22 = vunpack.i.h.bf16 %v9088_v24  ;;  %v6344_v47 = vpack.i.bf16 %v2003_v27, %v2002_v10  ;;  %v2109_v24 = vsel %vm1094_vm8, %v6177_v12, %v6178_v0 }
 0x3e1   : > { %v6198_v13 = vunpack.i.h.bf16 %v9150_v40  ;;  %v6197_v28 = vunpack.i.l.bf16 %v9150_v40 }
 0x3e2   : > { %6340 = vrot.lane.b32.xlu1 %v6339_v33, %s7255_s15  ;;  %v2057_v18 = vsel %vm1040_vm4, %v6167_v53, %v6168_v22 }
 0x3e3   : > { %v2031_v55 = vsel %vm1012_vm2, %v6162_v36, %v6197_v28  ;;  %v2032_v43 = vsel %vm1012_vm2, %v6197_v28, %v6198_v13 }
 0x3e4   : > { %v9164_v54 = vpop.permute.xlu1 %6205  ;;  %v2148_v44 = vpop.permute.xlu0 %2147  ;;  %v6349_v19 = vpack.i.bf16 %v2032_v43, %v2031_v55 }
 0x3e5   : > { %v6207_v35 = vunpack.i.l.bf16 %v9164_v54  ;;  %v2161_v60 = vsel %vm1148_vm7, %v2146_v15, %v2148_v44  ;;  %v2162_v31 = vsel %vm1148_vm7, %v2148_v44, %v2150_v20 }
 0x3e6   : > { %6350 = vrot.lane.b32.xlu0 %v6349_v19, %s7255_s15  ;;  %6345 = vrot.lane.b32.xlu1 %v6344_v47, %s7255_s15 }
 0x3e7   : > { %v2058_v36 = vsel %vm1040_vm4, %v6168_v22, %v6207_v35 }
 0x3e8   : > { %v9175_v41 = vpop.permute.xlu1 %6215  ;;  %v9177_v7 = vpop.permute.xlu0 %6200  ;;  %v6354_v57 = vpack.i.bf16 %v2058_v36, %v2057_v18 }
 0x3e9   : > { %v6217_v17 = vunpack.i.l.bf16 %v9175_v41 }
 0x3ea   : > { %6355 = vrot.lane.b32.xlu1 %v6354_v57, %s7255_s15 }
 0x3eb   : > { %v2110_v53 = vsel %vm1094_vm8, %v6178_v0, %v6217_v17 }
 0x3ec   : > { %v6211_v2 = vpop.permute.xlu0 %6210  ;;  %v6364_v52 = vpack.i.bf16 %v2110_v53, %v2109_v24 }
 0x3ed   : > { %v6212_v34 = vunpack.i.l.bf16 %v6211_v2 }
 0x3ee   : > { %6365 = vrot.lane.b32.xlu1 %v6364_v52, %s7255_s15 }
 0x3ef   : > { %v2084_v3 = vsel %vm1067_vm6, %v6173_v62, %v6212_v34 }
 0x3f0   : > { %v9192_v9 = vpop.permute.xlu0 %6220  ;;  %v6359_v12 = vpack.i.bf16 %v2084_v3, %v2083_v4 }
 0x3f1   : > { %v6222_v45 = vunpack.i.l.bf16 %v9192_v9 }
 0x3f2   : > { %6360 = vrot.lane.b32.xlu0 %v6359_v12, %s7255_s15  ;;  %2342 = vrot.lane.b32.xlu1 %v2161_v60, %s7255_s15 }
 0x3f3   : > { %v2136_v58 = vsel %vm1121_vm5, %v6183_v59, %v6222_v45 }
 0x3f4   : > { %v9204_v29 = vpop.permute.xlu0 %2151  ;;  %v6369_v23 = vpack.i.bf16 %v2136_v58, %v2135_v39 }
 0x3f5   : > { %v2163_v46 = vsel %vm1148_vm7, %v2150_v20, %v9204_v29  ;;  %v6213_v20 = vunpack.i.h.bf16 %v6211_v2 }
 0x3f6   : > { %6370 = vrot.lane.b32.xlu0 %v6369_v23, %s7255_s15  ;;  %2346 = vrot.lane.b32.xlu1 %v2163_v46, %s7255_s15 }
 0x3f7   : > { %v2085_v56 = vsel %vm1067_vm6, %v6212_v34, %v6213_v20  ;;  %v6208_v34 = vunpack.i.h.bf16 %v9164_v54 }
 0x3f8   : > { %v9210_v15 = vpop.permute.xlu0 %6225 }
 0x3f9   : > { %v9212_v37 = vpop.permute.xlu1 %2079  ;;  %v2059_v50 = vsel %vm1040_vm4, %v6207_v35, %v6208_v34 }
 0x3fa   : > { %2344 = vrot.lane.b32.xlu0 %v2162_v31, %s7255_s15 }
 0x3fc   : > { %v9216_v21 = vpop.permute.xlu0 %2053 }
 0x3fd   : > { %v9218_v42 = vpop.permute.xlu1 %2131 }
 0x400   : > { %v9220_v30 = vpop.permute.xlu0 %2105 }
 0x401   : > { %v9222_v32 = vpop.permute.xlu1 %2157 }
 0x404   : > { %v6241_v25 = vpop.permute.xlu0 %6240 }
 0x405   : > { %v9224_v40 = vpop.permute.xlu1 %6230  ;;  %v6243_v33 = vunpack.i.h.bf16 %v6241_v25  ;;  %v6242_v10 = vunpack.i.l.bf16 %v6241_v25 }
 0x406   : > { %v6233_v27 = vunpack.i.h.bf16 %v9224_v40  ;;  %v6232_v28 = vunpack.i.l.bf16 %v9224_v40 }
 0x407   : > { %v2033_v22 = vsel %vm1012_vm2, %v6198_v13, %v6242_v10  ;;  %v2034_v55 = vsel %vm1012_vm2, %v6242_v10, %v6243_v33 }
 0x408   : > { %v1975_v43 = vsel %vm952_vm1, %v6188_v8, %v6232_v28  ;;  %v1976_v44 = vsel %vm952_vm1, %v6232_v28, %v6233_v27  ;;  %v9236_v19 = vpop.permute.xlu0 %6250  ;;  %v6384_v47 = vpack.i.bf16 %v2034_v55, %v2033_v22 }
 0x409   : > { %v9238_v18 = vpop.permute.xlu1 %6235  ;;  %v6374_v0 = vpack.i.bf16 %v1976_v44, %v1975_v43  ;;  %v6252_v36 = vunpack.i.l.bf16 %v9236_v19  ;;  %v6414_v44 = vpack.i.bf16 %v9212_v37, %v9216_v21 }
 0x40a   : > { %v6238_v13 = vunpack.i.h.bf16 %v9238_v18  ;;  %v6237_v57 = vunpack.i.l.bf16 %v9238_v18  ;;  %6385 = vrot.lane.b32.xlu0 %v6384_v47, %s7255_s15 }
 0x40b   : > { %6375 = vrot.lane.b32.xlu1 %v6374_v0, %s7255_s15  ;;  %v2086_v8 = vsel %vm1067_vm6, %v6213_v20, %v6252_v36 }
 0x40c   : > { %v2004_v62 = vsel %vm982_vm3, %v6193_v11, %v6237_v57  ;;  %v2005_v24 = vsel %vm982_vm3, %v6237_v57, %v6238_v13  ;;  %v6394_v53 = vpack.i.bf16 %v2086_v8, %v2085_v56  ;;  %v6218_v11 = vunpack.i.h.bf16 %v9175_v41  ;;  %v6261_v12 = vpop.permute.xlu0 %6260 }
 0x40d   : > { %v9255_v2 = vpop.permute.xlu1 %2153  ;;  %v6379_v52 = vpack.i.bf16 %v2005_v24, %v2004_v62  ;;  %v6262_v28 = vunpack.i.l.bf16 %v6261_v12  ;;  %v6223_v41 = vunpack.i.h.bf16 %v9192_v9 }
 0x40e   : > { %6395 = vrot.lane.b32.xlu0 %v6394_v53, %s7255_s15  ;;  %v2111_v23 = vsel %vm1094_vm8, %v6217_v17, %v6218_v11  ;;  %v2164_v9 = vsel %vm1148_vm7, %v9204_v29, %v9255_v2 }
 0x40f   : > { %6380 = vrot.lane.b32.xlu1 %v6379_v52, %s7255_s15  ;;  %v2138_v47 = vsel %vm1121_vm5, %v6223_v41, %v6262_v28  ;;  %v2137_v8 = vsel %vm1121_vm5, %v6222_v45, %v6223_v41 }
 0x410   : > { %v6271_v25 = vpop.permute.xlu0 %6270  ;;  %v6419_v62 = vpack.i.bf16 %v2138_v47, %v2137_v8 }
 0x411   : > { %v6246_v4 = vpop.permute.xlu1 %6245  ;;  %v6273_v22 = vunpack.i.h.bf16 %v6271_v25  ;;  %v6272_v45 = vunpack.i.l.bf16 %v6271_v25 }
 0x412   : > { %v6247_v59 = vunpack.i.l.bf16 %v6246_v4  ;;  %v6248_v57 = vunpack.i.h.bf16 %v6246_v4  ;;  %v6263_v4 = vunpack.i.h.bf16 %v6261_v12 }
 0x413   : > { %v2006_v40 = vsel %vm982_vm3, %v6238_v13, %v6272_v45 }
 0x414   : > { %v2060_v3 = vsel %vm1040_vm4, %v6208_v34, %v6247_v59  ;;  %v9282_v0 = vpop.permute.xlu0 %2155  ;;  %v2062_v34 = vsel %vm1040_vm4, %v6248_v57, %v9216_v21  ;;  %v2140_v21 = vsel %vm1121_vm5, %v6263_v4, %v9218_v42 }
 0x415   : > { %v9265_v60 = vpop.permute.xlu1 %6255  ;;  %v6389_v39 = vpack.i.bf16 %v2060_v3, %v2059_v50  ;;  %v2165_v25 = vsel %vm1148_vm7, %v9255_v2, %v9282_v0 }
 0x416   : > { %v6257_v58 = vunpack.i.l.bf16 %v9265_v60 }
 0x417   : > { %6390 = vrot.lane.b32.xlu1 %v6389_v39, %s7255_s15  ;;  %v6253_v39 = vunpack.i.h.bf16 %v9236_v19 }
 0x418   : > { %v2112_v54 = vsel %vm1094_vm8, %v6218_v11, %v6257_v58 }
 0x419   : > { %v6266_v35 = vpop.permute.xlu1 %6265  ;;  %v6399_v46 = vpack.i.bf16 %v2112_v54, %v2111_v23  ;;  %v9291_v52 = vpop.permute.xlu0 %6285 }
 0x41a   : > { %v6268_v31 = vunpack.i.h.bf16 %v6266_v35  ;;  %v6267_v24 = vunpack.i.l.bf16 %v6266_v35  ;;  %v2088_v35 = vsel %vm1067_vm6, %v6253_v39, %v9212_v37 }
 0x41b   : > { %6400 = vrot.lane.b32.xlu1 %v6399_v46, %s7255_s15  ;;  %v2087_v46 = vsel %vm1067_vm6, %v6252_v36, %v6253_v39 }
 0x41c   : > { %v6404_v10 = vpack.i.bf16 %v6268_v31, %v9014_v48  ;;  %v1977_v50 = vsel %vm952_vm1, %v6233_v27, %v6267_v24  ;;  %v1978_v11 = vsel %vm952_vm1, %v6267_v24, %v6268_v31  ;;  %v2007_v27 = vsel %vm982_vm3, %v6272_v45, %v6273_v22 }
 0x41d   : > { %v6276_v20 = vpop.permute.xlu1 %6275  ;;  %v9310_v12 = vpop.permute.xlu0 %2336  ;;  %v6424_v29 = vpack.i.bf16 %v1978_v11, %v1977_v50  ;;  %v6429_v54 = vpack.i.bf16 %v2007_v27, %v2006_v40  ;;  %v6258_v31 = vunpack.i.h.bf16 %v9265_v60  ;;  %v6147_v60 = vunpack.i.l.bf16 %v9117_v16 }
 0x41e   : > { %v6278_v55 = vunpack.i.h.bf16 %v6276_v20  ;;  %v6277_v43 = vunpack.i.l.bf16 %v6276_v20  ;;  %v2166_v24 = vsel %vm1148_vm7, %v9282_v0, %v9222_v32 }
 0x41f   : > { %6405 = vrot.lane.b32.xlu1 %v6404_v10, %s7255_s15  ;;  %v6444_v10 = vpack.i.bf16 %v2088_v35, %v2087_v46  ;;  %v2114_v37 = vsel %vm1094_vm8, %v6258_v31, %v9220_v30  ;;  %v2113_v19 = vsel %vm1094_vm8, %v6257_v58, %v6258_v31  ;;  %v6454_v58 = vpack.i.bf16 %v9218_v42, %v9220_v30 }
 0x420   : > { %v6409_v17 = vpack.i.bf16 %v6278_v55, %v6273_v22  ;;  %v2035_v48 = vsel %vm1012_vm2, %v6243_v33, %v6277_v43  ;;  %v2036_v56 = vsel %vm1012_vm2, %v6277_v43, %v6278_v55  ;;  %v2061_v33 = vsel %vm1040_vm4, %v6247_v59, %v6248_v57 }
 0x421   : > { %v6434_v53 = vpack.i.bf16 %v2036_v56, %v2035_v48  ;;  %v6439_v3 = vpack.i.bf16 %v2062_v34, %v2061_v33  ;;  %v2139_v59 = vsel %vm1121_vm5, %v6262_v28, %v6263_v4  ;;  %v9325_v18 = vpop.permute.xlu1 %6280  ;;  %v6449_v2 = vpack.i.bf16 %v2114_v37, %v2113_v19 }
 0x422   : > { %6410 = vrot.lane.b32.xlu0 %v6409_v17, %s7255_s15  ;;  %v6459_v23 = vpack.i.bf16 %v2140_v21, %v2139_v59  ;;  %v6148_v55 = vunpack.i.h.bf16 %v9117_v16 }
 0x423   : > { %6415 = vrot.lane.b32.xlu1 %v6414_v44, %s7255_s15 }
 0x424   : > { %v2357_v42 = vsel %vm1344_vm9, %v6147_v60, %v6148_v55 }
 0x425   : > { %v9337_v36 = vpop.permute.xlu1 %6290 }
 0x426   : > { %6420 = vrot.lane.b32.xlu0 %v6419_v62, %s7255_s15  ;;  %v6292_v37 = vunpack.i.l.bf16 %v9337_v36 }
 0x427   : > { %6435 = vrot.lane.b32.xlu1 %v6434_v53, %s7255_s15 }
 0x42a   : > { %2348 = vrot.lane.b32.xlu0 %v2164_v9, %s7255_s15 }
 0x42b   : > { %6440 = vrot.lane.b32.xlu1 %v6439_v3, %s7255_s15  ;;  %v4924_v3 = vld [vmem:[%s11204_s4 + $0x8] sm:$0xff] }
 0x42e   : > { %6425 = vrot.lane.b32.xlu0 %v6424_v29, %s7255_s15 }
 0x42f   : > { %6460 = vrot.lane.b32.xlu1 %v6459_v23, %s7255_s15  ;;  %v6288_v23 = vunpack.i.h.bf16 %v9291_v52 }
 0x431   : > { %v6296_v13 = vpop.permute.xlu0 %6295 }
 0x432   : > { %6430 = vrot.lane.b32.xlu0 %v6429_v54, %s7255_s15  ;;  %v6297_v43 = vunpack.i.l.bf16 %v6296_v13  ;;  %v6298_v17 = vunpack.i.h.bf16 %v6296_v13  ;;  %v6287_v54 = vunpack.i.l.bf16 %v9291_v52  ;;  %v6293_v52 = vunpack.i.h.bf16 %v9337_v36 }
 0x433   : > { %2350 = vrot.lane.b32.xlu1 %v2165_v25, %s7255_s15 }
 0x434   : > { %v2356_v8 = vsel %vm1344_vm9, %v6297_v43, %v6147_v60 }
 0x435   : > { %v9339_v28 = vpop.permute.xlu0 %2338 }
 0x436   : > { %6445 = vrot.lane.b32.xlu0 %v6444_v10, %s7255_s15 }
 0x437   : > { %2354 = vrot.lane.b32.xlu1 %v9222_v32, %s7255_s15 }
 0x439   : > { %v6301_v20 = vpop.permute.xlu1 %6300  ;;  %v9345_v22 = vpop.permute.xlu0 %6315 }
 0x43a   : > { %6450 = vrot.lane.b32.xlu0 %v6449_v2, %s7255_s15  ;;  %v6318_v57 = vunpack.i.h.bf16 %v9345_v22  ;;  %v6317_v48 = vunpack.i.l.bf16 %v9345_v22  ;;  %v6303_v56 = vunpack.i.h.bf16 %v6301_v20  ;;  %v6302_v9 = vunpack.i.l.bf16 %v6301_v20 }
 0x43c   : > { %v2383_v11 = vsel %vm1344_vm9, %v6303_v56, %v6317_v48  ;;  %v2384_v32 = vsel %vm1344_vm9, %v6317_v48, %v6318_v57 }
 0x43d   : > { %v9351_v41 = vpop.permute.xlu1 %6305  ;;  %v9369_v53 = vpop.permute.xlu0 %6320 }
 0x43e   : > { %6455 = vrot.lane.b32.xlu0 %v6454_v58, %s7255_s15  ;;  %v6308_v44 = vunpack.i.h.bf16 %v9351_v41  ;;  %v6307_v47 = vunpack.i.l.bf16 %v9351_v41  ;;  %v6323_v0 = vunpack.i.h.bf16 %v9369_v53  ;;  %v6322_v21 = vunpack.i.l.bf16 %v9369_v53 }
 0x440   : > { %v2365_v62 = vsel %vm1344_vm9, %v6298_v17, %v6307_v47  ;;  %v2366_v30 = vsel %vm1344_vm9, %v6307_v47, %v6308_v44  ;;  %v2392_v31 = vsel %vm1344_vm9, %v6287_v54, %v6322_v21  ;;  %v2393_v25 = vsel %vm1344_vm9, %v6322_v21, %v6323_v0 }
 0x441   : > { %v9371_v34 = vpop.permute.xlu1 %6310  ;;  %v5471_v33 = vpack.c.bf16 %v2366_v30, %v2357_v42  ;;  %v5473_v4 = vpack.c.bf16 %v2365_v62, %v2356_v8 }
 0x442   : > { %2352 = vrot.lane.b32.xlu0 %v2166_v24, %s7255_s15  ;;  %v6313_v45 = vunpack.i.h.bf16 %v9371_v34  ;;  %v6312_v50 = vunpack.i.l.bf16 %v9371_v34 }
 0x443   : > { %5472 = vmatprep.subr.bf16.mxu1 %v5471_v33  ;;  %v9429_v33 = vld [vmem:[%s11203_s3 + $0x8] sm:$0xff] }
 0x444   : > { %v2374_v59 = vsel %vm1344_vm9, %v6302_v9, %v6312_v50  ;;  %5474 = vmatpush1.bf16.msra.mxu1 %v5473_v4  ;;  %v2375_v29 = vsel %vm1344_vm9, %v6312_v50, %v6313_v45  ;;  %v6203_v4 = vunpack.i.h.bf16 %v9177_v7  ;;  %v6202_v9 = vunpack.i.l.bf16 %v9177_v7 }
 0x445   : > { %v9389_v39 = vpop.permute.xlu1 %6325  ;;  %v5475_v40 = vpack.c.bf16 %v2384_v32, %v2375_v29  ;;  %v5477_v27 = vpack.c.bf16 %v2383_v11, %v2374_v59  ;;  %v2428_v50 = vsel %vm1344_vm9, %v9310_v12, %v9339_v28 }
 0x446   : > { %2173 = vperm.xlu0 %6108, %v4924_v3   ;;  %v6328_v35 = vunpack.i.h.bf16 %v9389_v39  ;;  %v6327_v46 = vunpack.i.l.bf16 %v9389_v39  ;;  %v2358_v21 = vsel %vm1344_vm9, %v6148_v55, %v6202_v9 }
 0x447   : > { %5476 = vmatprep.subr.bf16.mxu1 %v5475_v40 }
 0x448   : > { %v2401_v13 = vsel %vm1344_vm9, %v6288_v23, %v6327_v46  ;;  %5478 = vmatpush1.bf16.msra.mxu1 %v5477_v27  ;;  %v2402_v10 = vsel %vm1344_vm9, %v6327_v46, %v6328_v35 }
 0x449   : > { %v9405_v19 = vpop.permute.xlu0 %6335  ;;  %v9407_v2 = vpop.permute.xlu1 %6330  ;;  %v5479_v20 = vpack.c.bf16 %v2402_v10, %v2393_v25  ;;  %v5481_v60 = vpack.c.bf16 %v2401_v13, %v2392_v31 }
 0x44a   : > { %v6338_v58 = vunpack.i.h.bf16 %v9405_v19  ;;  %v6337_v43 = vunpack.i.l.bf16 %v9405_v19  ;;  %v6333_v17 = vunpack.i.h.bf16 %v9407_v2  ;;  %v6332_v47 = vunpack.i.l.bf16 %v9407_v2 }
 0x44b   : > { %5480 = vmatprep.subr.bf16.mxu1 %v5479_v20 }
 0x44c   : > { %v2419_v48 = vsel %vm1344_vm9, %v6293_v52, %v6337_v43  ;;  %v2410_v56 = vsel %vm1344_vm9, %v6292_v37, %v6332_v47  ;;  %5482 = vmatpush1.bf16.msra.mxu1 %v5481_v60  ;;  %v2411_v36 = vsel %vm1344_vm9, %v6332_v47, %v6333_v17  ;;  %v2420_v8 = vsel %vm1344_vm9, %v6337_v43, %v6338_v58 }
 0x44d   : > { %v9421_v62 = vpop.permute.xlu1 %2340  ;;  %v5483_v42 = vpack.c.bf16 %v2420_v8, %v2411_v36  ;;  %v5485_v30 = vpack.c.bf16 %v2419_v48, %v2410_v56 }
 0x44e   : > { %v2429_v24 = vsel %vm1344_vm9, %v9339_v28, %v9421_v62  ;;  %v2359_v28 = vsel %vm1344_vm9, %v6202_v9, %v6203_v4 }
 0x44f   : > { %5484 = vmatprep.subr.bf16.mxu1 %v5483_v42 }
 0x450   : > { %5486 = vmatpush1.bf16.msra.mxu1 %v5485_v30 }
 0x451   : > { %2537 = vmatprep.subr.mxu1 %v2429_v24 }
 0x454   : > { %v9436_v11 = vpop.permute.xlu1 %6340  ;;  %2538 = vmatpush1.msra.mxu1 %v2428_v50 }
 0x455   : > { %v6343_v3 = vunpack.i.h.bf16 %v9436_v11  ;;  %v6342_v32 = vunpack.i.l.bf16 %v9436_v11  ;;  %4925 = vmatmul.mubr.msk.f32.vlgmr.msra.gmra.mrb[10].mxu1 %vm1507_vm10, %v9429_v33 }
 0x456   : > { %2727 = vmatprep.mubr.f32.mxu1 %v8916_v14 }
 0x457   : > { %v2367_v12 = vsel %vm1344_vm9, %v6308_v44, %v6342_v32  ;;  %v2368_v59 = vsel %vm1344_vm9, %v6342_v32, %v6343_v3 }
 0x458   : > { %v9455_v29 = vpop.permute.xlu0 %6350  ;;  %v9457_v40 = vpop.permute.xlu1 %6345  ;;  %v5487_v14 = vpack.c.bf16 %v2368_v59, %v2359_v28  ;;  %v5489_v16 = vpack.c.bf16 %v2367_v12, %v2358_v21  ;;  %v6228_v12 = vunpack.i.h.bf16 %v9210_v15  ;;  %v6227_v28 = vunpack.i.l.bf16 %v9210_v15 }
 0x459   : > { %v6353_v55 = vunpack.i.h.bf16 %v9455_v29  ;;  %v6352_v41 = vunpack.i.l.bf16 %v9455_v29  ;;  %v6348_v44 = vunpack.i.h.bf16 %v9457_v40  ;;  %v6347_v27 = vunpack.i.l.bf16 %v9457_v40 }
 0x45a   : > { %5488 = vmatprep.subr.bf16.mxu0 %v5487_v14 }
 0x45b   : > { %v2385_v23 = vsel %vm1344_vm9, %v6318_v57, %v6352_v41  ;;  %v2376_v54 = vsel %vm1344_vm9, %v6313_v45, %v6347_v27  ;;  %5490 = vmatpush1.bf16.msra.mxu0 %v5489_v16  ;;  %v2377_v46 = vsel %vm1344_vm9, %v6347_v27, %v6348_v44  ;;  %v2386_v31 = vsel %vm1344_vm9, %v6352_v41, %v6353_v55 }
 0x45c   : > { %v5491_v13 = vpack.c.bf16 %v2386_v31, %v2377_v46  ;;  %v5493_v25 = vpack.c.bf16 %v2385_v23, %v2376_v54  ;;  %v9475_v10 = vpop.permute.xlu1 %6355  ;;  %v2360_v41 = vsel %vm1344_vm9, %v6203_v4, %v6227_v28  ;;  %v2361_v27 = vsel %vm1344_vm9, %v6227_v28, %v6228_v12 }
 0x45d   : > { %v6358_v22 = vunpack.i.h.bf16 %v9475_v10  ;;  %v6357_v57 = vunpack.i.l.bf16 %v9475_v10 }
 0x45e   : > { %5492 = vmatprep.subr.bf16.mxu0 %v5491_v13 }
 0x45f   : > { %5494 = vmatpush1.bf16.msra.mxu0 %v5493_v25  ;;  %v2394_v20 = vsel %vm1344_vm9, %v6323_v0, %v6357_v57  ;;  %v2395_v60 = vsel %vm1344_vm9, %v6357_v57, %v6358_v22 }
 0x460   : > { %v9479_v34 = vpop.permute.xlu1 %6365 }
 0x461   : > { %v6368_v43 = vunpack.i.h.bf16 %v9479_v34  ;;  %v6367_v47 = vunpack.i.l.bf16 %v9479_v34  ;;  %v6283_v34 = vunpack.i.h.bf16 %v9325_v18 }
 0x463   : > { %v2412_v30 = vsel %vm1344_vm9, %v6333_v17, %v6367_v47  ;;  %v9523_v17 = vld [vmem:[#allocation2] sm:$0xff] }
 0x464   : > { %v9481_v45 = vpop.permute.xlu0 %6360  ;;  %v2343_v2 = vpop.permute.xlu1 %2342 }
 0x465   : > { %v6363_v52 = vunpack.i.h.bf16 %v9481_v45  ;;  %v6362_v37 = vunpack.i.l.bf16 %v9481_v45 }
 0x467   : > { %v2403_v48 = vsel %vm1344_vm9, %v6328_v35, %v6362_v37  ;;  %v2404_v56 = vsel %vm1344_vm9, %v6362_v37, %v6363_v52  ;;  %v2413_v35 = vsel %vm1344_vm9, %v6367_v47, %v6368_v43 }
 0x468   : > { %v9499_v36 = vpop.permute.xlu0 %6370  ;;  %v5495_v53 = vpack.c.bf16 %v2404_v56, %v2395_v60  ;;  %v5497_v0 = vpack.c.bf16 %v2403_v48, %v2394_v20  ;;  %v9526_v21 = vpop.permute.xlu1 %2346 }
 0x469   : > { %v6373_v8 = vunpack.i.h.bf16 %v9499_v36  ;;  %v6372_v42 = vunpack.i.l.bf16 %v9499_v36 }
 0x46a   : > { %5496 = vmatprep.subr.bf16.mxu0 %v5495_v53 }
 0x46b   : > { %v2421_v39 = vsel %vm1344_vm9, %v6338_v58, %v6372_v42  ;;  %5498 = vmatpush1.bf16.msra.mxu0 %v5497_v0  ;;  %v2422_v24 = vsel %vm1344_vm9, %v6372_v42, %v6373_v8  ;;  %v2430_v58 = vsel %vm1344_vm9, %v9421_v62, %v2343_v2 }
 0x46c   : > { %v9515_v9 = vpop.permute.xlu0 %2344  ;;  %v5499_v50 = vpack.c.bf16 %v2422_v24, %v2413_v35  ;;  %v5501_v32 = vpack.c.bf16 %v2421_v39, %v2412_v30 }
 0x46d   : > { %v2431_v19 = vsel %vm1344_vm9, %v2343_v2, %v9515_v9 }
 0x46e   : > { %5500 = vmatprep.subr.bf16.mxu0 %v5499_v50 }
 0x46f   : > { %5502 = vmatpush1.bf16.msra.mxu0 %v5501_v32 }
 0x470   : > { %2608 = vmatprep.subr.mxu0 %v2431_v19 }
 0x473   : > { %2609 = vmatpush1.msra.mxu0 %v2430_v58 }
 0x474   : > { %4926 = vmatmul.mubr.msk.f32.vlgmr.msra.gmra.mrb[10].mxu0 %vm1507_vm10, %v9429_v33 }
 0x475   : > { %2798 = vmatprep.mubr.f32.mxu0 %v9523_v17 }
 0x47c   : > { %v9532_v14 = vpop.permute.xlu0 %6385 }
 0x47d   : > { %v9530_v59 = vpop.permute.xlu1 %6375  ;;  %v6388_v46 = vunpack.i.h.bf16 %v9532_v14  ;;  %v6387_v31 = vunpack.i.l.bf16 %v9532_v14 }
 0x47e   : > { %v6378_v62 = vunpack.i.h.bf16 %v9530_v59  ;;  %v6377_v16 = vunpack.i.l.bf16 %v9530_v59 }
 0x47f   : > { %v2388_v20 = vsel %vm1344_vm9, %v6387_v31, %v6388_v46 }
 0x480   : > { %v2369_v23 = vsel %vm1344_vm9, %v6343_v3, %v6377_v16  ;;  %v2370_v54 = vsel %vm1344_vm9, %v6377_v16, %v6378_v62  ;;  %v2387_v3 = vsel %vm1344_vm9, %v6353_v55, %v6387_v31  ;;  %v9566_v60 = vpop.permute.xlu0 %6395 }
 0x481   : > { %v9550_v13 = vpop.permute.xlu1 %6380  ;;  %v5503_v7 = vpack.c.bf16 %v2370_v54, %v2361_v27  ;;  %v5505_v4 = vpack.c.bf16 %v2369_v23, %v2360_v41  ;;  %v6398_v40 = vunpack.i.h.bf16 %v9566_v60  ;;  %v6397_v29 = vunpack.i.l.bf16 %v9566_v60 }
 0x482   : > { %v6383_v25 = vunpack.i.h.bf16 %v9550_v13  ;;  %v6382_v57 = vunpack.i.l.bf16 %v9550_v13 }
 0x483   : > { %5504 = vmatprep.subr.bf16.mxu1 %v5503_v7  ;;  %v2405_v53 = vsel %vm1344_vm9, %v6363_v52, %v6397_v29  ;;  %v2406_v30 = vsel %vm1344_vm9, %v6397_v29, %v6398_v40 }
 0x484   : > { %v2378_v11 = vsel %vm1344_vm9, %v6348_v44, %v6382_v57  ;;  %5506 = vmatpush1.bf16.msra.mxu1 %v5505_v4  ;;  %v2379_v37 = vsel %vm1344_vm9, %v6382_v57, %v6383_v25 }
 0x485   : > { %v5507_v47 = vpack.c.bf16 %v2388_v20, %v2379_v37  ;;  %v5509_v48 = vpack.c.bf16 %v2387_v3, %v2378_v11 }
 0x487   : > { %5508 = vmatprep.subr.bf16.mxu1 %v5507_v47 }
 0x488   : > { %5510 = vmatpush1.bf16.msra.mxu1 %v5509_v48 }
 0x489   : > { %v9570_v55 = vpop.permute.xlu1 %6390 }
 0x48a   : > { %v6393_v44 = vunpack.i.h.bf16 %v9570_v55  ;;  %v6392_v56 = vunpack.i.l.bf16 %v9570_v55 }
 0x48c   : > { %v2396_v0 = vsel %vm1344_vm9, %v6358_v22, %v6392_v56  ;;  %v2397_v42 = vsel %vm1344_vm9, %v6392_v56, %v6393_v44 }
 0x48d   : > { %v9586_v39 = vpop.permute.xlu1 %6400  ;;  %v5511_v35 = vpack.c.bf16 %v2406_v30, %v2397_v42  ;;  %v5513_v24 = vpack.c.bf16 %v2405_v53, %v2396_v0 }
 0x48e   : > { %v6403_v10 = vunpack.i.h.bf16 %v9586_v39  ;;  %v6402_v22 = vunpack.i.l.bf16 %v9586_v39 }
 0x48f   : > { %5512 = vmatprep.subr.bf16.mxu1 %v5511_v35 }
 0x490   : > { %5514 = vmatpush1.bf16.msra.mxu1 %v5513_v24  ;;  %v2414_v58 = vsel %vm1344_vm9, %v6368_v43, %v6402_v22  ;;  %v2415_v41 = vsel %vm1344_vm9, %v6402_v22, %v6403_v10  ;;  %v6282_v43 = vunpack.i.l.bf16 %v9325_v18  ;;  %v2432_v18 = vsel %vm1344_vm9, %v9515_v9, %v9526_v21 }
 0x491   : > { %v6406_v45 = vpop.permute.xlu1 %6405 }
 0x492   : > { %v6407_v36 = vunpack.i.l.bf16 %v6406_v45  ;;  %v6408_v4 = vunpack.i.h.bf16 %v6406_v45  ;;  %v2363_v48 = vsel %vm1344_vm9, %v6282_v43, %v6283_v34  ;;  %v2362_v42 = vsel %vm1344_vm9, %v6228_v12, %v6282_v43 }
 0x494   : > { %v6411_v52 = vpop.permute.xlu0 %6410  ;;  %v2364_v20 = vsel %vm1344_vm9, %v6283_v34, %v6407_v36 }
 0x495   : > { %v9588_v50 = vpop.permute.xlu1 %6415  ;;  %v6413_v29 = vunpack.i.h.bf16 %v6411_v52  ;;  %v6412_v30 = vunpack.i.l.bf16 %v6411_v52 }
 0x498   : > { %v9592_v32 = vpop.permute.xlu0 %6420 }
 0x499   : > { %v6423_v2 = vunpack.i.h.bf16 %v9592_v32  ;;  %v6422_v19 = vunpack.i.l.bf16 %v9592_v32  ;;  %v6436_v16 = vpop.permute.xlu1 %6435 }
 0x49a   : > { %v6438_v57 = vunpack.i.h.bf16 %v6436_v16  ;;  %v6437_v47 = vunpack.i.l.bf16 %v6436_v16 }
 0x49b   : > { %v2423_v28 = vsel %vm1344_vm9, %v6373_v8, %v6422_v19  ;;  %v2424_v27 = vsel %vm1344_vm9, %v6422_v19, %v6423_v2 }
 0x49c   : > { %v9608_v23 = vpop.permute.xlu0 %2348  ;;  %v5515_v54 = vpack.c.bf16 %v2424_v27, %v2415_v41  ;;  %v5517_v31 = vpack.c.bf16 %v2423_v28, %v2414_v58  ;;  %v2391_v59 = vsel %vm1344_vm9, %v6438_v57, %v6413_v29  ;;  %v2389_v15 = vsel %vm1344_vm9, %v6388_v46, %v6437_v47 }
 0x49d   : > { %v2433_v8 = vsel %vm1344_vm9, %v9526_v21, %v9608_v23  ;;  %v6441_v11 = vpop.permute.xlu1 %6440  ;;  %v2390_v22 = vsel %vm1344_vm9, %v6437_v47, %v6438_v57  ;;  %v6417_v46 = vunpack.i.l.bf16 %v9588_v50 }
 0x49e   : > { %5516 = vmatprep.subr.bf16.mxu1 %v5515_v54  ;;  %v6443_v12 = vunpack.i.h.bf16 %v6441_v11  ;;  %v6442_v52 = vunpack.i.l.bf16 %v6441_v11 }
 0x49f   : > { %5518 = vmatpush1.bf16.msra.mxu1 %v5517_v31  ;;  %v6418_v31 = vunpack.i.h.bf16 %v9588_v50 }
 0x4a0   : > { %v6426_v7 = vpop.permute.xlu0 %6425  ;;  %2679 = vmatprep.subr.mxu1 %v2433_v8  ;;  %v2398_v13 = vsel %vm1344_vm9, %v6393_v44, %v6442_v52  ;;  %v2399_v8 = vsel %vm1344_vm9, %v6442_v52, %v6443_v12 }
 0x4a1   : > { %v6428_v3 = vunpack.i.h.bf16 %v6426_v7  ;;  %v6427_v37 = vunpack.i.l.bf16 %v6426_v7  ;;  %v6461_v19 = vpop.permute.xlu1 %6460 }
 0x4a2   : > { %v6462_v36 = vunpack.i.l.bf16 %v6461_v19  ;;  %v6463_v7 = vunpack.i.h.bf16 %v6461_v19 }
 0x4a3   : > { %v2371_v56 = vsel %vm1344_vm9, %v6378_v62, %v6427_v37  ;;  %v2373_v53 = vsel %vm1344_vm9, %v6428_v3, %v6408_v4  ;;  %2680 = vmatpush1.msra.mxu1 %v2432_v18  ;;  %v2372_v0 = vsel %vm1344_vm9, %v6427_v37, %v6428_v3 }
 0x4a4   : > { %v6431_v35 = vpop.permute.xlu0 %6430  ;;  %4927 = vmatmul.mubr.msk.f32.vlgmr.msra.gmra.mrb[12].mxu1 %vm1507_vm10, %v9429_v33  ;;  %5535 = vmatprep.subr.bf16.mxu1 %v7257_v26  ;;  %v5519_v9 = vpack.c.bf16 %v2372_v0, %v2363_v48  ;;  %v5536_v21 = vpack.c.bf16 %v2373_v53, %v2364_v20  ;;  %v5521_v45 = vpack.c.bf16 %v2371_v56, %v2362_v42 }
 0x4a5   : > { %v6433_v62 = vunpack.i.h.bf16 %v6431_v35  ;;  %v6432_v24 = vunpack.i.l.bf16 %v6431_v35  ;;  %5062 = vmatprep.mubr.msk.f32.mxu1 %vm7258_vm11, %v9523_v17  ;;  %v2425_v47 = vsel %vm1344_vm9, %v6423_v2, %v6462_v36  ;;  %v2426_v18 = vsel %vm1344_vm9, %v6462_v36, %v6463_v7  ;;  %v2351_v0 = vpop.permute.xlu1 %2350 }
 0x4a6   : > { %5520 = vmatprep.subr.bf16.mxu0 %v5519_v9  ;;  %5537 = vmatpush3.bf16.msra.mxu1 %v5536_v21  ;;  %v2434_v35 = vsel %vm1344_vm9, %v9608_v23, %v2351_v0 }
 0x4a7   : > { %v2382_v58 = vsel %vm1344_vm9, %v6433_v62, %v6412_v30  ;;  %v2380_v28 = vsel %vm1344_vm9, %v6383_v25, %v6432_v24  ;;  %5522 = vmatpush1.bf16.msra.mxu0 %v5521_v45  ;;  %5538 = vmatprep.subr.bf16.mxu1 %v7257_v26  ;;  %v2381_v14 = vsel %vm1344_vm9, %v6432_v24, %v6433_v62 }
 0x4a8   : > { %v6446_v16 = vpop.permute.xlu0 %6445  ;;  %v5523_v41 = vpack.c.bf16 %v2390_v22, %v2381_v14  ;;  %v5539_v27 = vpack.c.bf16 %v2391_v59, %v2382_v58  ;;  %v5525_v54 = vpack.c.bf16 %v2389_v15, %v2380_v28  ;;  %v2400_v25 = vsel %vm1344_vm9, %v6443_v12, %v6417_v46 }
 0x4a9   : > { %v6448_v34 = vunpack.i.h.bf16 %v6446_v16  ;;  %v6447_v43 = vunpack.i.l.bf16 %v6446_v16  ;;  %v2355_v9 = vpop.permute.xlu1 %2354 }
 0x4aa   : > { %5524 = vmatprep.subr.bf16.mxu0 %v5523_v41  ;;  %5540 = vmatpush3.bf16.msra.mxu1 %v5539_v27 }
 0x4ab   : > { %v2407_v4 = vsel %vm1344_vm9, %v6398_v40, %v6447_v43  ;;  %v2409_v50 = vsel %vm1344_vm9, %v6448_v34, %v6418_v31  ;;  %5526 = vmatpush1.bf16.msra.mxu0 %v5525_v54  ;;  %5541 = vmatprep.subr.bf16.mxu1 %v7257_v26  ;;  %v2408_v55 = vsel %vm1344_vm9, %v6447_v43, %v6448_v34 }
 0x4ac   : > { %v6451_v44 = vpop.permute.xlu0 %6450  ;;  %v5527_v57 = vpack.c.bf16 %v2408_v55, %v2399_v8  ;;  %v5542_v11 = vpack.c.bf16 %v2409_v50, %v2400_v25  ;;  %v5529_v3 = vpack.c.bf16 %v2407_v4, %v2398_v13 }
 0x4ad   : > { %v6453_v37 = vunpack.i.h.bf16 %v6451_v44  ;;  %v6452_v20 = vunpack.i.l.bf16 %v6451_v44 }
 0x4ae   : > { %5528 = vmatprep.subr.bf16.mxu0 %v5527_v57  ;;  %5543 = vmatpush3.bf16.msra.mxu1 %v5542_v11 }
 0x4af   : > { %v2416_v60 = vsel %vm1344_vm9, %v6403_v10, %v6452_v20  ;;  %5530 = vmatpush1.bf16.msra.mxu0 %v5529_v3  ;;  %v2417_v40 = vsel %vm1344_vm9, %v6452_v20, %v6453_v37  ;;  %5544 = vmatprep.subr.bf16.mxu1 %v7257_v26 }
 0x4b0   : > { %v6456_v48 = vpop.permute.xlu0 %6455  ;;  %v5531_v29 = vpack.c.bf16 %v2426_v18, %v2417_v40  ;;  %v5533_v56 = vpack.c.bf16 %v2425_v47, %v2416_v60 }
 0x4b1   : > { %v6458_v53 = vunpack.i.h.bf16 %v6456_v48  ;;  %v6457_v32 = vunpack.i.l.bf16 %v6456_v48 }
 0x4b2   : > { %5532 = vmatprep.subr.bf16.mxu0 %v5531_v29 }
 0x4b3   : > { %v2418_v2 = vsel %vm1344_vm9, %v6453_v37, %v6457_v32  ;;  %v2427_v39 = vsel %vm1344_vm9, %v6463_v7, %v6458_v53  ;;  %5534 = vmatpush1.bf16.msra.mxu0 %v5533_v56  ;;  %v7178_v53 = vld [vmem:[%s11202_s2 + $0x8] ss:$0 sm:$0xff] }
 0x4b4   : > { %v2353_v10 = vpop.permute.xlu0 %2352  ;;  %v5545_v42 = vpack.c.bf16 %v2427_v39, %v2418_v2 }
 0x4b5   : > { %v2435_v30 = vsel %vm1344_vm9, %v2351_v0, %v2353_v10  ;;  %v2436_v21 = vsel %vm1344_vm9, %v2353_v10, %v2355_v9 }
 0x4b6   : > { %2750 = vmatprep.subr.mxu0 %v2435_v30  ;;  %5546 = vmatpush3.bf16.msra.mxu1 %v5545_v42 }
 0x4b7   : > { %2751 = vmatpush1.msra.mxu0 %v2434_v35  ;;  %5060 = vmatprep.subr.mxu1 %v9523_v17 }
 0x4b8   : > { %4928 = vmatmul.mubr.msk.f32.vlgmr.msra.gmra.mrb[12].mxu0 %vm1507_vm10, %v9429_v33 }
 0x4b9   : > { %3557 = vmatprep.mubr.f32.mxu0 %v9523_v17 }
 0x4ba   : > { %5061 = vmatpush3.msra.mxu1 %v2436_v21 }
 0x4bb   : > { %5063 = vmatmul.mubr.msk.f32.vlgmr.msra.gmra.mrb[14].mxu1 %vm1507_vm10, %v9429_v33 }
 0x4bc   : > { %3628 = vmatprep.mubr.f32.mxu1 %v9523_v17 }
 0x4c5   : > { %v9679_v59 = vpop.permute.xlu0 %2173 }
 0x528   : > { %v2587_v23 = vpop.f32.mrb[10].mxu1 }
 0x529   : > { %v2588_v62 = vadd.f32 %v2587_v23, %v9679_v59  ;;  %v2589_v24 = vpop.f32.mrb[11].mxu1 }
 0x52a   : > { %v2590_v45 = vadd.f32 %v2589_v24, %v9679_v59 }
 0x52b   : > { %v2875_v15 = vmax.f32 %v2588_v62, 0.0 }
 0x52c   : > { %v2876_v12 = vmax.f32 %v2590_v45, 0.0 }
 0x52d   : > { %v2884_v52 = vmul.f32 %v2875_v15, %v8947_v1 }
 0x52e   : > { %v2885_v22 = vmul.f32 %v2876_v12, %v8949_v51 }
 0x52f   : > { %3113 = vrot.lane.b32.xlu1 %v2884_v52, %s7250_s26 }
 0x530   : > { %v6464_v19 = vpack.i.bf16 %v2885_v22, %v2884_v52 }
 0x533   : > { %6465 = vrot.lane.b32.xlu1 %v6464_v19, %s7248_s23 }
 0x547   : > { %v2658_v33 = vpop.f32.mrb[10].mxu0 }
 0x548   : > { %v2659_v58 = vadd.f32 %v2658_v33, %v9679_v59  ;;  %v2660_v28 = vpop.f32.mrb[11].mxu0 }
 0x549   : > { %v2661_v14 = vadd.f32 %v2660_v28, %v9679_v59 }
 0x54a   : > { %v2877_v46 = vmax.f32 %v2659_v58, 0.0 }
 0x54b   : > { %v2878_v16 = vmax.f32 %v2661_v14, 0.0 }
 0x54c   : > { %v2886_v41 = vmul.f32 %v2877_v46, %v8965_v6 }
 0x54d   : > { %v9691_v27 = vmul.f32 %v2878_v16, %v8967_v38 }
 0x54e   : > { %v6469_v54 = vpack.i.bf16 %v9523_v17, %v2886_v41  ;;  %v6519_v31 = vpack.i.bf16 %v2886_v41, %v9523_v17 }
 0x54f   : > { %v6524_v34 = vpack.i.bf16 %v9691_v27, %v2886_v41 }
 0x550   : > { %6470 = vrot.lane.b32.xlu0 %v6469_v54, %s7248_s23  ;;  %6480 = vrot.lane.b32.xlu1 %v6469_v54, %s7247_s17 }
 0x554   : > { %6475 = vrot.lane.b32.xlu0 %v6464_v19, %s7247_s17  ;;  %6490 = vrot.lane.b32.xlu1 %v6469_v54, %s7249_s13 }
 0x558   : > { %6485 = vrot.lane.b32.xlu0 %v6464_v19, %s7249_s13  ;;  %3117 = vrot.lane.b32.xlu1 %v2886_v41, %s7250_s26 }
 0x55c   : > { %6495 = vrot.lane.b32.xlu0 %v6464_v19, %s7251_s30  ;;  %6515 = vrot.lane.b32.xlu1 %v6464_v19, %s7255_s15 }
 0x560   : > { %6500 = vrot.lane.b32.xlu0 %v6464_v19, %s7252_s6  ;;  %6520 = vrot.lane.b32.xlu1 %v6519_v31, %s7255_s15 }
 0x564   : > { %6505 = vrot.lane.b32.xlu0 %v6464_v19, %s7253_s7  ;;  %6525 = vrot.lane.b32.xlu1 %v6524_v34, %s7251_s30 }
 0x568   : > { %6510 = vrot.lane.b32.xlu0 %v6464_v19, %s7254_s8  ;;  %6530 = vrot.lane.b32.xlu1 %v6524_v34, %s7252_s6 }
 0x56c   : > { %3115 = vrot.lane.b32.xlu0 %v2885_v22, %s7250_s26  ;;  %6535 = vrot.lane.b32.xlu1 %v6524_v34, %s7253_s7 }
 0x570   : > { %6540 = vrot.lane.b32.xlu1 %v6524_v34, %s7254_s8 }
 0x574   : > { %3119 = vrot.lane.b32.xlu1 %v9691_v27, %s7250_s26 }
 0x577   : > { %v2729_v17 = vpop.f32.mrb[12].mxu1 }
 0x578   : > { %v2730_v43 = vadd.f32 %v2729_v17, %v9679_v59  ;;  %v2731_v13 = vpop.f32.mrb[13].mxu1 }
 0x579   : > { %v2732_v25 = vadd.f32 %v2731_v13, %v9679_v59 }
 0x57a   : > { %v2879_v36 = vmax.f32 %v2730_v43, 0.0 }
 0x57b   : > { %v2880_v8 = vmax.f32 %v2732_v25, 0.0 }
 0x57c   : > { %v2888_v7 = vmul.f32 %v2879_v36, %v8982_v63 }
 0x57d   : > { %v2889_v4 = vmul.f32 %v2880_v8, %v8984_v5 }
 0x57e   : > { %v6549_v50 = vpack.i.bf16 %v2888_v7, %v9691_v27 }
 0x57f   : > { %v6559_v55 = vpack.i.bf16 %v2889_v4, %v2888_v7 }
 0x580   : > { %6550 = vrot.lane.b32.xlu0 %v6549_v50, %s7247_s17  ;;  %6545 = vrot.lane.b32.xlu1 %v6549_v50, %s7248_s23 }
 0x584   : > { %3121 = vrot.lane.b32.xlu0 %v2888_v7, %s7250_s26  ;;  %6555 = vrot.lane.b32.xlu1 %v6549_v50, %s7249_s13 }
 0x588   : > { %6560 = vrot.lane.b32.xlu0 %v6559_v55, %s7251_s30  ;;  %6565 = vrot.lane.b32.xlu1 %v6559_v55, %s7252_s6 }
 0x58b   : > { %v2800_v44 = vpop.f32.mrb[12].mxu0 }
 0x58c   : > { %v2801_v57 = vadd.f32 %v2800_v44, %v9679_v59  ;;  %v2802_v11 = vpop.f32.mrb[13].mxu0  ;;  %6570 = vrot.lane.b32.xlu0 %v6559_v55, %s7253_s7  ;;  %6575 = vrot.lane.b32.xlu1 %v6559_v55, %s7254_s8 }
 0x58d   : > { %v2803_v3 = vadd.f32 %v2802_v11, %v9679_v59 }
 0x58e   : > { %v2881_v37 = vmax.f32 %v2801_v57, 0.0  ;;  %v2871_v20 = vpop.f32.mrb[14].mxu1 }
 0x58f   : > { %v2882_v47 = vmax.f32 %v2803_v3, 0.0  ;;  %v2872_v60 = vadd.f32 %v2871_v20, %v9679_v59  ;;  %v5064_v40 = vpop.f32.mrb[15].mxu1 }
 0x590   : > { %v2890_v18 = vmul.f32 %v2881_v37, %v8989_v49 }
 0x591   : > { %v2891_v48 = vmul.f32 %v2882_v47, %v8992_v61  ;;  %v2883_v29 = vmax.f32 %v2872_v60, 0.0 }
 0x592   : > { %v6579_v56 = vpack.i.bf16 %v2890_v18, %v2889_v4 }
 0x593   : > { %v2892_v32 = vmul.f32 %v7178_v53, %v2883_v29  ;;  %v6604_v0 = vpack.i.bf16 %v2891_v48, %v2890_v18 }
 0x594   : > { %6580 = vrot.lane.b32.xlu0 %v6579_v56, %s7248_s23  ;;  %6585 = vrot.lane.b32.xlu1 %v6579_v56, %s7247_s17 }
 0x595   : > { %2901 = vst.msk [vmem:[#allocation4 + $0x48] sm:$0xff] %vm233_vm0, %v2892_v32 }
 0x598   : > { %6590 = vrot.lane.b32.xlu0 %v6579_v56, %s7249_s13  ;;  %3123 = vrot.lane.b32.xlu1 %v2889_v4, %s7250_s26 }
 0x59c   : > { %3125 = vrot.lane.b32.xlu0 %v2890_v18, %s7250_s26  ;;  %6595 = vrot.lane.b32.xlu1 %v6559_v55, %s7255_s15  ;;  %v9745_v2 = vld [vmem:[#allocation4 + $0x48] sm:$0xff] }
 0x59d   : > { %v6624_v39 = vpack.i.bf16 %v9745_v2, %v2891_v48 }
 0x5a0   : > { %6605 = vrot.lane.b32.xlu0 %v6604_v0, %s7252_s6  ;;  %6600 = vrot.lane.b32.xlu1 %v6604_v0, %s7251_s30 }
 0x5a1   : > { %v9761_v10 = vpop.permute.xlu1 %3113 }
 0x5a4   : > { %6615 = vrot.lane.b32.xlu0 %v6604_v0, %s7254_s8  ;;  %6610 = vrot.lane.b32.xlu1 %v6604_v0, %s7253_s7 }
 0x5a5   : > { %v6466_v42 = vpop.permute.xlu1 %6465 }
 0x5a6   : > { %v6467_v9 = vunpack.i.l.bf16 %v6466_v42  ;;  %v6468_v23 = vunpack.i.h.bf16 %v6466_v42 }
 0x5a8   : > { %6625 = vrot.lane.b32.xlu0 %v6624_v39, %s7248_s23  ;;  %3127 = vrot.lane.b32.xlu1 %v2891_v48, %s7250_s26  ;;  %v2943_v19 = vsel %vm952_vm1, %v6467_v9, %v6468_v23 }
 0x5ac   : > { %6635 = vrot.lane.b32.xlu0 %v6624_v39, %s7249_s13  ;;  %6620 = vrot.lane.b32.xlu1 %v6604_v0, %s7255_s15 }
 0x5b0   : > { %3051 = vrot.lane.b32.xlu0 %v9745_v2, %s7252_s6  ;;  %6630 = vrot.lane.b32.xlu1 %v6624_v39, %s7247_s17 }
 0x5b4   : > { %3103 = vrot.lane.b32.xlu0 %v9745_v2, %s7254_s8  ;;  %3025 = vrot.lane.b32.xlu1 %v9745_v2, %s7251_s30 }
 0x5b8   : > { %3129 = vrot.lane.b32.xlu0 %v9745_v2, %s7250_s26  ;;  %3077 = vrot.lane.b32.xlu1 %v9745_v2, %s7253_s7 }
 0x5bc   : > { %3308 = vrot.lane.b32.xlu1 %v9761_v10, %s7255_s15 }
 0x5c2   : > { %v9769_v30 = vpop.permute.xlu0 %6470  ;;  %v9771_v35 = vpop.permute.xlu1 %6480 }
 0x5c3   : > { %v6473_v21 = vunpack.i.h.bf16 %v9769_v30  ;;  %v6472_v59 = vunpack.i.l.bf16 %v9769_v30  ;;  %v6482_v33 = vunpack.i.l.bf16 %v9771_v35 }
 0x5c5   : > { %v2942_v62 = vsel %vm952_vm1, %v6473_v21, %v6467_v9  ;;  %v2944_v12 = vsel %vm952_vm1, %v6468_v23, %v6472_v59 }
 0x5c6   : > { %v9776_v24 = vpop.permute.xlu0 %6475  ;;  %v9778_v45 = vpop.permute.xlu1 %6490  ;;  %v6639_v15 = vpack.i.bf16 %v2942_v62, %v9691_v27  ;;  %v6644_v46 = vpack.i.bf16 %v2944_v12, %v2943_v19 }
 0x5c7   : > { %v6478_v52 = vunpack.i.h.bf16 %v9776_v24  ;;  %v6477_v22 = vunpack.i.l.bf16 %v9776_v24  ;;  %v6492_v58 = vunpack.i.l.bf16 %v9778_v45 }
 0x5c8   : > { %6640 = vrot.lane.b32.xlu0 %v6639_v15, %s7255_s15 }
 0x5c9   : > { %v2972_v16 = vsel %vm982_vm3, %v6477_v22, %v6478_v52  ;;  %v2973_v41 = vsel %vm982_vm3, %v6478_v52, %v6482_v33 }
 0x5ca   : > { %v9790_v28 = vpop.permute.xlu0 %6485  ;;  %v9792_v14 = vpop.permute.xlu1 %3117  ;;  %v6649_v13 = vpack.i.bf16 %v2973_v41, %v2972_v16 }
 0x5cb   : > { %v6488_v27 = vunpack.i.h.bf16 %v9790_v28  ;;  %v6487_v54 = vunpack.i.l.bf16 %v9790_v28 }
 0x5cc   : > { %6645 = vrot.lane.b32.xlu0 %v6644_v46, %s7255_s15 }
 0x5cd   : > { %v3001_v31 = vsel %vm1012_vm2, %v6487_v54, %v6488_v27  ;;  %v3002_v34 = vsel %vm1012_vm2, %v6488_v27, %v6492_v58 }
 0x5ce   : > { %v6496_v17 = vpop.permute.xlu0 %6495  ;;  %v9809_v43 = vpop.permute.xlu1 %6515  ;;  %v6654_v25 = vpack.i.bf16 %v3002_v34, %v3001_v31 }
 0x5cf   : > { %v6498_v7 = vunpack.i.h.bf16 %v6496_v17  ;;  %v6497_v4 = vunpack.i.l.bf16 %v6496_v17 }
 0x5d0   : > { %6650 = vrot.lane.b32.xlu0 %v6649_v13, %s7255_s15  ;;  %6655 = vrot.lane.b32.xlu1 %v6654_v25, %s7255_s15  ;;  %v6483_v13 = vunpack.i.h.bf16 %v9771_v35 }
 0x5d1   : > { %v3027_v57 = vsel %vm1040_vm4, %v6497_v4, %v6498_v7 }
 0x5d2   : > { %v9813_v36 = vpop.permute.xlu0 %6500  ;;  %v9815_v8 = vpop.permute.xlu1 %6520 }
 0x5d3   : > { %v6503_v11 = vunpack.i.h.bf16 %v9813_v36  ;;  %v6502_v3 = vunpack.i.l.bf16 %v9813_v36 }
 0x5d5   : > { %v3053_v40 = vsel %vm1067_vm6, %v6502_v3, %v6503_v11 }
 0x5d6   : > { %v9817_v50 = vpop.permute.xlu1 %6525  ;;  %v9820_v44 = vpop.permute.xlu0 %6505 }
 0x5d7   : > { %v6527_v55 = vunpack.i.l.bf16 %v9817_v50  ;;  %v6508_v18 = vunpack.i.h.bf16 %v9820_v44  ;;  %v6507_v48 = vunpack.i.l.bf16 %v9820_v44  ;;  %v6528_v16 = vunpack.i.h.bf16 %v9817_v50 }
 0x5d9   : > { %v3028_v37 = vsel %vm1040_vm4, %v6498_v7, %v6527_v55  ;;  %v3079_v39 = vsel %vm1094_vm8, %v6507_v48, %v6508_v18  ;;  %v3029_v27 = vsel %vm1040_vm4, %v6527_v55, %v6528_v16 }
 0x5da   : > { %v9826_v20 = vpop.permute.xlu1 %6530  ;;  %v6659_v47 = vpack.i.bf16 %v3028_v37, %v3027_v57  ;;  %v9838_v56 = vpop.permute.xlu0 %6510  ;;  %v6684_v17 = vpack.i.bf16 %v3029_v27, %v6497_v4  ;;  %v2971_v4 = vsel %vm982_vm3, %v6483_v13, %v6477_v22 }
 0x5db   : > { %v6532_v60 = vunpack.i.l.bf16 %v9826_v20  ;;  %v6513_v42 = vunpack.i.h.bf16 %v9838_v56  ;;  %v6512_v9 = vunpack.i.l.bf16 %v9838_v56 }
 0x5dc   : > { %6660 = vrot.lane.b32.xlu1 %v6659_v47, %s7255_s15 }
 0x5dd   : > { %v3054_v29 = vsel %vm1067_vm6, %v6503_v11, %v6532_v60  ;;  %v3105_v52 = vsel %vm1121_vm5, %v6512_v9, %v6513_v42 }
 0x5de   : > { %v9840_v53 = vpop.permute.xlu1 %6535  ;;  %v6664_v32 = vpack.i.bf16 %v3054_v29, %v3053_v40  ;;  %v3116_v12 = vpop.permute.xlu0 %3115 }
 0x5df   : > { %v6537_v0 = vunpack.i.l.bf16 %v9840_v53  ;;  %v3132_v41 = vsel %vm1148_vm7, %v3116_v12, %v9792_v14  ;;  %v3131_v31 = vsel %vm1148_vm7, %v9761_v10, %v3116_v12  ;;  %v6538_v25 = vunpack.i.h.bf16 %v9840_v53 }
 0x5e0   : > { %6665 = vrot.lane.b32.xlu0 %v6664_v32, %s7255_s15  ;;  %v6493_v32 = vunpack.i.h.bf16 %v9778_v45 }
 0x5e1   : > { %v3080_v21 = vsel %vm1094_vm8, %v6508_v18, %v6537_v0  ;;  %v3081_v24 = vsel %vm1094_vm8, %v6537_v0, %v6538_v25 }
 0x5e2   : > { %v9848_v23 = vpop.permute.xlu1 %6540  ;;  %v6669_v62 = vpack.i.bf16 %v3080_v21, %v3079_v39  ;;  %v3000_v30 = vsel %vm1012_vm2, %v6493_v32, %v6487_v54  ;;  %v6689_v39 = vpack.i.bf16 %v3081_v24, %v6507_v48 }
 0x5e3   : > { %v6542_v15 = vunpack.i.l.bf16 %v9848_v23 }
 0x5e4   : > { %6670 = vrot.lane.b32.xlu0 %v6669_v62, %s7255_s15 }
 0x5e5   : > { %v3106_v19 = vsel %vm1121_vm5, %v6513_v42, %v6542_v15 }
 0x5e6   : > { %v6674_v46 = vpack.i.bf16 %v3106_v19, %v3105_v52  ;;  %v3120_v34 = vpop.permute.xlu1 %3119 }
 0x5e7   : > { %v3133_v48 = vsel %vm1148_vm7, %v9792_v14, %v3120_v34 }
 0x5e8   : > { %3312 = vrot.lane.b32.xlu0 %v3132_v41, %s7255_s15  ;;  %6675 = vrot.lane.b32.xlu1 %v6674_v46, %s7255_s15 }
 0x5ec   : > { %3310 = vrot.lane.b32.xlu1 %v3131_v31, %s7255_s15 }
 0x5f0   : > { %6685 = vrot.lane.b32.xlu1 %v6684_v17, %s7255_s15  ;;  %v6543_v17 = vunpack.i.h.bf16 %v9848_v23 }
 0x5f2   : > { %v9870_v7 = vpop.permute.xlu0 %6550  ;;  %v9872_v50 = vpop.permute.xlu1 %6545 }
 0x5f3   : > { %v6553_v44 = vunpack.i.h.bf16 %v9870_v7  ;;  %v6552_v55 = vunpack.i.l.bf16 %v9870_v7  ;;  %v6548_v10 = vunpack.i.h.bf16 %v9872_v50  ;;  %v6547_v57 = vunpack.i.l.bf16 %v9872_v50 }
 0x5f5   : > { %v2974_v11 = vsel %vm982_vm3, %v6482_v33, %v6552_v55  ;;  %v2945_v37 = vsel %vm952_vm1, %v6472_v59, %v6547_v57  ;;  %v2946_v47 = vsel %vm952_vm1, %v6547_v57, %v6548_v10  ;;  %v2975_v35 = vsel %vm982_vm3, %v6552_v55, %v6553_v44 }
 0x5f6   : > { %v9888_v40 = vpop.permute.xlu0 %3121  ;;  %v6556_v18 = vpop.permute.xlu1 %6555  ;;  %v6679_v29 = vpack.i.bf16 %v2974_v11, %v2971_v4  ;;  %v6694_v53 = vpack.i.bf16 %v2946_v47, %v2945_v37  ;;  %v6533_v59 = vunpack.i.h.bf16 %v9826_v20  ;;  %v6699_v0 = vpack.i.bf16 %v3000_v30, %v2975_v35 }
 0x5f7   : > { %v6558_v42 = vunpack.i.h.bf16 %v6556_v18  ;;  %v6557_v21 = vunpack.i.l.bf16 %v6556_v18  ;;  %v3134_v55 = vsel %vm1148_vm7, %v3120_v34, %v9888_v40  ;;  %v3107_v57 = vsel %vm1121_vm5, %v6542_v15, %v6543_v17 }
 0x5f8   : > { %6680 = vrot.lane.b32.xlu0 %v6679_v29, %s7255_s15  ;;  %6695 = vrot.lane.b32.xlu1 %v6694_v53, %s7255_s15  ;;  %v3055_v28 = vsel %vm1067_vm6, %v6532_v60, %v6533_v59 }
 0x5f9   : > { %v3003_v19 = vsel %vm1012_vm2, %v6492_v58, %v6557_v21  ;;  %v3004_v46 = vsel %vm1012_vm2, %v6557_v21, %v6558_v42 }
 0x5fa   : > { %v9901_v22 = vpop.permute.xlu0 %6560  ;;  %v9903_v33 = vpop.permute.xlu1 %6565  ;;  %v6704_v60 = vpack.i.bf16 %v3004_v46, %v3003_v19 }
 0x5fb   : > { %v6567_v62 = vunpack.i.l.bf16 %v9903_v33  ;;  %v6562_v41 = vunpack.i.l.bf16 %v9901_v22 }
 0x5fc   : > { %6690 = vrot.lane.b32.xlu0 %v6689_v39, %s7255_s15  ;;  %6700 = vrot.lane.b32.xlu1 %v6699_v0, %s7255_s15  ;;  %v6568_v39 = vunpack.i.h.bf16 %v9903_v33 }
 0x5fd   : > { %v3056_v54 = vsel %vm1067_vm6, %v6533_v59, %v6567_v62  ;;  %v3030_v58 = vsel %vm1040_vm4, %v6528_v16, %v6562_v41  ;;  %v6563_v59 = vunpack.i.h.bf16 %v9901_v22 }
 0x5fe   : > { %v9912_v12 = vpop.permute.xlu0 %6570  ;;  %v6714_v52 = vpack.i.bf16 %v3056_v54, %v3055_v28  ;;  %v9922_v27 = vpop.permute.xlu1 %6575  ;;  %v3057_v54 = vsel %vm1067_vm6, %v6567_v62, %v6568_v39 }
 0x5ff   : > { %v6572_v20 = vunpack.i.l.bf16 %v9912_v12  ;;  %v6577_v31 = vunpack.i.l.bf16 %v9922_v27  ;;  %v6573_v22 = vunpack.i.h.bf16 %v9912_v12  ;;  %v6578_v33 = vunpack.i.h.bf16 %v9922_v27 }
 0x600   : > { %3314 = vrot.lane.b32.xlu0 %v3133_v48, %s7255_s15  ;;  %6715 = vrot.lane.b32.xlu1 %v6714_v52, %s7255_s15 }
 0x601   : > { %v3082_v14 = vsel %vm1094_vm8, %v6538_v25, %v6572_v20  ;;  %v6709_v25 = vpack.i.bf16 %v6502_v3, %v3030_v58  ;;  %v3108_v56 = vsel %vm1121_vm5, %v6543_v17, %v6577_v31  ;;  %v3083_v27 = vsel %vm1094_vm8, %v6572_v20, %v6573_v22 }
 0x602   : > { %v6719_v45 = vpack.i.bf16 %v6512_v9, %v3082_v14  ;;  %v6724_v37 = vpack.i.bf16 %v3108_v56, %v3107_v57 }
 0x604   : > { %6705 = vrot.lane.b32.xlu0 %v6704_v60, %s7255_s15  ;;  %6720 = vrot.lane.b32.xlu1 %v6719_v45, %s7255_s15  ;;  %v3109_v45 = vsel %vm1121_vm5, %v6577_v31, %v6578_v33 }
 0x606   : > { %v9936_v13 = vpop.permute.xlu0 %6580  ;;  %v9938_v50 = vpop.permute.xlu1 %6585 }
 0x607   : > { %v6583_v9 = vunpack.i.h.bf16 %v9936_v13  ;;  %v6582_v16 = vunpack.i.l.bf16 %v9936_v13  ;;  %v6588_v36 = vunpack.i.h.bf16 %v9938_v50  ;;  %v6587_v3 = vunpack.i.l.bf16 %v9938_v50 }
 0x608   : > { %6710 = vrot.lane.b32.xlu0 %v6709_v25, %s7255_s15  ;;  %3316 = vrot.lane.b32.xlu1 %v3134_v55, %s7255_s15 }
 0x609   : > { %v2947_v47 = vsel %vm952_vm1, %v6548_v10, %v6582_v16  ;;  %v2948_v34 = vsel %vm952_vm1, %v6582_v16, %v6583_v9  ;;  %v2976_v35 = vsel %vm982_vm3, %v6553_v44, %v6587_v3  ;;  %v2977_v30 = vsel %vm982_vm3, %v6587_v3, %v6588_v36 }
 0x60a   : > { %v9954_v4 = vpop.permute.xlu0 %6590  ;;  %v9956_v11 = vpop.permute.xlu1 %3123  ;;  %v6729_v24 = vpack.i.bf16 %v2948_v34, %v2947_v47  ;;  %v6734_v21 = vpack.i.bf16 %v2977_v30, %v2976_v35  ;;  %v3031_v44 = vsel %vm1040_vm4, %v6562_v41, %v6563_v59 }
 0x60b   : > { %v6593_v18 = vunpack.i.h.bf16 %v9954_v4  ;;  %v6592_v23 = vunpack.i.l.bf16 %v9954_v4  ;;  %v3135_v20 = vsel %vm1148_vm7, %v9888_v40, %v9956_v11 }
 0x60c   : > { %6725 = vrot.lane.b32.xlu0 %v6724_v37, %s7255_s15 }
 0x60d   : > { %v3005_v15 = vsel %vm1012_vm2, %v6558_v42, %v6592_v23  ;;  %v3006_v29 = vsel %vm1012_vm2, %v6592_v23, %v6593_v18 }
 0x60e   : > { %v9967_v53 = vpop.permute.xlu0 %3125  ;;  %v9969_v32 = vpop.permute.xlu1 %6595  ;;  %v6739_v10 = vpack.i.bf16 %v3006_v29, %v3005_v15 }
 0x610   : > { %6730 = vrot.lane.b32.xlu0 %v6729_v24, %s7255_s15  ;;  %6740 = vrot.lane.b32.xlu1 %v6739_v10, %s7255_s15 }
 0x612   : > { %v6606_v0 = vpop.permute.xlu0 %6605  ;;  %v9981_v42 = vpop.permute.xlu1 %6600 }
 0x613   : > { %v6607_v28 = vunpack.i.l.bf16 %v6606_v0  ;;  %v6602_v7 = vunpack.i.l.bf16 %v9981_v42  ;;  %v6608_v23 = vunpack.i.h.bf16 %v6606_v0 }
 0x614   : > { %6735 = vrot.lane.b32.xlu0 %v6734_v21, %s7255_s15 }
 0x615   : > { %v3058_v48 = vsel %vm1067_vm6, %v6568_v39, %v6607_v28  ;;  %v3032_v52 = vsel %vm1040_vm4, %v6563_v59, %v6602_v7  ;;  %v3059_v0 = vsel %vm1067_vm6, %v6607_v28, %v6608_v23 }
 0x616   : > { %v6616_v19 = vpop.permute.xlu0 %6615  ;;  %v9993_v46 = vpop.permute.xlu1 %6610  ;;  %v6744_v14 = vpack.i.bf16 %v3032_v52, %v3031_v44  ;;  %v6749_v60 = vpack.i.bf16 %v3058_v48, %v3057_v54 }
 0x617   : > { %v6617_v41 = vunpack.i.l.bf16 %v6616_v19  ;;  %v6612_v62 = vunpack.i.l.bf16 %v9993_v46  ;;  %v6618_v39 = vunpack.i.h.bf16 %v6616_v19  ;;  %v6613_v28 = vunpack.i.h.bf16 %v9993_v46 }
 0x618   : > { %6745 = vrot.lane.b32.xlu0 %v6744_v14, %s7255_s15  ;;  %6750 = vrot.lane.b32.xlu1 %v6749_v60, %s7255_s15  ;;  %v3136_v46 = vsel %vm1148_vm7, %v9956_v11, %v9967_v53 }
 0x619   : > { %v3110_v58 = vsel %vm1121_vm5, %v6578_v33, %v6617_v41  ;;  %v3084_v17 = vsel %vm1094_vm8, %v6573_v22, %v6612_v62  ;;  %v3111_v50 = vsel %vm1121_vm5, %v6617_v41, %v6618_v39 }
 0x61a   : > { %v6626_v25 = vpop.permute.xlu0 %6625  ;;  %v3128_v56 = vpop.permute.xlu1 %3127  ;;  %v6754_v16 = vpack.i.bf16 %v3084_v17, %v3083_v27  ;;  %v6759_v55 = vpack.i.bf16 %v3110_v58, %v3109_v45  ;;  %v3085_v45 = vsel %vm1094_vm8, %v6612_v62, %v6613_v28 }
 0x61b   : > { %v6628_v57 = vunpack.i.h.bf16 %v6626_v25  ;;  %v6627_v3 = vunpack.i.l.bf16 %v6626_v25 }
 0x61c   : > { %6755 = vrot.lane.b32.xlu0 %v6754_v16, %s7255_s15  ;;  %6760 = vrot.lane.b32.xlu1 %v6759_v55, %s7255_s15  ;;  %v6522_v55 = vunpack.i.l.bf16 %v9815_v8 }
 0x61d   : > { %v2949_v31 = vsel %vm952_vm1, %v6583_v9, %v6627_v3  ;;  %v2950_v37 = vsel %vm952_vm1, %v6627_v3, %v6628_v57  ;;  %v6603_v9 = vunpack.i.h.bf16 %v9981_v42  ;;  %v6799_v42 = vpack.i.bf16 %v6628_v57, %v9745_v2 }
 0x61e   : > { %v6636_v4 = vpop.permute.xlu0 %6635  ;;  %v10006_v12 = vpop.permute.xlu1 %6620  ;;  %v6764_v35 = vpack.i.bf16 %v2950_v37, %v2949_v31  ;;  %v6518_v2 = vunpack.i.h.bf16 %v9809_v43 }
 0x61f   : > { %v6638_v47 = vunpack.i.h.bf16 %v6636_v4  ;;  %v6637_v34 = vunpack.i.l.bf16 %v6636_v4 }
 0x620   : > { %3318 = vrot.lane.b32.xlu0 %v3135_v20, %s7255_s15 }
 0x621   : > { %v3007_v15 = vsel %vm1012_vm2, %v6593_v18, %v6637_v34  ;;  %v3008_v29 = vsel %vm1012_vm2, %v6637_v34, %v6638_v47 }
 0x622   : > { %v3052_v24 = vpop.permute.xlu0 %3051  ;;  %v6631_v10 = vpop.permute.xlu1 %6630  ;;  %v6774_v30 = vpack.i.bf16 %v3008_v29, %v3007_v15 }
 0x623   : > { %v3060_v40 = vsel %vm1067_vm6, %v6608_v23, %v3052_v24  ;;  %v6633_v13 = vunpack.i.h.bf16 %v6631_v10  ;;  %v6632_v59 = vunpack.i.l.bf16 %v6631_v10 }
 0x624   : > { %6765 = vrot.lane.b32.xlu0 %v6764_v35, %s7255_s15  ;;  %6775 = vrot.lane.b32.xlu1 %v6774_v30, %s7255_s15  ;;  %v6784_v44 = vpack.i.bf16 %v3060_v40, %v3059_v0 }
 0x625   : > { %v2978_v18 = vsel %vm982_vm3, %v6588_v36, %v6632_v59  ;;  %v2979_v21 = vsel %vm982_vm3, %v6632_v59, %v6633_v13  ;;  %v3033_v36 = vsel %vm1040_vm4, %v6602_v7, %v6603_v9  ;;  %v3137_v7 = vsel %vm1148_vm7, %v9967_v53, %v3128_v56 }
 0x626   : > { %v3104_v54 = vpop.permute.xlu0 %3103  ;;  %v3026_v22 = vpop.permute.xlu1 %3025  ;;  %v6769_v33 = vpack.i.bf16 %v2979_v21, %v2978_v18  ;;  %v6804_v62 = vpack.i.bf16 %v6638_v47, %v6633_v13  ;;  %v6517_v53 = vunpack.i.l.bf16 %v9809_v43 }
 0x627   : > { %v3112_v48 = vsel %vm1121_vm5, %v6618_v39, %v3104_v54  ;;  %v3034_v52 = vsel %vm1040_vm4, %v6603_v9, %v3026_v22  ;;  %v6809_v11 = vpack.i.bf16 %v3052_v24, %v3026_v22 }
 0x628   : > { %6770 = vrot.lane.b32.xlu0 %v6769_v33, %s7255_s15  ;;  %6785 = vrot.lane.b32.xlu1 %v6784_v44, %s7255_s15  ;;  %v6794_v19 = vpack.i.bf16 %v3112_v48, %v3111_v50  ;;  %v6779_v14 = vpack.i.bf16 %v3034_v52, %v3033_v36  ;;  %v3328_v37 = vsel %vm1344_vm9, %v6522_v55, %v6517_v53  ;;  %v6523_v33 = vunpack.i.h.bf16 %v9815_v8 }
 0x629   : > { %v3329_v47 = vsel %vm1344_vm9, %v6517_v53, %v6518_v2 }
 0x62a   : > { %v3078_v60 = vpop.permute.xlu1 %3077  ;;  %v3130_v41 = vpop.permute.xlu0 %3129 }
 0x62b   : > { %v3086_v27 = vsel %vm1094_vm8, %v6613_v28, %v3078_v60  ;;  %v3138_v17 = vsel %vm1148_vm7, %v3128_v56, %v3130_v41  ;;  %v6814_v25 = vpack.i.bf16 %v3104_v54, %v3078_v60  ;;  %v4931_v56 = vld [vmem:[%s11204_s4 + $0x10] sm:$0xff] }
 0x62c   : > { %6780 = vrot.lane.b32.xlu0 %v6779_v14, %s7255_s15  ;;  %6795 = vrot.lane.b32.xlu1 %v6794_v19, %s7255_s15  ;;  %v6789_v58 = vpack.i.bf16 %v3086_v27, %v3085_v45  ;;  %v3330_v19 = vsel %vm1344_vm9, %v6518_v2, %v6523_v33 }
 0x62e   : > { %v10063_v57 = vpop.permute.xlu1 %3308 }
 0x630   : > { %6790 = vrot.lane.b32.xlu0 %v6789_v58, %s7255_s15  ;;  %3320 = vrot.lane.b32.xlu1 %v3136_v46, %s7255_s15 }
 0x634   : > { %6800 = vrot.lane.b32.xlu0 %v6799_v42, %s7255_s15  ;;  %3322 = vrot.lane.b32.xlu1 %v3137_v7, %s7255_s15 }
 0x638   : > { %3324 = vrot.lane.b32.xlu0 %v3138_v17, %s7255_s15  ;;  %6805 = vrot.lane.b32.xlu1 %v6804_v62, %s7255_s15 }
 0x63a   : > { %v10053_v16 = vpop.permute.xlu0 %6640 }
 0x63b   : > { %v6643_v4 = vunpack.i.h.bf16 %v10053_v16  ;;  %v6642_v48 = vunpack.i.l.bf16 %v10053_v16 }
 0x63c   : > { %6810 = vrot.lane.b32.xlu0 %v6809_v11, %s7255_s15  ;;  %6815 = vrot.lane.b32.xlu1 %v6814_v25, %s7255_s15 }
 0x63d   : > { %v3331_v8 = vsel %vm1344_vm9, %v6523_v33, %v6642_v48 }
 0x63e   : > { %v6646_v3 = vpop.permute.xlu0 %6645 }
 0x63f   : > { %v6648_v20 = vunpack.i.h.bf16 %v6646_v3  ;;  %v6647_v31 = vunpack.i.l.bf16 %v6646_v3 }
 0x640   : > { %3326 = vrot.lane.b32.xlu0 %v3130_v41, %s7255_s15  ;;  %3145 = vperm.xlu1 %6819, %v4931_v56  }
 0x641   : > { %v3337_v43 = vsel %vm1344_vm9, %v6643_v4, %v6647_v31  ;;  %v3338_v34 = vsel %vm1344_vm9, %v6647_v31, %v6648_v20 }
 0x642   : > { %v10071_v23 = vpop.permute.xlu0 %6650  ;;  %v10073_v15 = vpop.permute.xlu1 %6655  ;;  %v5547_v29 = vpack.c.bf16 %v3338_v34, %v3329_v47  ;;  %v5549_v24 = vpack.c.bf16 %v3337_v43, %v3328_v37 }
 0x643   : > { %v6653_v10 = vunpack.i.h.bf16 %v10071_v23  ;;  %v6652_v35 = vunpack.i.l.bf16 %v10071_v23  ;;  %v6658_v30 = vunpack.i.h.bf16 %v10073_v15  ;;  %v6657_v40 = vunpack.i.l.bf16 %v10073_v15 }
 0x644   : > { %5548 = vmatprep.subr.bf16.mxu0 %v5547_v29 }
 0x645   : > { %5550 = vmatpush1.bf16.msra.mxu0 %v5549_v24  ;;  %v3347_v13 = vsel %vm1344_vm9, %v6652_v35, %v6653_v10  ;;  %v3356_v59 = vsel %vm1344_vm9, %v6657_v40, %v6658_v30 }
 0x646   : > { %v5551_v9 = vpack.c.bf16 %v3356_v59, %v3347_v13 }
 0x648   : > { %5552 = vmatprep.subr.bf16.mxu0 %v5551_v9 }
 0x64e   : > { %v10081_v39 = vpop.permute.xlu1 %6660 }
 0x64f   : > { %v6663_v46 = vunpack.i.h.bf16 %v10081_v39  ;;  %v6662_v42 = vunpack.i.l.bf16 %v10081_v39 }
 0x651   : > { %v3365_v4 = vsel %vm1344_vm9, %v6662_v42, %v6663_v46 }
 0x652   : > { %v10083_v0 = vpop.permute.xlu0 %6665 }
 0x653   : > { %v6668_v14 = vunpack.i.h.bf16 %v10083_v0  ;;  %v6667_v60 = vunpack.i.l.bf16 %v10083_v0 }
 0x655   : > { %v3374_v25 = vsel %vm1344_vm9, %v6667_v60, %v6668_v14 }
 0x656   : > { %v10087_v21 = vpop.permute.xlu0 %6670 }
 0x657   : > { %v6673_v43 = vunpack.i.h.bf16 %v10087_v21  ;;  %v6672_v47 = vunpack.i.l.bf16 %v10087_v21 }
 0x65a   : > { %v10085_v18 = vpop.permute.xlu1 %6675  ;;  %v10091_v54 = vpop.permute.xlu0 %3312 }
 0x65b   : > { %v6678_v23 = vunpack.i.h.bf16 %v10085_v18  ;;  %v6677_v15 = vunpack.i.l.bf16 %v10085_v18 }
 0x65e   : > { %v10089_v44 = vpop.permute.xlu1 %3310 }
 0x662   : > { %v10093_v22 = vpop.permute.xlu1 %6685 }
 0x66a   : > { %v6681_v52 = vpop.permute.xlu0 %6680  ;;  %v10097_v28 = vpop.permute.xlu1 %6695 }
 0x66b   : > { %v6698_v50 = vunpack.i.h.bf16 %v10097_v28  ;;  %v6697_v36 = vunpack.i.l.bf16 %v10097_v28  ;;  %v6682_v27 = vunpack.i.l.bf16 %v6681_v52  ;;  %v6683_v31 = vunpack.i.h.bf16 %v6681_v52 }
 0x66d   : > { %v3339_v45 = vsel %vm1344_vm9, %v6648_v20, %v6697_v36  ;;  %v3340_v58 = vsel %vm1344_vm9, %v6697_v36, %v6698_v50  ;;  %v3346_v2 = vsel %vm1344_vm9, %v6682_v27, %v6652_v35  ;;  %v5555_v20 = vpack.c.bf16 %v3374_v25, %v3365_v4 }
 0x66e   : > { %v10113_v7 = vpop.permute.xlu0 %6690  ;;  %v10115_v41 = vpop.permute.xlu1 %6700  ;;  %v5563_v62 = vpack.c.bf16 %v3340_v58, %v3331_v8  ;;  %v5565_v17 = vpack.c.bf16 %v3339_v45, %v3330_v19  ;;  %v3348_v35 = vsel %vm1344_vm9, %v6653_v10, %v6683_v31  ;;  %v6688_v10 = vunpack.i.h.bf16 %v10093_v22 }
 0x66f   : > { %v6703_v11 = vunpack.i.h.bf16 %v10115_v41  ;;  %v6702_v37 = vunpack.i.l.bf16 %v10115_v41  ;;  %v3383_v36 = vsel %vm1344_vm9, %v6672_v47, %v6673_v43  ;;  %v3392_v45 = vsel %vm1344_vm9, %v6677_v15, %v6678_v23  ;;  %v10249_v41 = vld [vmem:[#allocation2] sm:$0xff] }
 0x670   : > { %5564 = vmatprep.subr.bf16.mxu1 %v5563_v62  ;;  %v6693_v58 = vunpack.i.h.bf16 %v10113_v7 }
 0x671   : > { %v3355_v53 = vsel %vm1344_vm9, %v6703_v11, %v6657_v40  ;;  %5566 = vmatpush1.bf16.msra.mxu1 %v5565_v17  ;;  %v6687_v40 = vunpack.i.l.bf16 %v10093_v22  ;;  %v3349_v0 = vsel %vm1344_vm9, %v6683_v31, %v6702_v37  ;;  %v6692_v22 = vunpack.i.l.bf16 %v10113_v7 }
 0x672   : > { %v10121_v55 = vpop.permute.xlu0 %3314  ;;  %v10123_v56 = vpop.permute.xlu1 %6715  ;;  %v5553_v3 = vpack.c.bf16 %v3355_v53, %v3346_v2  ;;  %v3366_v2 = vsel %vm1344_vm9, %v6663_v46, %v6688_v10  ;;  %v3384_v46 = vsel %vm1344_vm9, %v6673_v43, %v6693_v58 }
 0x673   : > { %v6717_v13 = vunpack.i.l.bf16 %v10123_v56  ;;  %v6718_v39 = vunpack.i.h.bf16 %v10123_v56  ;;  %v3364_v8 = vsel %vm1344_vm9, %v6687_v40, %v6662_v42  ;;  %v6597_v40 = vunpack.i.l.bf16 %v9969_v32 }
 0x674   : > { %5554 = vmatpush1.bf16.msra.mxu0 %v5553_v3 }
 0x675   : > { %5556 = vmatprep.subr.bf16.mxu0 %v5555_v20  ;;  %v3375_v62 = vsel %vm1344_vm9, %v6668_v14, %v6717_v13  ;;  %v3376_v42 = vsel %vm1344_vm9, %v6717_v13, %v6718_v39  ;;  %v3382_v13 = vsel %vm1344_vm9, %v6692_v22, %v6672_v47  ;;  %v3332_v28 = vsel %vm1344_vm9, %v6642_v48, %v6597_v40 }
 0x676   : > { %v10129_v34 = vpop.permute.xlu0 %6705  ;;  %v10138_v59 = vpop.permute.xlu1 %6720 }
 0x677   : > { %v6708_v29 = vunpack.i.h.bf16 %v10129_v34  ;;  %v6707_v24 = vunpack.i.l.bf16 %v10129_v34  ;;  %v6723_v27 = vunpack.i.h.bf16 %v10138_v59  ;;  %v6722_v11 = vunpack.i.l.bf16 %v10138_v59 }
 0x679   : > { %v3357_v9 = vsel %vm1344_vm9, %v6658_v30, %v6707_v24  ;;  %v3358_v18 = vsel %vm1344_vm9, %v6707_v24, %v6708_v29  ;;  %v3391_v4 = vsel %vm1344_vm9, %v6723_v27, %v6677_v15  ;;  %v5573_v24 = vpack.c.bf16 %v3375_v62, %v3366_v2 }
 0x67a   : > { %v10149_v21 = vpop.permute.xlu0 %6710  ;;  %v5567_v33 = vpack.c.bf16 %v3358_v18, %v3349_v0  ;;  %v5569_v52 = vpack.c.bf16 %v3357_v9, %v3348_v35  ;;  %v10171_v7 = vpop.permute.xlu1 %3316  ;;  %v6598_v35 = vunpack.i.h.bf16 %v9969_v32  ;;  %v3385_v15 = vsel %vm1344_vm9, %v6693_v58, %v6722_v11 }
 0x67b   : > { %v6713_v30 = vunpack.i.h.bf16 %v10149_v21  ;;  %v6712_v19 = vunpack.i.l.bf16 %v10149_v21  ;;  %v5561_v43 = vpack.c.bf16 %v3391_v4, %v3382_v13 }
 0x67c   : > { %5568 = vmatprep.subr.bf16.mxu1 %v5567_v33 }
 0x67d   : > { %v3373_v17 = vsel %vm1344_vm9, %v6713_v30, %v6667_v60  ;;  %5570 = vmatpush1.bf16.msra.mxu1 %v5569_v52  ;;  %v3367_v25 = vsel %vm1344_vm9, %v6688_v10, %v6712_v19  ;;  %v5559_v60 = vpack.c.bf16 %v3392_v45, %v3383_v36  ;;  %v3401_v36 = vsel %vm1344_vm9, %v10089_v44, %v10091_v54 }
 0x67e   : > { %v10169_v53 = vpop.permute.xlu0 %6725  ;;  %v5557_v14 = vpack.c.bf16 %v3373_v17, %v3364_v8  ;;  %v5571_v3 = vpack.c.bf16 %v3376_v42, %v3367_v25  ;;  %v3333_v30 = vsel %vm1344_vm9, %v6597_v40, %v6598_v35  ;;  %v3403_v8 = vsel %vm1344_vm9, %v10121_v55, %v10171_v7  ;;  %v10215_v17 = vld [vmem:[%s11203_s3 + $0x10] sm:$0xff] }
 0x67f   : > { %v6728_v20 = vunpack.i.h.bf16 %v10169_v53  ;;  %v6727_v31 = vunpack.i.l.bf16 %v10169_v53 }
 0x680   : > { %5558 = vmatpush1.bf16.msra.mxu0 %v5557_v14  ;;  %5572 = vmatprep.subr.bf16.mxu1 %v5571_v3  ;;  %v3400_v14 = vsel %vm1344_vm9, %v10063_v57, %v10089_v44 }
 0x681   : > { %v3393_v9 = vsel %vm1344_vm9, %v6678_v23, %v6727_v31  ;;  %5560 = vmatprep.subr.bf16.mxu0 %v5559_v60  ;;  %5574 = vmatpush1.bf16.msra.mxu1 %v5573_v24  ;;  %v3394_v0 = vsel %vm1344_vm9, %v6727_v31, %v6728_v20 }
 0x682   : > { %v10187_v18 = vpop.permute.xlu0 %6730  ;;  %v10189_v10 = vpop.permute.xlu1 %6740  ;;  %v5575_v47 = vpack.c.bf16 %v3394_v0, %v3385_v15  ;;  %v5577_v33 = vpack.c.bf16 %v3393_v9, %v3384_v46 }
 0x683   : > { %v6733_v52 = vunpack.i.h.bf16 %v10187_v18  ;;  %v6732_v23 = vunpack.i.l.bf16 %v10187_v18  ;;  %v6743_v27 = vunpack.i.h.bf16 %v10189_v10  ;;  %v6742_v45 = vunpack.i.l.bf16 %v10189_v10 }
 0x684   : > { %5562 = vmatpush1.bf16.msra.mxu0 %v5561_v43  ;;  %5576 = vmatprep.subr.bf16.mxu1 %v5575_v47 }
 0x685   : > { %3509 = vmatprep.subr.mxu0 %v3401_v36  ;;  %5578 = vmatpush1.bf16.msra.mxu1 %v5577_v33  ;;  %v3342_v58 = vsel %vm1344_vm9, %v6732_v23, %v6733_v52  ;;  %v3341_v22 = vsel %vm1344_vm9, %v6698_v50, %v6732_v23  ;;  %v3402_v50 = vsel %vm1344_vm9, %v10091_v54, %v10121_v55 }
 0x686   : > { %v10210_v62 = vpop.permute.xlu0 %6735  ;;  %3580 = vmatprep.subr.mxu1 %v3403_v8  ;;  %v5579_v25 = vpack.c.bf16 %v3342_v58, %v3333_v30  ;;  %v5581_v3 = vpack.c.bf16 %v3341_v22, %v3332_v28  ;;  %v3360_v16 = vsel %vm1344_vm9, %v6742_v45, %v6743_v27  ;;  %v6622_v8 = vunpack.i.l.bf16 %v10006_v12 }
 0x687   : > { %v6738_v42 = vunpack.i.h.bf16 %v10210_v62  ;;  %v6737_v2 = vunpack.i.l.bf16 %v10210_v62  ;;  %v6623_v58 = vunpack.i.h.bf16 %v10006_v12 }
 0x688   : > { %3510 = vmatpush1.msra.mxu0 %v3400_v14  ;;  %v3334_v53 = vsel %vm1344_vm9, %v6598_v35, %v6622_v8 }
 0x689   : > { %4932 = vmatmul.mubr.msk.f32.vlgmr.msra.gmra.mrb[14].mxu0 %vm1507_vm10, %v10215_v17  ;;  %3581 = vmatpush1.msra.mxu1 %v3402_v50  ;;  %v3351_v60 = vsel %vm1344_vm9, %v6737_v2, %v6738_v42  ;;  %v3350_v57 = vsel %vm1344_vm9, %v6702_v37, %v6737_v2  ;;  %v3359_v37 = vsel %vm1344_vm9, %v6708_v29, %v6742_v45 }
 0x68a   : > { %5580 = vmatprep.subr.bf16.mxu0 %v5579_v25  ;;  %v10239_v44 = vpop.permute.xlu0 %6745  ;;  %v10241_v54 = vpop.permute.xlu1 %6750  ;;  %4933 = vmatmul.mubr.msk.f32.vlgmr.msra.gmra.mrb[16].mxu1 %vm1507_vm10, %v10215_v17  ;;  %v5583_v48 = vpack.c.bf16 %v3360_v16, %v3351_v60  ;;  %v5585_v40 = vpack.c.bf16 %v3359_v37, %v3350_v57  ;;  %v3335_v50 = vsel %vm1344_vm9, %v6622_v8, %v6623_v58 }
 0x68b   : > { %v6748_v55 = vunpack.i.h.bf16 %v10239_v44  ;;  %v6747_v4 = vunpack.i.l.bf16 %v10239_v44  ;;  %v6753_v31 = vunpack.i.h.bf16 %v10241_v54  ;;  %v6752_v24 = vunpack.i.l.bf16 %v10241_v54  ;;  %5582 = vmatpush1.bf16.msra.mxu0 %v5581_v3  ;;  %3699 = vmatprep.mubr.f32.mxu0 %v10249_v41 }
 0x68c   : > { %5584 = vmatprep.subr.bf16.mxu0 %v5583_v48  ;;  %3770 = vmatprep.mubr.f32.mxu1 %v10249_v41 }
 0x68d   : > { %v3369_v46 = vsel %vm1344_vm9, %v6747_v4, %v6748_v55  ;;  %v3378_v13 = vsel %vm1344_vm9, %v6752_v24, %v6753_v31  ;;  %v3368_v9 = vsel %vm1344_vm9, %v6712_v19, %v6747_v4  ;;  %v3377_v34 = vsel %vm1344_vm9, %v6718_v39, %v6752_v24 }
 0x68e   : > { %v10268_v29 = vpop.permute.xlu0 %6755  ;;  %v10270_v15 = vpop.permute.xlu1 %6760  ;;  %v5587_v0 = vpack.c.bf16 %v3378_v13, %v3369_v46  ;;  %v5589_v21 = vpack.c.bf16 %v3377_v34, %v3368_v9 }
 0x68f   : > { %v6758_v43 = vunpack.i.h.bf16 %v10268_v29  ;;  %v6757_v47 = vunpack.i.l.bf16 %v10268_v29  ;;  %v6763_v33 = vunpack.i.h.bf16 %v10270_v15  ;;  %v6762_v23 = vunpack.i.l.bf16 %v10270_v15  ;;  %5586 = vmatpush1.bf16.msra.mxu0 %v5585_v40 }
 0x690   : > { %5588 = vmatprep.subr.bf16.mxu0 %v5587_v0 }
 0x691   : > { %v3387_v56 = vsel %vm1344_vm9, %v6757_v47, %v6758_v43  ;;  %v3396_v39 = vsel %vm1344_vm9, %v6762_v23, %v6763_v33  ;;  %v3386_v19 = vsel %vm1344_vm9, %v6722_v11, %v6757_v47  ;;  %v3395_v36 = vsel %vm1344_vm9, %v6728_v20, %v6762_v23 }
 0x692   : > { %v3319_v30 = vpop.permute.xlu0 %3318  ;;  %v5591_v45 = vpack.c.bf16 %v3396_v39, %v3387_v56  ;;  %v5593_v22 = vpack.c.bf16 %v3395_v36, %v3386_v19 }
 0x693   : > { %5590 = vmatpush1.bf16.msra.mxu0 %v5589_v21 }
 0x694   : > { %5592 = vmatprep.subr.bf16.mxu0 %v5591_v45  ;;  %v3404_v45 = vsel %vm1344_vm9, %v10171_v7, %v3319_v30 }
 0x696   : > { %v10290_v25 = vpop.permute.xlu0 %6765  ;;  %v10292_v2 = vpop.permute.xlu1 %6775 }
 0x697   : > { %v6768_v59 = vunpack.i.h.bf16 %v10290_v25  ;;  %v6767_v11 = vunpack.i.l.bf16 %v10290_v25  ;;  %5594 = vmatpush1.bf16.msra.mxu0 %v5593_v22  ;;  %v6777_v20 = vunpack.i.l.bf16 %v10292_v2  ;;  %v6778_v28 = vunpack.i.h.bf16 %v10292_v2 }
 0x699   : > { %v3343_v14 = vsel %vm1344_vm9, %v6733_v52, %v6767_v11  ;;  %v3344_v3 = vsel %vm1344_vm9, %v6767_v11, %v6768_v59  ;;  %v3361_v57 = vsel %vm1344_vm9, %v6743_v27, %v6777_v20  ;;  %v3362_v10 = vsel %vm1344_vm9, %v6777_v20, %v6778_v28 }
 0x69a   : > { %v10310_v60 = vpop.permute.xlu0 %6770  ;;  %v10312_v32 = vpop.permute.xlu1 %6785  ;;  %v5595_v35 = vpack.c.bf16 %v3344_v3, %v3335_v50  ;;  %v5597_v16 = vpack.c.bf16 %v3343_v14, %v3334_v53 }
 0x69b   : > { %v6773_v18 = vunpack.i.h.bf16 %v10310_v60  ;;  %v6772_v52 = vunpack.i.l.bf16 %v10310_v60  ;;  %v6787_v48 = vunpack.i.l.bf16 %v10312_v32  ;;  %v6788_v24 = vunpack.i.h.bf16 %v10312_v32 }
 0x69c   : > { %5596 = vmatprep.subr.bf16.mxu1 %v5595_v35 }
 0x69d   : > { %v3352_v4 = vsel %vm1344_vm9, %v6738_v42, %v6772_v52  ;;  %5598 = vmatpush1.bf16.msra.mxu1 %v5597_v16  ;;  %v3353_v37 = vsel %vm1344_vm9, %v6772_v52, %v6773_v18  ;;  %v3379_v9 = vsel %vm1344_vm9, %v6753_v31, %v6787_v48  ;;  %v3380_v54 = vsel %vm1344_vm9, %v6787_v48, %v6788_v24 }
 0x69e   : > { %v10330_v40 = vpop.permute.xlu0 %6780  ;;  %v10332_v27 = vpop.permute.xlu1 %6795  ;;  %v5599_v46 = vpack.c.bf16 %v3362_v10, %v3353_v37  ;;  %v5601_v13 = vpack.c.bf16 %v3361_v57, %v3352_v4 }
 0x69f   : > { %v6783_v62 = vunpack.i.h.bf16 %v10330_v40  ;;  %v6782_v42 = vunpack.i.l.bf16 %v10330_v40  ;;  %v6797_v34 = vunpack.i.l.bf16 %v10332_v27  ;;  %v6798_v47 = vunpack.i.h.bf16 %v10332_v27 }
 0x6a0   : > { %5600 = vmatprep.subr.bf16.mxu1 %v5599_v46 }
 0x6a1   : > { %v3370_v0 = vsel %vm1344_vm9, %v6748_v55, %v6782_v42  ;;  %5602 = vmatpush1.bf16.msra.mxu1 %v5601_v13  ;;  %v3371_v23 = vsel %vm1344_vm9, %v6782_v42, %v6783_v62  ;;  %v3397_v55 = vsel %vm1344_vm9, %v6763_v33, %v6797_v34  ;;  %v3398_v11 = vsel %vm1344_vm9, %v6797_v34, %v6798_v47 }
 0x6a2   : > { %v6791_v21 = vpop.permute.xlu0 %6790  ;;  %v3321_v31 = vpop.permute.xlu1 %3320  ;;  %v5603_v56 = vpack.c.bf16 %v3380_v54, %v3371_v23  ;;  %v5605_v39 = vpack.c.bf16 %v3379_v9, %v3370_v0 }
 0x6a3   : > { %v6793_v19 = vunpack.i.h.bf16 %v6791_v21  ;;  %v6792_v36 = vunpack.i.l.bf16 %v6791_v21  ;;  %v3405_v44 = vsel %vm1344_vm9, %v3319_v30, %v3321_v31 }
 0x6a4   : > { %3651 = vmatprep.subr.mxu0 %v3405_v44  ;;  %5604 = vmatprep.subr.bf16.mxu1 %v5603_v56 }
 0x6a5   : > { %v3388_v8 = vsel %vm1344_vm9, %v6758_v43, %v6792_v36  ;;  %3652 = vmatpush1.msra.mxu0 %v3404_v45  ;;  %5606 = vmatpush1.bf16.msra.mxu1 %v5605_v39  ;;  %v3389_v22 = vsel %vm1344_vm9, %v6792_v36, %v6793_v19 }
 0x6a6   : > { %v6801_v53 = vpop.permute.xlu0 %6800  ;;  %v3323_v20 = vpop.permute.xlu1 %3322  ;;  %4934 = vmatmul.mubr.msk.f32.vlgmr.msra.gmra.mrb[16].mxu0 %vm1507_vm10, %v10215_v17  ;;  %v5607_v15 = vpack.c.bf16 %v3398_v11, %v3389_v22  ;;  %v5609_v33 = vpack.c.bf16 %v3397_v55, %v3388_v8  ;;  %5611 = vmatprep.subr.bf16.mxu0 %v7257_v26 }
 0x6a7   : > { %v6803_v7 = vunpack.i.h.bf16 %v6801_v53  ;;  %v6802_v30 = vunpack.i.l.bf16 %v6801_v53  ;;  %5083 = vmatprep.mubr.msk.f32.mxu0 %vm7258_vm11, %v10249_v41  ;;  %v3406_v57 = vsel %vm1344_vm9, %v3321_v31, %v3323_v20 }
 0x6a8   : > { %5608 = vmatprep.subr.bf16.mxu1 %v5607_v15 }
 0x6a9   : > { %v3336_v29 = vsel %vm1344_vm9, %v6623_v58, %v6802_v30  ;;  %v3345_v43 = vsel %vm1344_vm9, %v6768_v59, %v6803_v7  ;;  %5610 = vmatpush1.bf16.msra.mxu1 %v5609_v33 }
 0x6aa   : > { %v3325_v14 = vpop.permute.xlu0 %3324  ;;  %v6806_v50 = vpop.permute.xlu1 %6805  ;;  %v5612_v3 = vpack.c.bf16 %v3345_v43, %v3336_v29 }
 0x6ab   : > { %v6808_v35 = vunpack.i.h.bf16 %v6806_v50  ;;  %v6807_v16 = vunpack.i.l.bf16 %v6806_v50  ;;  %v3407_v52 = vsel %vm1344_vm9, %v3323_v20, %v3325_v14 }
 0x6ac   : > { %3722 = vmatprep.subr.mxu1 %v3407_v52  ;;  %5613 = vmatpush3.bf16.msra.mxu0 %v5612_v3 }
 0x6ad   : > { %v3354_v12 = vsel %vm1344_vm9, %v6773_v18, %v6807_v16  ;;  %v3363_v58 = vsel %vm1344_vm9, %v6778_v28, %v6808_v35  ;;  %3723 = vmatpush1.msra.mxu1 %v3406_v57  ;;  %5614 = vmatprep.subr.bf16.mxu0 %v7257_v26 }
 0x6ae   : > { %v6811_v25 = vpop.permute.xlu0 %6810  ;;  %v6816_v59 = vpop.permute.xlu1 %6815  ;;  %4935 = vmatmul.mubr.msk.f32.vlgmr.msra.gmra.mrb[18].mxu1 %vm1507_vm10, %v10215_v17  ;;  %v5615_v48 = vpack.c.bf16 %v3363_v58, %v3354_v12 }
 0x6af   : > { %v6813_v4 = vunpack.i.h.bf16 %v6811_v25  ;;  %v6812_v37 = vunpack.i.l.bf16 %v6811_v25  ;;  %v6818_v10 = vunpack.i.h.bf16 %v6816_v59  ;;  %v6817_v27 = vunpack.i.l.bf16 %v6816_v59  ;;  %4529 = vmatprep.mubr.f32.mxu1 %v10249_v41 }
 0x6b0   : > { %5616 = vmatpush3.bf16.msra.mxu0 %v5615_v48 }
 0x6b1   : > { %v3372_v2 = vsel %vm1344_vm9, %v6783_v62, %v6812_v37  ;;  %v3381_v28 = vsel %vm1344_vm9, %v6788_v24, %v6813_v4  ;;  %5617 = vmatprep.subr.bf16.mxu0 %v7257_v26  ;;  %v3390_v18 = vsel %vm1344_vm9, %v6793_v19, %v6817_v27  ;;  %v3399_v46 = vsel %vm1344_vm9, %v6798_v47, %v6818_v10 }
 0x6b2   : > { %v5618_v60 = vpack.c.bf16 %v3381_v28, %v3372_v2  ;;  %v5621_v13 = vpack.c.bf16 %v3399_v46, %v3390_v18  ;;  %v3327_v42 = vpop.permute.xlu0 %3326 }
 0x6b3   : > { %v3408_v40 = vsel %vm1344_vm9, %v3325_v14, %v3327_v42 }
 0x6b4   : > { %5619 = vmatpush3.bf16.msra.mxu0 %v5618_v60 }
 0x6b5   : > { %5620 = vmatprep.subr.bf16.mxu0 %v7257_v26 }
 0x6b8   : > { %5622 = vmatpush3.bf16.msra.mxu0 %v5621_v13 }
 0x6b9   : > { %5081 = vmatprep.subr.mxu0 %v10249_v41 }
 0x6bc   : > { %5082 = vmatpush3.msra.mxu0 %v3408_v40 }
 0x6bd   : > { %5084 = vmatmul.mubr.msk.f32.vlgmr.msra.gmra.mrb[18].mxu0 %vm1507_vm10, %v10215_v17 }
 0x6be   : > { %4600 = vmatprep.mubr.f32.mxu0 %v10249_v41 }
 0x6bf   : > { %v10399_v32 = vpop.permute.xlu1 %3145 }
 0x75c   : > { %v3559_v24 = vpop.f32.mrb[14].mxu0 }
 0x75d   : > { %v3560_v62 = vadd.f32 %v3559_v24, %v10399_v32  ;;  %v3561_v9 = vpop.f32.mrb[15].mxu0  ;;  %v3630_v34 = vpop.f32.mrb[16].mxu1 }
 0x75e   : > { %v3562_v0 = vadd.f32 %v3561_v9, %v10399_v32  ;;  %v3631_v47 = vadd.f32 %v3630_v34, %v10399_v32  ;;  %v3632_v23 = vpop.f32.mrb[17].mxu1 }
 0x75f   : > { %v3847_v54 = vmax.f32 %v3560_v62, 0.0  ;;  %v3633_v21 = vadd.f32 %v3632_v23, %v10399_v32 }
 0x760   : > { %v3848_v31 = vmax.f32 %v3562_v0, 0.0  ;;  %v3849_v56 = vmax.f32 %v3631_v47, 0.0 }
 0x761   : > { %v3856_v17 = vmul.f32 %v3847_v54, %v8947_v1  ;;  %v3850_v39 = vmax.f32 %v3633_v21, 0.0 }
 0x762   : > { %v3857_v19 = vmul.f32 %v3848_v31, %v8949_v51  ;;  %v3858_v36 = vmul.f32 %v3849_v56, %v8965_v6 }
 0x763   : > { %v3859_v44 = vmul.f32 %v3850_v39, %v8967_v38  ;;  %4085 = vrot.lane.b32.xlu0 %v3856_v17, %s7250_s26 }
 0x764   : > { %4087 = vrot.lane.b32.xlu1 %v3857_v19, %s7250_s26  ;;  %v6820_v55 = vpack.i.bf16 %v3857_v19, %v3856_v17  ;;  %v6860_v8 = vpack.i.bf16 %v10249_v41, %v3858_v36 }
 0x765   : > { %v6875_v45 = vpack.i.bf16 %v3859_v44, %v3858_v36 }
 0x767   : > { %6821 = vrot.lane.b32.xlu0 %v6820_v55, %s7248_s23 }
 0x768   : > { %6861 = vrot.lane.b32.xlu1 %v6860_v8, %s7248_s23 }
 0x76b   : > { %6826 = vrot.lane.b32.xlu0 %v6820_v55, %s7247_s17 }
 0x76c   : > { %6866 = vrot.lane.b32.xlu1 %v6860_v8, %s7247_s17 }
 0x76f   : > { %6831 = vrot.lane.b32.xlu0 %v6820_v55, %s7249_s13 }
 0x770   : > { %6871 = vrot.lane.b32.xlu1 %v6860_v8, %s7249_s13 }
 0x773   : > { %6836 = vrot.lane.b32.xlu0 %v6820_v55, %s7251_s30 }
 0x774   : > { %6876 = vrot.lane.b32.xlu1 %v6875_v45, %s7251_s30 }
 0x777   : > { %6841 = vrot.lane.b32.xlu0 %v6820_v55, %s7252_s6 }
 0x778   : > { %6881 = vrot.lane.b32.xlu1 %v6875_v45, %s7252_s6 }
 0x779   : > { %v3701_v1 = vpop.f32.mrb[16].mxu0 }
 0x77a   : > { %v3702_v51 = vadd.f32 %v3701_v1, %v10399_v32  ;;  %v3703_v6 = vpop.f32.mrb[17].mxu0 }
 0x77b   : > { %v3704_v38 = vadd.f32 %v3703_v6, %v10399_v32  ;;  %6846 = vrot.lane.b32.xlu0 %v6820_v55, %s7253_s7 }
 0x77c   : > { %v3851_v22 = vmax.f32 %v3702_v51, 0.0  ;;  %6886 = vrot.lane.b32.xlu1 %v6875_v45, %s7253_s7 }
 0x77d   : > { %v3852_v11 = vmax.f32 %v3704_v38, 0.0 }
 0x77e   : > { %v3860_v53 = vmul.f32 %v3851_v22, %v8982_v63 }
 0x77f   : > { %v3861_v20 = vmul.f32 %v3852_v11, %v8984_v5  ;;  %6851 = vrot.lane.b32.xlu0 %v6820_v55, %s7254_s8 }
 0x780   : > { %6891 = vrot.lane.b32.xlu1 %v6875_v45, %s7254_s8  ;;  %v6900_v15 = vpack.i.bf16 %v3860_v53, %v3859_v44 }
 0x781   : > { %v3772_v33 = vpop.f32.mrb[18].mxu1  ;;  %v6915_v7 = vpack.i.bf16 %v3861_v20, %v3860_v53 }
 0x782   : > { %v3773_v30 = vadd.f32 %v3772_v33, %v10399_v32  ;;  %v3774_v29 = vpop.f32.mrb[19].mxu1 }
 0x783   : > { %v3775_v43 = vadd.f32 %v3774_v29, %v10399_v32  ;;  %6856 = vrot.lane.b32.xlu0 %v6820_v55, %s7255_s15 }
 0x784   : > { %v3853_v14 = vmax.f32 %v3773_v30, 0.0  ;;  %6901 = vrot.lane.b32.xlu1 %v6900_v15, %s7247_s17 }
 0x785   : > { %v3854_v63 = vmax.f32 %v3775_v43, 0.0 }
 0x786   : > { %v3862_v5 = vmul.f32 %v3853_v14, %v8989_v49 }
 0x787   : > { %v3863_v50 = vmul.f32 %v3854_v63, %v8992_v61  ;;  %4089 = vrot.lane.b32.xlu0 %v3858_v36, %s7250_s26  ;;  %v7180_v61 = vld [vmem:[%s11202_s2 + $0x8] ss:$0 sm:$0xff] }
 0x788   : > { %4093 = vrot.lane.b32.xlu1 %v3860_v53, %s7250_s26  ;;  %v6940_v3 = vpack.i.bf16 %v3862_v5, %v3861_v20 }
 0x789   : > { %v6955_v35 = vpack.i.bf16 %v3863_v50, %v3862_v5 }
 0x78b   : > { %6896 = vrot.lane.b32.xlu0 %v6900_v15, %s7248_s23 }
 0x78c   : > { %6916 = vrot.lane.b32.xlu1 %v6915_v7, %s7251_s30 }
 0x78f   : > { %6906 = vrot.lane.b32.xlu0 %v6900_v15, %s7249_s13 }
 0x790   : > { %v3843_v16 = vpop.f32.mrb[18].mxu0  ;;  %6926 = vrot.lane.b32.xlu1 %v6915_v7, %s7253_s7 }
 0x791   : > { %v3844_v52 = vadd.f32 %v3843_v16, %v10399_v32  ;;  %v5085_v49 = vpop.f32.mrb[19].mxu0 }
 0x793   : > { %v3855_v57 = vmax.f32 %v3844_v52, 0.0  ;;  %4091 = vrot.lane.b32.xlu0 %v3859_v44, %s7250_s26 }
 0x794   : > { %6941 = vrot.lane.b32.xlu1 %v6940_v3, %s7248_s23 }
 0x795   : > { %v3864_v12 = vmul.f32 %v7180_v61, %v3855_v57 }
 0x797   : > { %3873 = vst.msk [vmem:[#allocation3 + $0x48] sm:$0xff] %vm233_vm0, %v3864_v12  ;;  %6911 = vrot.lane.b32.xlu0 %v6875_v45, %s7255_s15 }
 0x798   : > { %6946 = vrot.lane.b32.xlu1 %v6940_v3, %s7247_s17 }
 0x79b   : > { %6921 = vrot.lane.b32.xlu0 %v6915_v7, %s7252_s6 }
 0x79c   : > { %4097 = vrot.lane.b32.xlu1 %v3862_v5, %s7250_s26 }
 0x79e   : > { %v10456_v58 = vld [vmem:[#allocation3 + $0x48] sm:$0xff] }
 0x79f   : > { %6931 = vrot.lane.b32.xlu0 %v6915_v7, %s7254_s8  ;;  %v6975_v25 = vpack.i.bf16 %v10456_v58, %v3863_v50 }
 0x7a0   : > { %6956 = vrot.lane.b32.xlu1 %v6955_v35, %s7251_s30 }
 0x7a3   : > { %4095 = vrot.lane.b32.xlu0 %v3861_v20, %s7250_s26 }
 0x7a4   : > { %6966 = vrot.lane.b32.xlu1 %v6955_v35, %s7253_s7 }
 0x7a7   : > { %6936 = vrot.lane.b32.xlu0 %v6915_v7, %s7255_s15 }
 0x7a8   : > { %6976 = vrot.lane.b32.xlu1 %v6975_v25, %s7248_s23 }
 0x7ab   : > { %6951 = vrot.lane.b32.xlu0 %v6940_v3, %s7249_s13 }
 0x7ac   : > { %6986 = vrot.lane.b32.xlu1 %v6975_v25, %s7249_s13 }
 0x7af   : > { %6961 = vrot.lane.b32.xlu0 %v6955_v35, %s7252_s6 }
 0x7b0   : > { %4023 = vrot.lane.b32.xlu1 %v10456_v58, %s7252_s6 }
 0x7b3   : > { %6971 = vrot.lane.b32.xlu0 %v6955_v35, %s7254_s8 }
 0x7b4   : > { %4075 = vrot.lane.b32.xlu1 %v10456_v58, %s7254_s8  ;;  %s5700_s8 = smul.u32 1152, %s7311_s22 }
 0x7b6   : > { %s11154_s10 = scalar_lea.hbm %s11205_s5, %s5700_s8 }
 0x7b7   : > { %6981 = vrot.lane.b32.xlu0 %v6975_v25, %s7247_s17 }
 0x7b8   : > { %4101 = vrot.lane.b32.xlu1 %v10456_v58, %s7250_s26 }
 0x7bb   : > { %3997 = vrot.lane.b32.xlu0 %v10456_v58, %s7251_s30  ;;  %s215_s30 = sand.u32 1, %s7236_s19  }
 0x7bc   : > { %6991 = vrot.lane.b32.xlu1 %v6955_v35, %s7255_s15  ;;  %s5699_s6 = smul.u32 72, %s215_s30  ;;  %s4838_s22 = scalar_lea.sflag [#allocation6], %s215_s30 }
 0x7bf   : > { %4049 = vrot.lane.b32.xlu0 %v10456_v58, %s7253_s7  ;;  %s11139_s7 = scalar_lea.vmem [#allocation5], %s5699_s6 }
 0x7c3   : > { %4099 = vrot.lane.b32.xlu0 %v3863_v50, %s7250_s26 }
 0x7d5   : > { %v4086_v59 = vpop.permute.xlu0 %4085 }
 0x7d6   : > { %v10479_v48 = vpop.permute.xlu1 %4087 }
 0x7d9   : > { %v6822_v4 = vpop.permute.xlu0 %6821 }
 0x7da   : > { %v10481_v37 = vpop.permute.xlu1 %6861  ;;  %v6823_v24 = vunpack.i.l.bf16 %v6822_v4  ;;  %v6824_v19 = vunpack.i.h.bf16 %v6822_v4 }
 0x7db   : > { %v6864_v62 = vunpack.i.h.bf16 %v10481_v37  ;;  %v6863_v44 = vunpack.i.l.bf16 %v10481_v37 }
 0x7dc   : > { %v3915_v11 = vsel %vm952_vm1, %v6823_v24, %v6824_v19 }
 0x7dd   : > { %v6827_v10 = vpop.permute.xlu0 %6826  ;;  %v3914_v0 = vsel %vm952_vm1, %v6864_v62, %v6823_v24  ;;  %v3916_v53 = vsel %vm952_vm1, %v6824_v19, %v6863_v44 }
 0x7de   : > { %v10483_v27 = vpop.permute.xlu1 %6866  ;;  %v6828_v17 = vunpack.i.l.bf16 %v6827_v10  ;;  %v7005_v36 = vpack.i.bf16 %v3914_v0, %v10249_v41  ;;  %v4103_v41 = vsel %vm1148_vm7, %v4086_v59, %v10479_v48  ;;  %v6829_v38 = vunpack.i.h.bf16 %v6827_v10 }
 0x7df   : > { %v6869_v39 = vunpack.i.h.bf16 %v10483_v27  ;;  %v6868_v20 = vunpack.i.l.bf16 %v10483_v27  ;;  %v7015_v63 = vpack.i.bf16 %v3916_v53, %v3915_v11 }
 0x7e0   : > { %v3944_v5 = vsel %vm982_vm3, %v6828_v17, %v6829_v38 }
 0x7e1   : > { %v6832_v2 = vpop.permute.xlu0 %6831  ;;  %v3943_v22 = vsel %vm982_vm3, %v6869_v39, %v6828_v17  ;;  %v3945_v50 = vsel %vm982_vm3, %v6829_v38, %v6868_v20 }
 0x7e2   : > { %v10485_v28 = vpop.permute.xlu1 %6871  ;;  %v6833_v47 = vunpack.i.l.bf16 %v6832_v2  ;;  %v6834_v45 = vunpack.i.h.bf16 %v6832_v2 }
 0x7e3   : > { %v6874_v23 = vunpack.i.h.bf16 %v10485_v28  ;;  %v6873_v1 = vunpack.i.l.bf16 %v10485_v28 }
 0x7e4   : > { %v3973_v33 = vsel %vm1012_vm2, %v6833_v47, %v6834_v45 }
 0x7e5   : > { %v6837_v60 = vpop.permute.xlu0 %6836  ;;  %v3972_v8 = vsel %vm1012_vm2, %v6874_v23, %v6833_v47  ;;  %v3974_v7 = vsel %vm1012_vm2, %v6834_v45, %v6873_v1 }
 0x7e6   : > { %v10487_v18 = vpop.permute.xlu1 %6876  ;;  %v6838_v13 = vunpack.i.l.bf16 %v6837_v60  ;;  %v7010_v15 = vpack.i.bf16 %v3972_v8, %v3943_v22  ;;  %v6839_v30 = vunpack.i.h.bf16 %v6837_v60  ;;  %v7025_v3 = vpack.i.bf16 %v3974_v7, %v3973_v33 }
 0x7e7   : > { %v6878_v29 = vunpack.i.l.bf16 %v10487_v18 }
 0x7e8   : > { %v3999_v52 = vsel %vm1040_vm4, %v6838_v13, %v6839_v30 }
 0x7e9   : > { %v10489_v46 = vpop.permute.xlu0 %6841  ;;  %v4000_v49 = vsel %vm1040_vm4, %v6839_v30, %v6878_v29 }
 0x7ea   : > { %v6843_v42 = vunpack.i.l.bf16 %v10489_v46  ;;  %v10492_v40 = vpop.permute.xlu1 %6881  ;;  %v6844_v35 = vunpack.i.h.bf16 %v10489_v46  ;;  %v7030_v4 = vpack.i.bf16 %v4000_v49, %v3999_v52 }
 0x7eb   : > { %v6883_v16 = vunpack.i.l.bf16 %v10492_v40  ;;  %v6884_v38 = vunpack.i.h.bf16 %v10492_v40 }
 0x7ec   : > { %v6995_v32 = vpack.i.bf16 %v6843_v42, %v6838_v13  ;;  %v4025_v10 = vsel %vm1067_vm6, %v6843_v42, %v6844_v35 }
 0x7ed   : > { %v10495_v9 = vpop.permute.xlu0 %6846  ;;  %v4026_v2 = vsel %vm1067_vm6, %v6844_v35, %v6883_v16 }
 0x7ee   : > { %6996 = vrot.lane.b32.xlu0 %v6995_v32, %s7255_s15  ;;  %v10498_v34 = vpop.permute.xlu1 %6886  ;;  %v6848_v21 = vunpack.i.l.bf16 %v10495_v9  ;;  %v6849_v28 = vunpack.i.h.bf16 %v10495_v9  ;;  %v7035_v42 = vpack.i.bf16 %v4026_v2, %v4025_v10 }
 0x7ef   : > { %v6888_v60 = vunpack.i.l.bf16 %v10498_v34 }
 0x7f0   : > { %v4051_v23 = vsel %vm1094_vm8, %v6848_v21, %v6849_v28 }
 0x7f1   : > { %v6852_v54 = vpop.permute.xlu0 %6851 }
 0x7f2   : > { %v6853_v31 = vunpack.i.l.bf16 %v6852_v54  ;;  %4280 = vrot.lane.b32.xlu0 %v4086_v59, %s7255_s15  ;;  %v10504_v56 = vpop.permute.xlu1 %6891  ;;  %v6854_v57 = vunpack.i.h.bf16 %v6852_v54  ;;  %v7020_v59 = vpack.i.bf16 %v3945_v50, %v3944_v5  ;;  %v4052_v54 = vsel %vm1094_vm8, %v6849_v28, %v6888_v60 }
 0x7f3   : > { %v6893_v61 = vunpack.i.l.bf16 %v10504_v56  ;;  %v7040_v9 = vpack.i.bf16 %v4052_v54, %v4051_v23  ;;  %v4027_v5 = vsel %vm1067_vm6, %v6883_v16, %v6884_v38 }
 0x7f4   : > { %v7000_v55 = vpack.i.bf16 %v6853_v31, %v6848_v21  ;;  %v4077_v46 = vsel %vm1121_vm5, %v6853_v31, %v6854_v57 }
 0x7f5   : > { %v10513_v51 = vpop.permute.xlu0 %6856  ;;  %v4078_v13 = vsel %vm1121_vm5, %v6854_v57, %v6893_v61 }
 0x7f6   : > { %7001 = vrot.lane.b32.xlu1 %v7000_v55, %s7255_s15  ;;  %v10516_v6 = vpop.permute.xlu1 %6901  ;;  %7006 = vrot.lane.b32.xlu0 %v7005_v36, %s7255_s15  ;;  %v7045_v47 = vpack.i.bf16 %v4078_v13, %v4077_v46  ;;  %v6859_v8 = vunpack.i.h.bf16 %v10513_v51 }
 0x7f7   : > { %v6904_v22 = vunpack.i.h.bf16 %v10516_v6  ;;  %v6903_v53 = vunpack.i.l.bf16 %v10516_v6 }
 0x7f9   : > { %v10530_v43 = vpop.permute.xlu0 %4089 }
 0x7fa   : > { %v10532_v14 = vpop.permute.xlu1 %4093  ;;  %7011 = vrot.lane.b32.xlu1 %v7010_v15, %s7255_s15  ;;  %4282 = vrot.lane.b32.xlu0 %v4103_v41, %s7255_s15  ;;  %v4104_v15 = vsel %vm1148_vm7, %v10479_v48, %v10530_v43  ;;  %v6894_v48 = vunpack.i.h.bf16 %v10504_v56 }
 0x7fc   : > { %v4079_v27 = vsel %vm1121_vm5, %v6893_v61, %v6894_v48  ;;  %v6889_v61 = vunpack.i.h.bf16 %v10498_v34 }
 0x7fd   : > { %v10547_v12 = vpop.permute.xlu0 %6896 }
 0x7fe   : > { %v10549_v25 = vpop.permute.xlu1 %6916  ;;  %7026 = vrot.lane.b32.xlu0 %v7025_v3, %s7255_s15  ;;  %7016 = vrot.lane.b32.xlu1 %v7015_v63, %s7255_s15  ;;  %v6899_v36 = vunpack.i.h.bf16 %v10547_v12  ;;  %v6898_v55 = vunpack.i.l.bf16 %v10547_v12  ;;  %v3947_v3 = vsel %vm982_vm3, %v6903_v53, %v6904_v22 }
 0x7ff   : > { %v6918_v35 = vunpack.i.l.bf16 %v10549_v25 }
 0x800   : > { %v3917_v33 = vsel %vm952_vm1, %v6863_v44, %v6898_v55  ;;  %v3918_v40 = vsel %vm952_vm1, %v6898_v55, %v6899_v36  ;;  %v3946_v44 = vsel %vm982_vm3, %v6868_v20, %v6903_v53 }
 0x801   : > { %v10561_v32 = vpop.permute.xlu0 %6906  ;;  %v7050_v50 = vpack.i.bf16 %v3918_v40, %v3917_v33  ;;  %v7055_v20 = vpack.i.bf16 %v3947_v3, %v3946_v44 }
 0x802   : > { %v6909_v24 = vunpack.i.h.bf16 %v10561_v32  ;;  %v6908_v62 = vunpack.i.l.bf16 %v10561_v32  ;;  %v10565_v0 = vpop.permute.xlu1 %6926  ;;  %7031 = vrot.lane.b32.xlu0 %v7030_v4, %s7255_s15  ;;  %7021 = vrot.lane.b32.xlu1 %v7020_v59, %s7255_s15  ;;  %v6879_v59 = vunpack.i.h.bf16 %v10487_v18 }
 0x803   : > { %v6928_v2 = vunpack.i.l.bf16 %v10565_v0 }
 0x804   : > { %v3975_v31 = vsel %vm1012_vm2, %v6873_v1, %v6908_v62  ;;  %v3976_v17 = vsel %vm1012_vm2, %v6908_v62, %v6909_v24  ;;  %v4002_v10 = vsel %vm1040_vm4, %v6879_v59, %v6918_v35  ;;  %v4001_v56 = vsel %vm1040_vm4, %v6878_v29, %v6879_v59 }
 0x805   : > { %v10579_v39 = vpop.permute.xlu0 %4091  ;;  %v7060_v21 = vpack.i.bf16 %v3976_v17, %v3975_v31  ;;  %v7065_v62 = vpack.i.bf16 %v4002_v10, %v4001_v56  ;;  %v4053_v31 = vsel %vm1094_vm8, %v6888_v60, %v6889_v61 }
 0x806   : > { %v10581_v19 = vpop.permute.xlu1 %6941  ;;  %7046 = vrot.lane.b32.xlu0 %v7045_v47, %s7255_s15  ;;  %7036 = vrot.lane.b32.xlu1 %v7035_v42, %s7255_s15  ;;  %v4054_v42 = vsel %vm1094_vm8, %v6889_v61, %v6928_v2  ;;  %v4106_v23 = vsel %vm1148_vm7, %v10579_v39, %v10532_v14 }
 0x807   : > { %v7075_v17 = vpack.i.bf16 %v4054_v42, %v4053_v31  ;;  %v6943_v34 = vunpack.i.l.bf16 %v10581_v19  ;;  %v6944_v60 = vunpack.i.h.bf16 %v10581_v19 }
 0x809   : > { %v10587_v45 = vpop.permute.xlu0 %6911  ;;  %v3919_v32 = vsel %vm952_vm1, %v6899_v36, %v6943_v34 }
 0x80a   : > { %v6913_v1 = vunpack.i.l.bf16 %v10587_v45  ;;  %v10591_v41 = vpop.permute.xlu1 %6946  ;;  %7061 = vrot.lane.b32.xlu0 %v7060_v21, %s7255_s15  ;;  %7041 = vrot.lane.b32.xlu1 %v7040_v9, %s7255_s15  ;;  %v6914_v54 = vunpack.i.h.bf16 %v10587_v45 }
 0x80b   : > { %v6949_v44 = vunpack.i.h.bf16 %v10591_v41  ;;  %v6948_v3 = vunpack.i.l.bf16 %v10591_v41 }
 0x80c   : > { %v10602_v11 = vsel %vm1344_vm9, %v6859_v8, %v6913_v1 }
 0x80d   : > { %v10614_v7 = vpop.permute.xlu0 %6921 }
 0x80e   : > { %v6923_v30 = vunpack.i.l.bf16 %v10614_v7  ;;  %v10617_v63 = vpop.permute.xlu1 %4097  ;;  %4284 = vrot.lane.b32.xlu1 %v4104_v15, %s7255_s15  ;;  %v6924_v15 = vunpack.i.h.bf16 %v10614_v7 }
 0x810   : > { %v4028_v37 = vsel %vm1067_vm6, %v6884_v38, %v6923_v30  ;;  %v4029_v7 = vsel %vm1067_vm6, %v6923_v30, %v6924_v15 }
 0x811   : > { %v7070_v52 = vpack.i.bf16 %v4028_v37, %v4027_v5  ;;  %v10630_v49 = vpop.permute.xlu0 %6931  ;;  %v4105_v5 = vsel %vm1148_vm7, %v10530_v43, %v10579_v39 }
 0x812   : > { %v6933_v16 = vunpack.i.l.bf16 %v10630_v49  ;;  %v10633_v57 = vpop.permute.xlu1 %6956  ;;  %7051 = vrot.lane.b32.xlu1 %v7050_v50, %s7255_s15  ;;  %v6934_v43 = vunpack.i.h.bf16 %v10630_v49 }
 0x813   : > { %7071 = vrot.lane.b32.xlu0 %v7070_v52, %s7255_s15 }
 0x814   : > { %v4080_v4 = vsel %vm1121_vm5, %v6894_v48, %v6933_v16 }
 0x815   : > { %v7080_v28 = vpack.i.bf16 %v4080_v4, %v4079_v27  ;;  %v10646_v46 = vpop.permute.xlu0 %4095  ;;  %v4081_v27 = vsel %vm1121_vm5, %v6933_v16, %v6934_v43  ;;  %v6958_v4 = vunpack.i.l.bf16 %v10633_v57 }
 0x816   : > { %v10648_v13 = vpop.permute.xlu1 %6966  ;;  %7056 = vrot.lane.b32.xlu1 %v7055_v20, %s7255_s15  ;;  %v4107_v12 = vsel %vm1148_vm7, %v10532_v14, %v10646_v46  ;;  %v3948_v14 = vsel %vm982_vm3, %v6904_v22, %v6948_v3  ;;  %v3949_v20 = vsel %vm982_vm3, %v6948_v3, %v6949_v44 }
 0x817   : > { %7081 = vrot.lane.b32.xlu0 %v7080_v28, %s7255_s15  ;;  %v6919_v28 = vunpack.i.h.bf16 %v10549_v25  ;;  %v7090_v16 = vpack.i.bf16 %v3949_v20, %v3948_v14  ;;  %v6968_v22 = vunpack.i.l.bf16 %v10648_v13  ;;  %v6959_v20 = vunpack.i.h.bf16 %v10633_v57 }
 0x819   : > { %v10659_v47 = vpop.permute.xlu0 %6936  ;;  %v4004_v6 = vsel %vm1040_vm4, %v6919_v28, %v6958_v4  ;;  %v4003_v42 = vsel %vm1040_vm4, %v6918_v35, %v6919_v28 }
 0x81a   : > { %v6938_v18 = vunpack.i.l.bf16 %v10659_v47  ;;  %v10666_v29 = vpop.permute.xlu1 %6976  ;;  %7066 = vrot.lane.b32.xlu1 %v7065_v62, %s7255_s15 }
 0x81b   : > { %4288 = vrot.lane.b32.xlu0 %v4106_v23, %s7255_s15  ;;  %v4108_v23 = vsel %vm1148_vm7, %v10646_v46, %v10617_v63  ;;  %v6979_v31 = vunpack.i.h.bf16 %v10666_v29 }
 0x81c   : > { %v10678_v9 = vsel %vm1344_vm9, %v6914_v54, %v6938_v18 }
 0x81d   : > { %v10680_v21 = vpop.permute.xlu0 %6951 }
 0x81e   : > { %v6954_v55 = vunpack.i.h.bf16 %v10680_v21  ;;  %v6953_v38 = vunpack.i.l.bf16 %v10680_v21  ;;  %v10684_v53 = vpop.permute.xlu1 %6986  ;;  %7076 = vrot.lane.b32.xlu1 %v7075_v17, %s7255_s15  ;;  %v6978_v17 = vunpack.i.l.bf16 %v10666_v29 }
 0x81f   : > { %v6989_v25 = vunpack.i.h.bf16 %v10684_v53 }
 0x820   : > { %v3977_v33 = vsel %vm1012_vm2, %v6909_v24, %v6953_v38  ;;  %v3978_v40 = vsel %vm1012_vm2, %v6953_v38, %v6954_v55  ;;  %v3920_v24 = vsel %vm952_vm1, %v6943_v34, %v6944_v60  ;;  %v6929_v34 = vunpack.i.h.bf16 %v10565_v0 }
 0x821   : > { %v7095_v48 = vpack.i.bf16 %v3978_v40, %v3977_v33  ;;  %v10699_v50 = vpop.permute.xlu0 %6961  ;;  %v7085_v49 = vpack.i.bf16 %v3920_v24, %v3919_v32  ;;  %v7100_v33 = vpack.i.bf16 %v4004_v6, %v4003_v42  ;;  %v6988_v0 = vunpack.i.l.bf16 %v10684_v53 }
 0x822   : > { %v6963_v37 = vunpack.i.l.bf16 %v10699_v50  ;;  %v10702_v19 = vpop.permute.xlu1 %4023  ;;  %4286 = vrot.lane.b32.xlu1 %v4105_v5, %s7255_s15  ;;  %v4056_v46 = vsel %vm1094_vm8, %v6929_v34, %v6968_v22  ;;  %v3921_v5 = vsel %vm952_vm1, %v6944_v60, %v6978_v17  ;;  %v4055_v24 = vsel %vm1094_vm8, %v6928_v2, %v6929_v34 }
 0x823   : > { %7096 = vrot.lane.b32.xlu0 %v7095_v48, %s7255_s15  ;;  %v3922_v48 = vsel %vm952_vm1, %v6978_v17, %v6979_v31  ;;  %v6964_v3 = vunpack.i.h.bf16 %v10699_v50  ;;  %v3980_v53 = vsel %vm1012_vm2, %v6988_v0, %v6989_v25 }
 0x824   : > { %v4030_v39 = vsel %vm1067_vm6, %v6924_v15, %v6963_v37  ;;  %v6939_v15 = vunpack.i.h.bf16 %v10659_v47 }
 0x825   : > { %v7105_v36 = vpack.i.bf16 %v4030_v39, %v4029_v7  ;;  %v10720_v52 = vpop.permute.xlu0 %6971  ;;  %v7110_v7 = vpack.i.bf16 %v4056_v46, %v4055_v24 }
 0x826   : > { %v6973_v59 = vunpack.i.l.bf16 %v10720_v52  ;;  %v10723_v30 = vpop.permute.xlu1 %4075  ;;  %4290 = vrot.lane.b32.xlu1 %v4107_v12, %s7255_s15 }
 0x827   : > { %7106 = vrot.lane.b32.xlu0 %v7105_v36, %s7255_s15  ;;  %v7120_v36 = vpack.i.bf16 %v6979_v31, %v10456_v58  ;;  %v3979_v58 = vsel %vm1012_vm2, %v6954_v55, %v6988_v0  ;;  %v4005_v55 = vsel %vm1040_vm4, %v6958_v4, %v6959_v20 }
 0x828   : > { %v4082_v41 = vsel %vm1121_vm5, %v6934_v43, %v6973_v59  ;;  %v7135_v43 = vpack.i.bf16 %v3922_v48, %v3921_v5 }
 0x829   : > { %v7115_v10 = vpack.i.bf16 %v4082_v41, %v4081_v27  ;;  %v6982_v56 = vpop.permute.xlu0 %6981  ;;  %v4032_v27 = vsel %vm1067_vm6, %v6964_v3, %v10702_v19 }
 0x82a   : > { %v10737_v61 = vpop.permute.xlu1 %4101  ;;  %7086 = vrot.lane.b32.xlu1 %v7085_v49, %s7255_s15  ;;  %v6984_v62 = vunpack.i.h.bf16 %v6982_v56  ;;  %v6983_v32 = vunpack.i.l.bf16 %v6982_v56  ;;  %v4031_v49 = vsel %vm1067_vm6, %v6963_v37, %v6964_v3 }
 0x82b   : > { %7116 = vrot.lane.b32.xlu0 %v7115_v10, %s7255_s15  ;;  %v7155_v50 = vpack.i.bf16 %v4032_v27, %v4031_v49  ;;  %v7145_v10 = vpack.i.bf16 %v3980_v53, %v3979_v58 }
 0x82c   : > { %v7125_v40 = vpack.i.bf16 %v6989_v25, %v6984_v62  ;;  %v3951_v12 = vsel %vm982_vm3, %v6983_v32, %v6984_v62  ;;  %v3950_v60 = vsel %vm982_vm3, %v6949_v44, %v6983_v32  ;;  %v6969_v44 = vunpack.i.h.bf16 %v10648_v13 }
 0x82d   : > { %v3998_v39 = vpop.permute.xlu0 %3997  ;;  %v7140_v2 = vpack.i.bf16 %v3951_v12, %v3950_v60  ;;  %v6858_v25 = vunpack.i.l.bf16 %v10513_v51 }
 0x82e   : > { %v10753_v38 = vpop.permute.xlu1 %6991  ;;  %7091 = vrot.lane.b32.xlu1 %v7090_v16, %s7255_s15  ;;  %v7130_v14 = vpack.i.bf16 %v10702_v19, %v3998_v39  ;;  %v4057_v13 = vsel %vm1094_vm8, %v6968_v22, %v6969_v44  ;;  %v6974_v19 = vunpack.i.h.bf16 %v10720_v52  ;;  %v4006_v21 = vsel %vm1040_vm4, %v6959_v20, %v3998_v39  ;;  %v4938_v52 = vld [vmem:[%s11204_s4 + $0x18] sm:$0xff] }
 0x82f   : > { %v6993_v35 = vunpack.i.l.bf16 %v10753_v38  ;;  %4292 = vrot.lane.b32.xlu0 %v4108_v23, %s7255_s15  ;;  %v7150_v56 = vpack.i.bf16 %v4006_v21, %v4005_v55  ;;  %v4301_v32 = vsel %vm1344_vm9, %v6858_v25, %v6859_v8 }
 0x830   : > { %v4083_v16 = vsel %vm1121_vm5, %v6973_v59, %v6974_v19  ;;  %v4084_v6 = vsel %vm1121_vm5, %v6974_v19, %v10723_v30 }
 0x831   : > { %v10767_v29 = vsel %vm1344_vm9, %v6939_v15, %v6993_v35  ;;  %v4050_v41 = vpop.permute.xlu0 %4049  ;;  %v7170_v57 = vpack.i.bf16 %v4084_v6, %v4083_v16 }
 0x832   : > { %7101 = vrot.lane.b32.xlu1 %v7100_v33, %s7255_s15  ;;  %v4058_v37 = vsel %vm1094_vm8, %v6969_v44, %v4050_v41  ;;  %v7165_v22 = vpack.i.bf16 %v10723_v30, %v4050_v41 }
 0x833   : > { %7126 = vrot.lane.b32.xlu0 %v7125_v40, %s7255_s15  ;;  %v7160_v28 = vpack.i.bf16 %v4058_v37, %v4057_v13 }
 0x835   : > { %v4100_v62 = vpop.permute.xlu0 %4099 }
 0x836   : > { %7111 = vrot.lane.b32.xlu1 %v7110_v7, %s7255_s15  ;;  %v4110_v4 = vsel %vm1148_vm7, %v4100_v62, %v10737_v61  ;;  %v4109_v59 = vsel %vm1148_vm7, %v10617_v63, %v4100_v62 }
 0x837   : > { %7136 = vrot.lane.b32.xlu0 %v7135_v43, %s7255_s15 }
 0x83a   : > { %7121 = vrot.lane.b32.xlu1 %v7120_v36, %s7255_s15 }
 0x83b   : > { %7141 = vrot.lane.b32.xlu0 %v7140_v2, %s7255_s15 }
 0x83e   : > { %7131 = vrot.lane.b32.xlu1 %v7130_v14, %s7255_s15 }
 0x83f   : > { %7156 = vrot.lane.b32.xlu0 %v7155_v50, %s7255_s15 }
 0x842   : > { %7146 = vrot.lane.b32.xlu1 %v7145_v10, %s7255_s15 }
 0x843   : > { %7161 = vrot.lane.b32.xlu0 %v7160_v28, %s7255_s15 }
 0x846   : > { %7151 = vrot.lane.b32.xlu1 %v7150_v56, %s7255_s15 }
 0x847   : > { %7166 = vrot.lane.b32.xlu0 %v7165_v22, %s7255_s15 }
 0x84a   : > { %7171 = vrot.lane.b32.xlu1 %v7170_v57, %s7255_s15 }
 0x84b   : > { %4296 = vrot.lane.b32.xlu0 %v4110_v4, %s7255_s15 }
 0x84e   : > { %4294 = vrot.lane.b32.xlu1 %v4109_v59, %s7255_s15 }
 0x84f   : > { %4117 = vperm.xlu0 %6108, %v4938_v52  }
 0x852   : > { %4298 = vrot.lane.b32.xlu1 %v10737_v61, %s7255_s15  ;;  %s4852_s15 = sshll.u32 %s11139_s7, 4  ;;  %s11156_s15 = int_to_ptr.vmem [resolvable:$true] %s4852_s15 }
 0x853   : > { %s7182_s11 = scalar_lea.vmem %s11156_s15, 1152  ;;  %p7189_p0 = scmp.lt.s32.totalorder %s11156_s15, %s7187_s14 }
 0x854   : > { %p7183_p11 = scmp.ne.s32.totalorder %s11156_s15, %s7182_s11  ;;  %p7190_p1 = scmp.lt.s32.totalorder %s7188_s25, %s7182_s11 }
 0x856   : > { %p7184_p12 = pnand %p7183_p11, %p7328_p5  ;;  %p7191_p2 = por %p7190_p1, %p7189_p0 }
 0x858   : > { %p7185_p13 = pneg %p7184_p12 }
 0x85a   : > { %p7192_p3 = pnand %p7191_p2, %p7185_p13 }
 0x860   : > { %v6997_v30 = vpop.permute.xlu0 %6996 }
 0x861   : > { %v6998_v53 = vunpack.i.l.bf16 %v6997_v30  ;;  %v6999_v13 = vunpack.i.h.bf16 %v6997_v30 }
 0x864   : > { %v10828_v42 = vpop.permute.xlu0 %4280 }
 0x868   : > { %v7002_v23 = vpop.permute.xlu1 %7001  ;;  %v7007_v31 = vpop.permute.xlu0 %7006 }
 0x869   : > { %v7008_v33 = vunpack.i.l.bf16 %v7007_v31  ;;  %v7009_v40 = vunpack.i.h.bf16 %v7007_v31  ;;  %v7004_v52 = vunpack.i.h.bf16 %v7002_v23  ;;  %v7003_v59 = vunpack.i.l.bf16 %v7002_v23 }
 0x86b   : > { %v4300_v48 = vsel %vm1344_vm9, %v7008_v33, %v6858_v25 }
 0x86c   : > { %v7012_v17 = vpop.permute.xlu1 %7011  ;;  %v10830_v34 = vpop.permute.xlu0 %4282 }
 0x86d   : > { %v7014_v0 = vunpack.i.h.bf16 %v7012_v17  ;;  %v7013_v51 = vunpack.i.l.bf16 %v7012_v17 }
 0x870   : > { %v10833_v46 = vpop.permute.xlu0 %7026  ;;  %v10835_v63 = vpop.permute.xlu1 %7016 }
 0x871   : > { %v7019_v5 = vunpack.i.h.bf16 %v10835_v63  ;;  %v7018_v61 = vunpack.i.l.bf16 %v10835_v63  ;;  %v7029_v24 = vunpack.i.h.bf16 %v10833_v46  ;;  %v7028_v7 = vunpack.i.l.bf16 %v10833_v46  ;;  %v10934_v63 = vld [vmem:[#allocation2] sm:$0xff] }
 0x873   : > { %v4309_v43 = vsel %vm1344_vm9, %v7009_v40, %v7018_v61  ;;  %v4310_v39 = vsel %vm1344_vm9, %v7018_v61, %v7019_v5  ;;  %v4327_v41 = vsel %vm1344_vm9, %v7014_v0, %v7028_v7  ;;  %v4328_v58 = vsel %vm1344_vm9, %v7028_v7, %v7029_v24  ;;  %v10909_v0 = vld [vmem:[%s11203_s3 + $0x18] sm:$0xff] }
 0x874   : > { %v5625_v3 = vpack.c.bf16 %v4309_v43, %v4300_v48  ;;  %v10849_v12 = vpop.permute.xlu0 %7031  ;;  %v10851_v60 = vpop.permute.xlu1 %7021  ;;  %v5623_v36 = vpack.c.bf16 %v4310_v39, %v4301_v32 }
 0x875   : > { %v7024_v8 = vunpack.i.h.bf16 %v10851_v60  ;;  %v7023_v2 = vunpack.i.l.bf16 %v10851_v60  ;;  %v7034_v49 = vunpack.i.h.bf16 %v10849_v12  ;;  %v7033_v27 = vunpack.i.l.bf16 %v10849_v12 }
 0x876   : > { %5624 = vmatprep.subr.bf16.mxu1 %v5623_v36 }
 0x877   : > { %v4318_v44 = vsel %vm1344_vm9, %v7013_v51, %v7023_v2  ;;  %5626 = vmatpush1.bf16.msra.mxu1 %v5625_v3  ;;  %v4319_v14 = vsel %vm1344_vm9, %v7023_v2, %v7024_v8  ;;  %v4336_v28 = vsel %vm1344_vm9, %v6998_v53, %v7033_v27  ;;  %v4337_v55 = vsel %vm1344_vm9, %v7033_v27, %v7034_v49 }
 0x878   : > { %v5629_v50 = vpack.c.bf16 %v4327_v41, %v4318_v44  ;;  %v10865_v37 = vpop.permute.xlu0 %7046  ;;  %v10867_v20 = vpop.permute.xlu1 %7036  ;;  %v5627_v10 = vpack.c.bf16 %v4328_v58, %v4319_v14  ;;  %v4372_v51 = vsel %vm1344_vm9, %v10828_v42, %v10830_v34  ;;  %v4303_v2 = vsel %vm1344_vm9, %v6913_v1, %v6914_v54 }
 0x879   : > { %v7039_v19 = vunpack.i.h.bf16 %v10867_v20  ;;  %v7038_v21 = vunpack.i.l.bf16 %v10867_v20  ;;  %v7049_v56 = vunpack.i.h.bf16 %v10865_v37  ;;  %v7048_v16 = vunpack.i.l.bf16 %v10865_v37 }
 0x87a   : > { %5628 = vmatprep.subr.bf16.mxu1 %v5627_v10 }
 0x87b   : > { %v4345_v6 = vsel %vm1344_vm9, %v6999_v13, %v7038_v21  ;;  %5630 = vmatpush1.bf16.msra.mxu1 %v5629_v50  ;;  %v4346_v22 = vsel %vm1344_vm9, %v7038_v21, %v7039_v19  ;;  %v4363_v17 = vsel %vm1344_vm9, %v7004_v52, %v7048_v16  ;;  %v4364_v40 = vsel %vm1344_vm9, %v7048_v16, %v7049_v56 }
 0x87c   : > { %v5633_v62 = vpack.c.bf16 %v4345_v6, %v4336_v28  ;;  %v10881_v57 = vpop.permute.xlu1 %7041  ;;  %v5631_v4 = vpack.c.bf16 %v4346_v22, %v4337_v55  ;;  %v10895_v32 = vpop.permute.xlu0 %7061 }
 0x87d   : > { %v7044_v30 = vunpack.i.h.bf16 %v10881_v57  ;;  %v7043_v31 = vunpack.i.l.bf16 %v10881_v57  ;;  %v7064_v27 = vunpack.i.h.bf16 %v10895_v32  ;;  %v7063_v41 = vunpack.i.l.bf16 %v10895_v32 }
 0x87e   : > { %5632 = vmatprep.subr.bf16.mxu1 %v5631_v4 }
 0x87f   : > { %v4354_v25 = vsel %vm1344_vm9, %v7003_v59, %v7043_v31  ;;  %5634 = vmatpush1.bf16.msra.mxu1 %v5633_v62  ;;  %v4355_v33 = vsel %vm1344_vm9, %v7043_v31, %v7044_v30  ;;  %v4330_v13 = vsel %vm1344_vm9, %v7063_v41, %v7064_v27 }
 0x880   : > { %v5637_v61 = vpack.c.bf16 %v4363_v17, %v4354_v25  ;;  %v10893_v23 = vpop.permute.xlu1 %4284  ;;  %v5635_v48 = vpack.c.bf16 %v4364_v40, %v4355_v33 }
 0x881   : > { %v4373_v7 = vsel %vm1344_vm9, %v10830_v34, %v10893_v23 }
 0x882   : > { %5636 = vmatprep.subr.bf16.mxu1 %v5635_v48 }
 0x883   : > { %5638 = vmatpush1.bf16.msra.mxu1 %v5637_v61 }
 0x884   : > { %v10900_v43 = vpop.permute.xlu1 %7051  ;;  %4481 = vmatprep.subr.mxu1 %v4373_v7 }
 0x885   : > { %v7054_v39 = vunpack.i.h.bf16 %v10900_v43  ;;  %v7053_v3 = vunpack.i.l.bf16 %v10900_v43  ;;  %v10904_v36 = vpop.permute.xlu0 %7071 }
 0x886   : > { %v7073_v58 = vunpack.i.l.bf16 %v10904_v36 }
 0x887   : > { %v4311_v44 = vsel %vm1344_vm9, %v7019_v5, %v7053_v3  ;;  %4482 = vmatpush1.msra.mxu1 %v4372_v51  ;;  %v4312_v14 = vsel %vm1344_vm9, %v7053_v3, %v7054_v39  ;;  %v7074_v5 = vunpack.i.h.bf16 %v10904_v36 }
 0x888   : > { %v5641_v42 = vpack.c.bf16 %v4311_v44, %v10602_v11  ;;  %v10928_v34 = vpop.permute.xlu1 %7056  ;;  %4939 = vmatmul.mubr.msk.f32.vlgmr.msra.gmra.mrb[20].mxu1 %vm1507_vm10, %v10909_v0  ;;  %v5639_v45 = vpack.c.bf16 %v4312_v14, %v4303_v2  ;;  %v4329_v11 = vsel %vm1344_vm9, %v7029_v24, %v7063_v41  ;;  %v4305_v41 = vsel %vm1344_vm9, %v6938_v18, %v6939_v15 }
 0x889   : > { %v7059_v1 = vunpack.i.h.bf16 %v10928_v34  ;;  %v7058_v54 = vunpack.i.l.bf16 %v10928_v34  ;;  %4671 = vmatprep.mubr.f32.mxu1 %v10934_v63  ;;  %v10945_v50 = vpop.permute.xlu0 %7081  ;;  %v4348_v55 = vsel %vm1344_vm9, %v7073_v58, %v7074_v5 }
 0x88a   : > { %5640 = vmatprep.subr.bf16.mxu0 %v5639_v45  ;;  %v7084_v16 = vunpack.i.h.bf16 %v10945_v50  ;;  %v7083_v6 = vunpack.i.l.bf16 %v10945_v50 }
 0x88b   : > { %v4320_v53 = vsel %vm1344_vm9, %v7024_v8, %v7058_v54  ;;  %5642 = vmatpush1.bf16.msra.mxu0 %v5641_v42  ;;  %v4321_v10 = vsel %vm1344_vm9, %v7058_v54, %v7059_v1  ;;  %v4347_v8 = vsel %vm1344_vm9, %v7039_v19, %v7073_v58 }
 0x88c   : > { %v5645_v21 = vpack.c.bf16 %v4329_v11, %v4320_v53  ;;  %v10953_v28 = vpop.permute.xlu1 %7066  ;;  %v5643_v46 = vpack.c.bf16 %v4330_v13, %v4321_v10  ;;  %v4365_v12 = vsel %vm1344_vm9, %v7049_v56, %v7083_v6  ;;  %v4366_v25 = vsel %vm1344_vm9, %v7083_v6, %v7084_v16 }
 0x88d   : > { %v7069_v24 = vunpack.i.h.bf16 %v10953_v28  ;;  %v7068_v60 = vunpack.i.l.bf16 %v10953_v28  ;;  %v10973_v52 = vpop.permute.xlu0 %4288 }
 0x88e   : > { %5644 = vmatprep.subr.bf16.mxu0 %v5643_v46 }
 0x88f   : > { %v4338_v22 = vsel %vm1344_vm9, %v7034_v49, %v7068_v60  ;;  %5646 = vmatpush1.bf16.msra.mxu0 %v5645_v21  ;;  %v4339_v20 = vsel %vm1344_vm9, %v7068_v60, %v7069_v24 }
 0x890   : > { %v5649_v62 = vpack.c.bf16 %v4347_v8, %v4338_v22  ;;  %v10971_v19 = vpop.permute.xlu1 %7076  ;;  %v5647_v4 = vpack.c.bf16 %v4348_v55, %v4339_v20 }
 0x891   : > { %v7079_v59 = vunpack.i.h.bf16 %v10971_v19  ;;  %v7078_v31 = vunpack.i.l.bf16 %v10971_v19 }
 0x892   : > { %5648 = vmatprep.subr.bf16.mxu0 %v5647_v4 }
 0x893   : > { %v4356_v49 = vsel %vm1344_vm9, %v7044_v30, %v7078_v31  ;;  %5650 = vmatpush1.bf16.msra.mxu0 %v5649_v62  ;;  %v4357_v17 = vsel %vm1344_vm9, %v7078_v31, %v7079_v59 }
 0x894   : > { %v5653_v33 = vpack.c.bf16 %v4365_v12, %v4356_v49  ;;  %v4287_v40 = vpop.permute.xlu1 %4286  ;;  %v5651_v61 = vpack.c.bf16 %v4366_v25, %v4357_v17 }
 0x895   : > { %v10989_v48 = vpop.permute.xlu0 %7096  ;;  %v4375_v37 = vsel %vm1344_vm9, %v4287_v40, %v10973_v52  ;;  %v4374_v30 = vsel %vm1344_vm9, %v10893_v23, %v4287_v40 }
 0x896   : > { %5652 = vmatprep.subr.bf16.mxu0 %v5651_v61  ;;  %v7099_v44 = vunpack.i.h.bf16 %v10989_v48  ;;  %v7098_v23 = vunpack.i.l.bf16 %v10989_v48 }
 0x897   : > { %5654 = vmatpush1.bf16.msra.mxu0 %v5653_v33 }
 0x898   : > { %v10993_v56 = vpop.permute.xlu1 %4290  ;;  %4552 = vmatprep.subr.mxu0 %v4375_v37  ;;  %v4331_v43 = vsel %vm1344_vm9, %v7064_v27, %v7098_v23  ;;  %v4332_v10 = vsel %vm1344_vm9, %v7098_v23, %v7099_v44 }
 0x899   : > { %v10995_v57 = vpop.permute.xlu0 %7106 }
 0x89a   : > { %v7109_v15 = vunpack.i.h.bf16 %v10995_v57  ;;  %v7108_v53 = vunpack.i.l.bf16 %v10995_v57 }
 0x89b   : > { %4553 = vmatpush1.msra.mxu0 %v4374_v30 }
 0x89c   : > { %v7087_v7 = vpop.permute.xlu1 %7086  ;;  %4940 = vmatmul.mubr.msk.f32.vlgmr.msra.gmra.mrb[20].mxu0 %vm1507_vm10, %v10909_v0  ;;  %v4349_v60 = vsel %vm1344_vm9, %v7074_v5, %v7108_v53  ;;  %v4350_v8 = vsel %vm1344_vm9, %v7108_v53, %v7109_v15 }
 0x89d   : > { %v7089_v3 = vunpack.i.h.bf16 %v7087_v7  ;;  %v7088_v51 = vunpack.i.l.bf16 %v7087_v7  ;;  %v11001_v2 = vpop.permute.xlu0 %7116  ;;  %4742 = vmatprep.mubr.f32.mxu0 %v10934_v63 }
 0x89e   : > { %v7119_v55 = vunpack.i.h.bf16 %v11001_v2  ;;  %v7118_v6 = vunpack.i.l.bf16 %v11001_v2 }
 0x89f   : > { %v4313_v14 = vsel %vm1344_vm9, %v7054_v39, %v7088_v51  ;;  %v4314_v42 = vsel %vm1344_vm9, %v7088_v51, %v7089_v3 }
 0x8a0   : > { %v5657_v45 = vpack.c.bf16 %v4313_v14, %v10678_v9  ;;  %v11016_v54 = vpop.permute.xlu1 %7091  ;;  %v5655_v58 = vpack.c.bf16 %v4314_v42, %v4305_v41  ;;  %v4368_v40 = vsel %vm1344_vm9, %v7118_v6, %v7119_v55 }
 0x8a1   : > { %v7094_v11 = vunpack.i.h.bf16 %v11016_v54  ;;  %v7093_v47 = vunpack.i.l.bf16 %v11016_v54  ;;  %v11020_v18 = vpop.permute.xlu0 %4292 }
 0x8a2   : > { %5656 = vmatprep.subr.bf16.mxu1 %v5655_v58  ;;  %v4377_v51 = vsel %vm1344_vm9, %v10993_v56, %v11020_v18 }
 0x8a3   : > { %v4322_v9 = vsel %vm1344_vm9, %v7059_v1, %v7093_v47  ;;  %5658 = vmatpush1.bf16.msra.mxu1 %v5657_v45  ;;  %v4323_v39 = vsel %vm1344_vm9, %v7093_v47, %v7094_v11  ;;  %v6994_v1 = vunpack.i.h.bf16 %v10753_v38 }
 0x8a4   : > { %v5661_v13 = vpack.c.bf16 %v4331_v43, %v4322_v9  ;;  %v11036_v21 = vpop.permute.xlu1 %7101  ;;  %v5659_v46 = vpack.c.bf16 %v4332_v10, %v4323_v39 }
 0x8a5   : > { %v7104_v32 = vunpack.i.h.bf16 %v11036_v21  ;;  %v7103_v27 = vunpack.i.l.bf16 %v11036_v21  ;;  %v11040_v34 = vpop.permute.xlu0 %7126  ;;  %v4307_v28 = vsel %vm1344_vm9, %v6993_v35, %v6994_v1 }
 0x8a6   : > { %5660 = vmatprep.subr.bf16.mxu1 %v5659_v46  ;;  %v7129_v47 = vunpack.i.h.bf16 %v11040_v34  ;;  %v7128_v53 = vunpack.i.l.bf16 %v11040_v34 }
 0x8a7   : > { %v4340_v22 = vsel %vm1344_vm9, %v7069_v24, %v7103_v27  ;;  %5662 = vmatpush1.bf16.msra.mxu1 %v5661_v13  ;;  %v4341_v36 = vsel %vm1344_vm9, %v7103_v27, %v7104_v32  ;;  %v4367_v24 = vsel %vm1344_vm9, %v7084_v16, %v7118_v6 }
 0x8a8   : > { %v5665_v20 = vpack.c.bf16 %v4349_v60, %v4340_v22  ;;  %v11057_v5 = vpop.permute.xlu1 %7111  ;;  %v5663_v62 = vpack.c.bf16 %v4350_v8, %v4341_v36 }
 0x8a9   : > { %v7114_v4 = vunpack.i.h.bf16 %v11057_v5  ;;  %v7113_v31 = vunpack.i.l.bf16 %v11057_v5  ;;  %v7137_v12 = vpop.permute.xlu0 %7136 }
 0x8aa   : > { %v7139_v49 = vunpack.i.h.bf16 %v7137_v12  ;;  %v7138_v17 = vunpack.i.l.bf16 %v7137_v12  ;;  %5664 = vmatprep.subr.bf16.mxu1 %v5663_v62 }
 0x8ab   : > { %v4358_v25 = vsel %vm1344_vm9, %v7079_v59, %v7113_v31  ;;  %5666 = vmatpush1.bf16.msra.mxu1 %v5665_v20  ;;  %v4359_v33 = vsel %vm1344_vm9, %v7113_v31, %v7114_v4 }
 0x8ac   : > { %v5669_v38 = vpack.c.bf16 %v4367_v24, %v4358_v25  ;;  %v4315_v35 = vsel %vm1344_vm9, %v7089_v3, %v7138_v17  ;;  %v7122_v61 = vpop.permute.xlu1 %7121  ;;  %v5667_v50 = vpack.c.bf16 %v4368_v40, %v4359_v33  ;;  %v4316_v16 = vsel %vm1344_vm9, %v7138_v17, %v7139_v49 }
 0x8ad   : > { %v5673_v19 = vpack.c.bf16 %v4315_v35, %v10767_v29  ;;  %v7124_v37 = vunpack.i.h.bf16 %v7122_v61  ;;  %v7123_v59 = vunpack.i.l.bf16 %v7122_v61  ;;  %v7142_v30 = vpop.permute.xlu0 %7141  ;;  %v5671_v7 = vpack.c.bf16 %v4316_v16, %v4307_v28 }
 0x8ae   : > { %5668 = vmatprep.subr.bf16.mxu1 %v5667_v50  ;;  %v4376_v29 = vsel %vm1344_vm9, %v10973_v52, %v10993_v56  ;;  %v7144_v42 = vunpack.i.h.bf16 %v7142_v30  ;;  %v7143_v45 = vunpack.i.l.bf16 %v7142_v30 }
 0x8af   : > { %5670 = vmatpush1.bf16.msra.mxu1 %v5669_v38  ;;  %5672 = vmatprep.subr.bf16.mxu0 %v5671_v7  ;;  %v4317_v41 = vsel %vm1344_vm9, %v7139_v49, %v7124_v37  ;;  %v4308_v3 = vsel %vm1344_vm9, %v6994_v1, %v7123_v59 }
 0x8b0   : > { %v7132_v23 = vpop.permute.xlu1 %7131  ;;  %4623 = vmatprep.subr.mxu1 %v4377_v51  ;;  %5674 = vmatpush1.bf16.msra.mxu0 %v5673_v19  ;;  %v5688_v58 = vpack.c.bf16 %v4317_v41, %v4308_v3  ;;  %v4324_v56 = vsel %vm1344_vm9, %v7094_v11, %v7143_v45  ;;  %v4326_v27 = vsel %vm1344_vm9, %v7144_v42, %v7128_v53 }
 0x8b1   : > { %v7157_v14 = vpop.permute.xlu0 %7156  ;;  %v7134_v43 = vunpack.i.h.bf16 %v7132_v23  ;;  %v4325_v60 = vsel %vm1344_vm9, %v7143_v45, %v7144_v42  ;;  %v7133_v6 = vunpack.i.l.bf16 %v7132_v23 }
 0x8b2   : > { %v7159_v39 = vunpack.i.h.bf16 %v7157_v14  ;;  %v7158_v10 = vunpack.i.l.bf16 %v7157_v14 }
 0x8b3   : > { %4624 = vmatpush1.msra.mxu1 %v4376_v29 }
 0x8b4   : > { %v7147_v9 = vpop.permute.xlu1 %7146  ;;  %4941 = vmatmul.mubr.msk.f32.vlgmr.msra.gmra.mrb[22].mxu1 %vm1507_vm10, %v10909_v0  ;;  %5687 = vmatprep.subr.bf16.mxu1 %v7257_v26  ;;  %v4351_v11 = vsel %vm1344_vm9, %v7109_v15, %v7158_v10  ;;  %v4353_v62 = vsel %vm1344_vm9, %v7159_v39, %v7134_v43  ;;  %v4352_v28 = vsel %vm1344_vm9, %v7158_v10, %v7159_v39 }
 0x8b5   : > { %v7149_v13 = vunpack.i.h.bf16 %v7147_v9  ;;  %v7148_v46 = vunpack.i.l.bf16 %v7147_v9  ;;  %v7162_v52 = vpop.permute.xlu0 %7161  ;;  %5689 = vmatpush3.bf16.msra.mxu1 %v5688_v58  ;;  %5104 = vmatprep.mubr.msk.f32.mxu1 %vm7258_vm11, %v10934_v63 }
 0x8b6   : > { %5690 = vmatprep.subr.bf16.mxu1 %v7257_v26  ;;  %v7164_v49 = vunpack.i.h.bf16 %v7162_v52 }
 0x8b7   : > { %v4335_v34 = vsel %vm1344_vm9, %v7149_v13, %v7129_v47  ;;  %v4333_v1 = vsel %vm1344_vm9, %v7099_v44, %v7148_v46  ;;  %v4334_v8 = vsel %vm1344_vm9, %v7148_v46, %v7149_v13  ;;  %v7163_v44 = vunpack.i.l.bf16 %v7162_v52 }
 0x8b8   : > { %v5691_v22 = vpack.c.bf16 %v4335_v34, %v4326_v27  ;;  %v5677_v36 = vpack.c.bf16 %v4333_v1, %v4324_v56  ;;  %v7152_v54 = vpop.permute.xlu1 %7151  ;;  %v5675_v20 = vpack.c.bf16 %v4334_v8, %v4325_v60 }
 0x8b9   : > { %v7154_v31 = vunpack.i.h.bf16 %v7152_v54  ;;  %v7153_v12 = vunpack.i.l.bf16 %v7152_v54  ;;  %v7167_v48 = vpop.permute.xlu0 %7166  ;;  %v4360_v21 = vsel %vm1344_vm9, %v7114_v4, %v7163_v44  ;;  %v4361_v16 = vsel %vm1344_vm9, %v7163_v44, %v7164_v49 }
 0x8ba   : > { %v7168_v17 = vunpack.i.l.bf16 %v7167_v48  ;;  %5676 = vmatprep.subr.bf16.mxu0 %v5675_v20  ;;  %5692 = vmatpush3.bf16.msra.mxu1 %v5691_v22  ;;  %v7169_v35 = vunpack.i.h.bf16 %v7167_v48 }
 0x8bb   : > { %v4342_v24 = vsel %vm1344_vm9, %v7104_v32, %v7153_v12  ;;  %v4344_v57 = vsel %vm1344_vm9, %v7154_v31, %v7133_v6  ;;  %5678 = vmatpush1.bf16.msra.mxu0 %v5677_v36  ;;  %5693 = vmatprep.subr.bf16.mxu1 %v7257_v26  ;;  %v4343_v15 = vsel %vm1344_vm9, %v7153_v12, %v7154_v31 }
 0x8bc   : > { %v5681_v25 = vpack.c.bf16 %v4351_v11, %v4342_v24  ;;  %v5694_v33 = vpack.c.bf16 %v4353_v62, %v4344_v57  ;;  %v7172_v40 = vpop.permute.xlu1 %7171  ;;  %v5679_v38 = vpack.c.bf16 %v4352_v28, %v4343_v15  ;;  %v4362_v32 = vsel %vm1344_vm9, %v7164_v49, %v7168_v17 }
 0x8bd   : > { %v7174_v61 = vunpack.i.h.bf16 %v7172_v40  ;;  %v7173_v50 = vunpack.i.l.bf16 %v7172_v40  ;;  %v4297_v51 = vpop.permute.xlu0 %4296 }
 0x8be   : > { %5680 = vmatprep.subr.bf16.mxu0 %v5679_v38  ;;  %5695 = vmatpush3.bf16.msra.mxu1 %v5694_v33 }
 0x8bf   : > { %v4371_v19 = vsel %vm1344_vm9, %v7174_v61, %v7169_v35  ;;  %v4369_v37 = vsel %vm1344_vm9, %v7119_v55, %v7173_v50  ;;  %5682 = vmatpush1.bf16.msra.mxu0 %v5681_v25  ;;  %5696 = vmatprep.subr.bf16.mxu1 %v7257_v26  ;;  %v4370_v59 = vsel %vm1344_vm9, %v7173_v50, %v7174_v61 }
 0x8c0   : > { %v5697_v5 = vpack.c.bf16 %v4371_v19, %v4362_v32  ;;  %v5685_v30 = vpack.c.bf16 %v4369_v37, %v4360_v21  ;;  %v4295_v4 = vpop.permute.xlu1 %4294  ;;  %v5683_v7 = vpack.c.bf16 %v4370_v59, %v4361_v16 }
 0x8c1   : > { %v4379_v41 = vsel %vm1344_vm9, %v4295_v4, %v4297_v51  ;;  %v4378_v55 = vsel %vm1344_vm9, %v11020_v18, %v4295_v4 }
 0x8c2   : > { %5684 = vmatprep.subr.bf16.mxu0 %v5683_v7  ;;  %5698 = vmatpush3.bf16.msra.mxu1 %v5697_v5 }
 0x8c3   : > { %5686 = vmatpush1.bf16.msra.mxu0 %v5685_v30  ;;  %5102 = vmatprep.subr.mxu1 %v10934_v63 }
 0x8c4   : > { %v4299_v2 = vpop.permute.xlu1 %4298  ;;  %4694 = vmatprep.subr.mxu0 %v4379_v41 }
 0x8c5   : > { %v4380_v26 = vsel %vm1344_vm9, %v4297_v51, %v4299_v2 }
 0x8c6   : > { %5103 = vmatpush3.msra.mxu1 %v4380_v26 }
 0x8c7   : > { %4695 = vmatpush1.msra.mxu0 %v4378_v55  ;;  %5105 = vmatmul.mubr.msk.f32.vlgmr.msra.gmra.mrb[24].mxu1 %vm1507_vm10, %v10909_v0 }
 0x8c8   : > { %4942 = vmatmul.mubr.msk.f32.vlgmr.msra.gmra.mrb[22].mxu0 %vm1507_vm10, %v10909_v0 }
 0x8ce   : > { %v4118_v3 = vpop.permute.xlu0 %4117 }
 0x95b   : > { %v4531_v63 = vpop.f32.mrb[20].mxu1 }
 0x95c   : > { %v4532_v23 = vadd.f32 %v4531_v63, %v4118_v3  ;;  %v4533_v14 = vpop.f32.mrb[21].mxu1 }
 0x95d   : > { %v4534_v29 = vadd.f32 %v4533_v14, %v4118_v3 }
 0x95e   : > { %v4819_v42 = vmax.f32 %v4532_v23, 0.0 }
 0x95f   : > { %v4820_v45 = vmax.f32 %v4534_v29, 0.0 }
 0x960   : > { %4828 = vst [vmem:[%s11139_s7] sm:$0xff] %v4819_v42 }
 0x961   : > { %4829 = vst [vmem:[%s11139_s7 + $0x8] sm:$0xff] %v4820_v45 }
 0x96f   : > { %v4602_v0 = vpop.f32.mrb[20].mxu0 }
 0x970   : > { %v4603_v18 = vadd.f32 %v4602_v0, %v4118_v3  ;;  %v4604_v58 = vpop.f32.mrb[21].mxu0 }
 0x971   : > { %v4605_v47 = vadd.f32 %v4604_v58, %v4118_v3 }
 0x972   : > { %v4821_v53 = vmax.f32 %v4603_v18, 0.0 }
 0x973   : > { %v4822_v43 = vmax.f32 %v4605_v47, 0.0 }
 0x974   : > { %4830 = vst [vmem:[%s11139_s7 + $0x10] sm:$0xff] %v4821_v53 }
 0x975   : > { %4831 = vst [vmem:[%s11139_s7 + $0x18] sm:$0xff] %v4822_v43 }
 0x987   : > { %v4673_v9 = vpop.f32.mrb[22].mxu1 }
 0x988   : > { %v4674_v39 = vadd.f32 %v4673_v9, %v4118_v3  ;;  %v4675_v10 = vpop.f32.mrb[23].mxu1 }
 0x989   : > { %v4676_v13 = vadd.f32 %v4675_v10, %v4118_v3 }
 0x98a   : > { %v4823_v46 = vmax.f32 %v4674_v39, 0.0 }
 0x98b   : > { %v4824_v52 = vmax.f32 %v4676_v13, 0.0 }
 0x98c   : > { %4832 = vst [vmem:[%s11139_s7 + $0x20] sm:$0xff] %v4823_v46 }
 0x98d   : > { %4833 = vst [vmem:[%s11139_s7 + $0x28] sm:$0xff] %v4824_v52 }
 0x99a   : > { %v4815_v56 = vpop.f32.mrb[24].mxu1 }
 0x99b   : > { %v4816_v27 = vadd.f32 %v4815_v56, %v4118_v3  ;;  %v4744_v34 = vpop.f32.mrb[22].mxu0  ;;  %v5106_v1 = vpop.f32.mrb[25].mxu1 }
 0x99c   : > { %v4745_v60 = vadd.f32 %v4744_v34, %v4118_v3  ;;  %v4746_v8 = vpop.f32.mrb[23].mxu0 }
 0x99d   : > { %v4827_v6 = vmax.f32 %v4816_v27, 0.0  ;;  %v4747_v22 = vadd.f32 %v4746_v8, %v4118_v3 }
 0x99e   : > { %v4825_v36 = vmax.f32 %v4745_v60, 0.0 }
 0x99f   : > { %4836 = vst.msk [vmem:[%s11139_s7 + $0x40] sm:$0xff] %vm233_vm0, %v4827_v6  ;;  %v4826_v54 = vmax.f32 %v4747_v22, 0.0 }
 0x9a0   : > { %4834 = vst [vmem:[%s11139_s7 + $0x30] sm:$0xff] %v4825_v36 }
 0x9a1   : > { %4835 = vst [vmem:[%s11139_s7 + $0x38] sm:$0xff] %v4826_v54 }
 0x9a2   : > { %7195 = shalt.err (!%p7192_p3)
}
 0x9a3   : > { %s7196_s17 = scalar_lea.hbm %s11154_s10, 1152  ;;  %s7200_s26 = scalar_lea.hbm %s11205_s5, 2304 }
 0x9a4   : > { %p7197_p4 = scmp.ne.s32.totalorder %s11154_s10, %s7196_s17  ;;  %p7201_p9 = scmp.lt.u32.totalorder %s11154_s10, %s11205_s5 }
 0x9a5   : > { %p7202_p10 = scmp.lt.u32.totalorder %s7200_s26, %s7196_s17  ;;  %p7204_p12 = scmp.lt.u32.totalorder %s7196_s17, %s11154_s10 }
 0x9a6   : > { %p7198_p7 = pnand %p7197_p4, %p7328_p5 }
 0x9a7   : > { %p7203_p11 = por %p7202_p10, %p7201_p9 }
 0x9a8   : > { %p7199_p8 = pneg %p7198_p7 }
 0x9a9   : > { %p7205_p13 = por %p7204_p12, %p7203_p11 }
 0x9ab   : > { %p7206_p0 = pnand %p7205_p13, %p7199_p8 }
 0x9ad   : > { %7209 = shalt.err (!%p7206_p0)
}
 0x9ae   : > { %5701 = dma.vmem_to_hbm [thread:$0]  (%p7328_p5), %s11156_s15, 1152, %s11154_s10, %s4838_s22  }
 0x9af PF: > { %p5707_p1 = scmp.ge.s32.totalorder %s7244_s21, 2  ;;  %s4864_s7 = sand.u32 1, %s7232_s18  }
 0x9b0   : > { %s4865_s8 = scalar_lea.sflag [#allocation6], %s4864_s7 }
 0x9b1   : > { %p5704_p2 = pnand %p5707_p1, %p7332_p6 }
 0x9b3   : > { %7227 = dma.done.wait (!%p5704_p2), %s4865_s8, 1152  }
 0x9b4   : > { %7229 = vsyncadd (!%p5704_p2), %s4865_s8, 4294966144  ;;  %p15_p3 = scmp.ge.s32.totalorder %s7315_s24, 4   ;;  %s11208_s18 = smov %s7236_s19 }
 0x9b5   : > { %s11209_s19 = smov %s7240_s20  ;;  %s11210_s20 = smov %s7326_s27 }
 0x9b6   : > { %s11211_s21 = smov %s7315_s24  ;;  %17 = sbr.rel (!%p15_p3) target bundleno = 3 (0x3), region = 81 }
 0x9bd   :  { %4870 = vsyncpa [#allocation6], 1 }
 0x9be   :  { %4872 = vsyncpa [#allocation6 + $0x1], 1 }

</bundles_post_ra>
